<compile_context>
chip_gen: v7x
topology: tpu7x:2x2x1
jax: 0.10.0
libtpu: 0.0.40
codegen_flags: <defaults>
</compile_context>

<pallas_src>
import jax
import jax.numpy as jnp
from jax.experimental import pallas as pl
from jax.experimental.pallas import tpu as pltpu


# ---------------------------------------------------------------------------
# Kernel 1: conv1/conv2/conv3 (1x1 convs) + global max-pool over points.
# Grid: (B, N_pad // TN).  Activations are (C, TN): channels on sublanes,
# points on lanes (NCW layout preserved, lane-dense input DMA).
# ---------------------------------------------------------------------------
def make_conv_pool_kernel(n_valid, tn, need_mask):
    def conv_pool_kernel(x_ref, w1_ref, b1_ref, w2_ref, b2_ref, w3_ref, b3_ref,
                         pooled_ref, acc_ref):
        nt = pl.program_id(1)

        # In-kernel bf16 cast: keeps the HBM stream f32 (no extra wrapper pass).
        x = x_ref[0].astype(jnp.bfloat16)                        # (k, TN)

        # conv1 + ReLU : (64, k) @ (k, TN) -> (64, TN), f32 accumulation.
        h = jnp.dot(w1_ref[...], x,
                    preferred_element_type=jnp.float32) + b1_ref[...]
        h = jnp.maximum(h, 0.0)
        # conv2 + ReLU : (128, 64) @ (64, TN) -> (128, TN).
        h = jnp.dot(w2_ref[...], h.astype(jnp.bfloat16),
                    preferred_element_type=jnp.float32) + b2_ref[...]
        h = jnp.maximum(h, 0.0)
        # conv3 : (1024, 128) @ (128, TN) -> (1024, TN).  Its ReLU is folded
        # into the pooling below (max with 0), so no full-width VPU max here.
        h = jnp.dot(w3_ref[...], h.astype(jnp.bfloat16),
                    preferred_element_type=jnp.float32) + b3_ref[...]

        if need_mask:
            # Padded point lanes must not contribute to the max (ReLU(bias)>0).
            lane = jax.lax.broadcasted_iota(jnp.int32, (1, tn), 1)
            valid = (nt * tn + lane) < n_valid
            h = jnp.where(valid, h, -jnp.inf)

        # Per-tile lane reduce on the XLU; running max is a tiny (1024, 1) f32.
        tile_max = jnp.max(h, axis=1, keepdims=True)             # (1024, 1)

        @pl.when(nt == 0)
        def _():
            acc_ref[...] = jnp.maximum(tile_max, 0.0)            # folded conv3 ReLU

        @pl.when(nt != 0)
        def _():
            acc_ref[...] = jnp.maximum(acc_ref[...], tile_max)

        @pl.when(nt == pl.num_programs(1) - 1)
        def _():
            # TODO(synk): a lane-dense (1, 1024) store would avoid masked vst,
            # but needs a sublane->lane transpose; small absolute win.
            pooled_ref[0] = acc_ref[...]

    return conv_pool_kernel


# ---------------------------------------------------------------------------
# Kernel 2: fc1/fc2/fc3, batched over the whole batch (gridded over row tiles
# for large B so the weights stay VMEM-resident while M fills the MXU).
# ---------------------------------------------------------------------------
def fc_kernel(pooled_ref, f1w_ref, f1b_ref, f2w_ref, f2b_ref, f3w_ref, f3b_ref,
              out_ref):
    p = pooled_ref[...].astype(jnp.bfloat16)                     # (TB, 1024)
    g = jnp.dot(p, f1w_ref[...], preferred_element_type=jnp.float32) + f1b_ref[...]
    g = jnp.maximum(g, 0.0)
    g = jnp.dot(g.astype(jnp.bfloat16), f2w_ref[...],
                preferred_element_type=jnp.float32) + f2b_ref[...]
    g = jnp.maximum(g, 0.0)
    g = jnp.dot(g.astype(jnp.bfloat16), f3w_ref[...],
                preferred_element_type=jnp.float32) + f3b_ref[...]
    out_ref[...] = g                                             # (TB, k*k) f32


# ---------------------------------------------------------------------------
# Parameters (deterministic synthetic init matching STNkd.__init__ shapes).
# Conv weights (C_out, C_in) bf16; FC weights transposed (in, out) bf16.
# Biases f32: conv biases (C, 1), fc biases (1, C).  fc3: zero weight,
# identity bias (as in the PyTorch module).
# ---------------------------------------------------------------------------
def init_params(key, k):
    conv_dims = [(64, k), (128, 64), (1024, 128)]   # (out, in)
    fc_dims = [(1024, 512), (512, 256)]             # (in, out)
    keys = jax.random.split(key, 5)
    params = []
    for kk_, (cout, cin) in zip(keys[:3], conv_dims):
        w = (0.05 * jax.random.normal(kk_, (cout, cin), dtype=jnp.float32)
             ).astype(jnp.bfloat16)
        b = 0.01 * jnp.arange(cout, dtype=jnp.float32).reshape(cout, 1)
        params += [w, b]
    for kk_, (cin, cout) in zip(keys[3:], fc_dims):
        w = (0.05 * jax.random.normal(kk_, (cin, cout), dtype=jnp.float32)
             ).astype(jnp.bfloat16)
        b = 0.01 * jnp.arange(cout, dtype=jnp.float32).reshape(1, cout)
        params += [w, b]
    f3w = jnp.zeros((256, k * k), dtype=jnp.bfloat16)
    f3b = jnp.eye(k, dtype=jnp.float32).reshape(1, k * k)
    params += [f3w, f3b]
    return tuple(params)


# ---------------------------------------------------------------------------
# Point-axis planning: pad to a multiple of 128 when tiling is needed, prefer
# TN that is a multiple of 256 (MXU result width on v6e/v7x), fall back to 128.
# ---------------------------------------------------------------------------
def _pick_tn(n_pad, target):
    if n_pad <= target:
        return n_pad
    start = target - (target % 256)
    for tn in range(start, 255, -256):
        if tn > 0 and n_pad % tn == 0:
            return tn
    start = target - (target % 128)
    for tn in range(start, 127, -128):
        if n_pad % tn == 0:
            return tn
    return n_pad


def _plan_points(n, target):
    """Returns (n_pad, tn, need_mask)."""
    if n <= target:
        return n, n, False                      # single full-axis block
    n_pad = -(-n // 128) * 128
    tn = _pick_tn(n_pad, target)
    return n_pad, tn, (n_pad != n)


def _conv_vmem_limit(kc, tn):
    """Derive the scoped-VMEM request from the TN-dependent footprint."""
    x_buf = 2 * kc * tn * 4                                      # f32 input, 2 bufs
    w_buf = 2 * ((64 * kc + 128 * 64 + 1024 * 128) * 2           # bf16 weights, 2 bufs
                 + (64 + 128 + 1024) * 4)                        # f32 biases
    inter = (64 * tn + 128 * tn + 2 * 1024 * tn) * 4             # f32 intermediates
    inter += (64 * tn + 128 * tn) * 2                            # bf16 recasts
    acc_out = 1024 * 4 + 2 * 1024 * 4
    est = x_buf + w_buf + inter + acc_out
    return int(min(max(2 * est, 16 * 1024 * 1024), 64 * 1024 * 1024))


def _nbytes(a):
    return a.size * a.dtype.itemsize


def stnkd_forward(x, params, k, tn_target=1024):
    B, kc, N = x.shape
    assert kc == k, "channel dim must equal k"
    (w1, b1, w2, b2, w3, b3, f1w, f1b, f2w, f2b, f3w, f3b) = params
    kk = k * k

    N_pad, TN, need_mask = _plan_points(N, tn_target)
    if N_pad != N:
        x = jnp.pad(x, ((0, 0), (0, 0), (0, N_pad - N)))
    NT = N_pad // TN

    def const_spec(arr):
        nd = arr.ndim
        return pl.BlockSpec(arr.shape, lambda b, n, _nd=nd: (0,) * _nd)

    conv_flops = 2 * B * N_pad * (kc * 64 + 64 * 128 + 128 * 1024)
    conv_bytes = (_nbytes(x)
                  + sum(_nbytes(a) for a in (w1, b1, w2, b2, w3, b3))
                  + B * 1024 * 4)

    pooled = pl.pallas_call(
        make_conv_pool_kernel(N, TN, need_mask),
        out_shape=jax.ShapeDtypeStruct((B, 1024, 1), jnp.float32),
        grid_spec=pltpu.PrefetchScalarGridSpec(
            num_scalar_prefetch=0,
            grid=(B, NT),
            in_specs=[
                pl.BlockSpec((1, kc, TN), lambda b, n: (b, 0, n)),
                const_spec(w1), const_spec(b1),
                const_spec(w2), const_spec(b2),
                const_spec(w3), const_spec(b3),
            ],
            out_specs=pl.BlockSpec((1, 1024, 1), lambda b, n: (b, 0, 0)),
            scratch_shapes=[pltpu.VMEM((1024, 1), jnp.float32)],
        ),
        compiler_params=pltpu.CompilerParams(
            # TODO(synk): on v7x with tiny/odd B, add a leading size-2 'parallel'
            # axis splitting the point tiles across both TensorCores.
            dimension_semantics=("parallel", "arbitrary"),
            vmem_limit_bytes=_conv_vmem_limit(kc, TN)),
        cost_estimate=pl.CostEstimate(
            flops=conv_flops, transcendentals=0, bytes_accessed=conv_bytes),
    )(x, w1, b1, w2, b2, w3, b3)

    pooled2d = pooled.reshape(B, 1024)     # trailing-1 squeeze

    TB = 256 if (B > 256 and B % 256 == 0) else B
    NB = B // TB

    fc_flops = 2 * B * (1024 * 512 + 512 * 256 + 256 * kk)
    fc_bytes = (B * 1024 * 4
                + sum(_nbytes(a) for a in (f1w, f1b, f2w, f2b, f3w, f3b))
                + B * kk * 4)

    def fc_const_spec(arr):
        nd = arr.ndim
        return pl.BlockSpec(arr.shape, lambda i, _nd=nd: (0,) * _nd)

    out = pl.pallas_call(
        fc_kernel,
        out_shape=jax.ShapeDtypeStruct((B, kk), jnp.float32),
        grid_spec=pltpu.PrefetchScalarGridSpec(
            num_scalar_prefetch=0,
            grid=(NB,),
            in_specs=[pl.BlockSpec((TB, 1024), lambda i: (i, 0)),
                      fc_const_spec(f1w), fc_const_spec(f1b),
                      fc_const_spec(f2w), fc_const_spec(f2b),
                      fc_const_spec(f3w), fc_const_spec(f3b)],
            out_specs=pl.BlockSpec((TB, kk), lambda i: (i, 0)),
        ),
        compiler_params=pltpu.CompilerParams(
            dimension_semantics=("parallel",)),
        cost_estimate=pl.CostEstimate(
            flops=fc_flops, transcendentals=0, bytes_accessed=fc_bytes),
    )(pooled2d, f1w, f1b, f2w, f2b, f3w, f3b)

    return out.reshape(B, k, k)


# ---------------------------------------------------------------------------
# Pure-JAX reference mirroring the kernel's numerics (bf16 matmul operands,
# f32 accumulation / elementwise path) for validation.
# ---------------------------------------------------------------------------
def stnkd_reference(x, params, k):
    (w1, b1, w2, b2, w3, b3, f1w, f1b, f2w, f2b, f3w, f3b) = params

    def conv(h, w, b):
        y = jnp.einsum('oc,bcn->bon', w, h.astype(jnp.bfloat16),
                       preferred_element_type=jnp.float32) + b[None]
        return jax.nn.relu(y)

    h = conv(x, w1, b1)
    h = conv(h, w2, b2)
    h = conv(h, w3, b3)
    pooled = jnp.max(h, axis=2)                               # (B, 1024)

    def fc(g, w, b, act):
        y = jnp.dot(g.astype(jnp.bfloat16), w,
                    preferred_element_type=jnp.float32) + b
        return jax.nn.relu(y) if act else y

    g = fc(pooled, f1w, f1b, True)
    g = fc(g, f2w, f2b, True)
    g = fc(g, f3w, f3b, False)
    return g.reshape(-1, k, k)


if __name__ == "__main__":
    B, K, N = 2, 8, 16  # small shapes: batch=2, k=8 channels, 16 points
    key = jax.random.PRNGKey(0)
    kx, kp, kw, kb = jax.random.split(key, 4)
    x = jax.random.normal(kx, (B, K, N), dtype=jnp.float32)   # (B, k, num_points)

    # 1) Module-default init: fc3 zero weight / identity bias -> output must be
    #    exactly a stack of identity matrices.
    params = init_params(kp, K)
    out = jax.block_until_ready(stnkd_forward(x, params, K))
    assert out.shape == (B, K, K), out.shape
    assert jnp.allclose(out, jnp.broadcast_to(jnp.eye(K), (B, K, K)), atol=1e-5)

    # 2) Non-trivial fc3 so the full FC matmul path is validated against the
    #    precision-matched pure-JAX reference.
    params2 = list(params)
    params2[10] = (0.05 * jax.random.normal(kw, (256, K * K), dtype=jnp.float32)
                   ).astype(jnp.bfloat16)
    params2[11] = 0.05 * jax.random.normal(kb, (1, K * K), dtype=jnp.float32)
    params2 = tuple(params2)
    out2 = jax.block_until_ready(stnkd_forward(x, params2, K))
    ref2 = stnkd_reference(x, params2, K)
    assert jnp.allclose(out2, ref2, atol=5e-2, rtol=5e-2), "mismatch vs reference"

    # 3) Exercise the tiled + padded/masked point path: N=200 pads to 256,
    #    TN=128 (two point tiles, second tile partially masked).
    N2 = 200
    x3 = jax.random.normal(jax.random.PRNGKey(3), (B, K, N2), dtype=jnp.float32)
    out3 = jax.block_until_ready(stnkd_forward(x3, params2, K, tn_target=128))
    ref3 = stnkd_reference(x3, params2, K)
    assert jnp.allclose(out3, ref3, atol=5e-2, rtol=5e-2), "mismatch (masked path)"

    print("KERNEL_OK")
</pallas_src>

<mosaic_0001>
module attributes {stable_mosaic.version = 11 : i64} {
  func.func @conv_pool_kernel(%arg0: i32, %arg1: i32, %arg2: memref<1x8x16xf32, #tpu.memory_space<vmem>>, %arg3: memref<64x8xbf16, #tpu.memory_space<vmem>>, %arg4: memref<64x1xf32, #tpu.memory_space<vmem>>, %arg5: memref<128x64xbf16, #tpu.memory_space<vmem>>, %arg6: memref<128x1xf32, #tpu.memory_space<vmem>>, %arg7: memref<1024x128xbf16, #tpu.memory_space<vmem>>, %arg8: memref<1024x1xf32, #tpu.memory_space<vmem>>, %arg9: memref<1x1024x1xf32, #tpu.memory_space<vmem>>, %arg10: memref<1024x1xf32, #tpu.memory_space<vmem>>) attributes {dimension_semantics = [#tpu.dimension_semantics<parallel>, #tpu.dimension_semantics<arbitrary>], iteration_bounds = array<i64: 2, 1>, scalar_prefetch = 0 : i64, scratch_operands = 1 : i64, tpu.core_type = #tpu.core_type<tc>, window_params = [{transform_indices = @transform_0, window_bounds = array<i64: 1, 8, 16>}, {pipeline_mode = #tpu.pipeline_mode<synchronous>, transform_indices = @transform_1, window_bounds = array<i64: 64, 8>}, {pipeline_mode = #tpu.pipeline_mode<synchronous>, transform_indices = @transform_2, window_bounds = array<i64: 64, 1>}, {pipeline_mode = #tpu.pipeline_mode<synchronous>, transform_indices = @transform_3, window_bounds = array<i64: 128, 64>}, {pipeline_mode = #tpu.pipeline_mode<synchronous>, transform_indices = @transform_4, window_bounds = array<i64: 128, 1>}, {pipeline_mode = #tpu.pipeline_mode<synchronous>, transform_indices = @transform_5, window_bounds = array<i64: 1024, 128>}, {pipeline_mode = #tpu.pipeline_mode<synchronous>, transform_indices = @transform_6, window_bounds = array<i64: 1024, 1>}, {transform_indices = @transform_7, window_bounds = array<i64: 1, 1024, 1>}]} {
    %c0 = arith.constant 0 : index
    %c0_0 = arith.constant 0 : index
    %c0_1 = arith.constant 0 : index
    %0 = vector.load %arg2[%c0, %c0_0, %c0_1] : memref<1x8x16xf32, #tpu.memory_space<vmem>>, vector<1x8x16xf32>
    %1 = vector.shape_cast %0 : vector<1x8x16xf32> to vector<8x16xf32>
    %2 = arith.truncf %1 : vector<8x16xf32> to vector<8x16xbf16>
    %c0_2 = arith.constant 0 : index
    %c0_3 = arith.constant 0 : index
    %3 = vector.load %arg3[%c0_2, %c0_3] : memref<64x8xbf16, #tpu.memory_space<vmem>>, vector<64x8xbf16>
    %cst = arith.constant dense<0.000000e+00> : vector<64x16xf32>
    %4 = tpu.matmul %3, %2, %cst {dimension_numbers = #tpu.dot_dimension_numbers<[1], [0], [0], [1], [0, 0, 1, 1], [], []>} : vector<64x8xbf16>, vector<8x16xbf16>, vector<64x16xf32> -> vector<64x16xf32>
    %c0_4 = arith.constant 0 : index
    %c0_5 = arith.constant 0 : index
    %5 = vector.load %arg4[%c0_4, %c0_5] : memref<64x1xf32, #tpu.memory_space<vmem>>, vector<64x1xf32>
    %6 = vector.broadcast %5 : vector<64x1xf32> to vector<64x16xf32>
    %7 = arith.addf %4, %6 : vector<64x16xf32>
    %cst_6 = arith.constant 0.000000e+00 : f32
    %8 = vector.broadcast %cst_6 : f32 to vector<64x16xf32>
    %9 = arith.maximumf %7, %8 : vector<64x16xf32>
    %c0_7 = arith.constant 0 : index
    %c0_8 = arith.constant 0 : index
    %10 = vector.load %arg5[%c0_7, %c0_8] : memref<128x64xbf16, #tpu.memory_space<vmem>>, vector<128x64xbf16>
    %11 = arith.truncf %9 : vector<64x16xf32> to vector<64x16xbf16>
    %cst_9 = arith.constant dense<0.000000e+00> : vector<128x16xf32>
    %12 = tpu.matmul %10, %11, %cst_9 {dimension_numbers = #tpu.dot_dimension_numbers<[1], [0], [0], [1], [0, 0, 1, 1], [], []>} : vector<128x64xbf16>, vector<64x16xbf16>, vector<128x16xf32> -> vector<128x16xf32>
    %c0_10 = arith.constant 0 : index
    %c0_11 = arith.constant 0 : index
    %13 = vector.load %arg6[%c0_10, %c0_11] : memref<128x1xf32, #tpu.memory_space<vmem>>, vector<128x1xf32>
    %14 = vector.broadcast %13 : vector<128x1xf32> to vector<128x16xf32>
    %15 = arith.addf %12, %14 : vector<128x16xf32>
    %cst_12 = arith.constant 0.000000e+00 : f32
    %16 = vector.broadcast %cst_12 : f32 to vector<128x16xf32>
    %17 = arith.maximumf %15, %16 : vector<128x16xf32>
    %c0_13 = arith.constant 0 : index
    %c0_14 = arith.constant 0 : index
    %18 = vector.load %arg7[%c0_13, %c0_14] : memref<1024x128xbf16, #tpu.memory_space<vmem>>, vector<1024x128xbf16>
    %19 = arith.truncf %17 : vector<128x16xf32> to vector<128x16xbf16>
    %cst_15 = arith.constant dense<0.000000e+00> : vector<1024x16xf32>
    %20 = tpu.matmul %18, %19, %cst_15 {dimension_numbers = #tpu.dot_dimension_numbers<[1], [0], [0], [1], [0, 0, 1, 1], [], []>} : vector<1024x128xbf16>, vector<128x16xbf16>, vector<1024x16xf32> -> vector<1024x16xf32>
    %c0_16 = arith.constant 0 : index
    %c0_17 = arith.constant 0 : index
    %21 = vector.load %arg8[%c0_16, %c0_17] : memref<1024x1xf32, #tpu.memory_space<vmem>>, vector<1024x1xf32>
    %22 = vector.broadcast %21 : vector<1024x1xf32> to vector<1024x16xf32>
    %23 = arith.addf %20, %22 : vector<1024x16xf32>
    %cst_18 = arith.constant dense<0xFF800000> : vector<1024xf32>
    %24 = vector.multi_reduction <maximumf>, %23, %cst_18 [1] : vector<1024x16xf32> to vector<1024xf32>
    %25 = vector.shape_cast %24 : vector<1024xf32> to vector<1024x1xf32>
    %c0_i32 = arith.constant 0 : i32
    %26 = arith.cmpi eq, %arg1, %c0_i32 : i32
    %27 = arith.extui %26 : i1 to i32
    %c0_i32_19 = arith.constant 0 : i32
    %28 = arith.cmpi ne, %27, %c0_i32_19 : i32
    scf.if %28 {
      %cst_24 = arith.constant 0.000000e+00 : f32
      %35 = vector.broadcast %cst_24 : f32 to vector<1024x1xf32>
      %36 = arith.maximumf %25, %35 : vector<1024x1xf32>
      %c0_25 = arith.constant 0 : index
      %c0_26 = arith.constant 0 : index
      %37 = vector.load %arg10[%c0_25, %c0_26] : memref<1024x1xf32, #tpu.memory_space<vmem>>, vector<1024x1xf32>
      tpu.vector_store %arg10[%c0_25, %c0_26], %36 {strides = array<i32>} : memref<1024x1xf32, #tpu.memory_space<vmem>>, vector<1024x1xf32>,
    } else {
    }
    %c0_i32_20 = arith.constant 0 : i32
    %29 = arith.cmpi ne, %arg1, %c0_i32_20 : i32
    %30 = arith.extui %29 : i1 to i32
    %c0_i32_21 = arith.constant 0 : i32
    %31 = arith.cmpi ne, %30, %c0_i32_21 : i32
    scf.if %31 {
      %c0_24 = arith.constant 0 : index
      %c0_25 = arith.constant 0 : index
      %35 = vector.load %arg10[%c0_24, %c0_25] : memref<1024x1xf32, #tpu.memory_space<vmem>>, vector<1024x1xf32>
      %36 = arith.maximumf %35, %25 : vector<1024x1xf32>
      %c0_26 = arith.constant 0 : index
      %c0_27 = arith.constant 0 : index
      %37 = vector.load %arg10[%c0_26, %c0_27] : memref<1024x1xf32, #tpu.memory_space<vmem>>, vector<1024x1xf32>
      tpu.vector_store %arg10[%c0_26, %c0_27], %36 {strides = array<i32>} : memref<1024x1xf32, #tpu.memory_space<vmem>>, vector<1024x1xf32>,
    } else {
    }
    %c0_i32_22 = arith.constant 0 : i32
    %32 = arith.cmpi eq, %arg1, %c0_i32_22 : i32
    %33 = arith.extui %32 : i1 to i32
    %c0_i32_23 = arith.constant 0 : i32
    %34 = arith.cmpi ne, %33, %c0_i32_23 : i32
    scf.if %34 {
      %c0_24 = arith.constant 0 : index
      %c0_25 = arith.constant 0 : index
      %35 = vector.load %arg10[%c0_24, %c0_25] : memref<1024x1xf32, #tpu.memory_space<vmem>>, vector<1024x1xf32>
      %c0_26 = arith.constant 0 : index
      %c0_27 = arith.constant 0 : index
      %c0_28 = arith.constant 0 : index
      %36 = vector.load %arg9[%c0_26, %c0_27, %c0_28] : memref<1x1024x1xf32, #tpu.memory_space<vmem>>, vector<1x1024x1xf32>
      %37 = vector.shape_cast %36 : vector<1x1024x1xf32> to vector<1024x1xf32>
      %38 = vector.shape_cast %35 : vector<1024x1xf32> to vector<1x1024x1xf32>
      tpu.vector_store %arg9[%c0_26, %c0_27, %c0_28], %38 {strides = array<i32>} : memref<1x1024x1xf32, #tpu.memory_space<vmem>>, vector<1x1024x1xf32>,
    } else {
    }
    return
  }
  func.func @transform_0(%arg0: i32, %arg1: i32) -> (i32, i32, i32) {
    %c0_i32 = arith.constant 0 : i32
    %c0_i32_0 = arith.constant 0 : i32
    return %arg0, %c0_i32, %arg1 : i32, i32, i32
  }
  func.func @transform_1(%arg0: i32, %arg1: i32) -> (i32, i32) {
    %c0_i32 = arith.constant 0 : i32
    %c0_i32_0 = arith.constant 0 : i32
    %c0_i32_1 = arith.constant 0 : i32
    return %c0_i32, %c0_i32_0 : i32, i32
  }
  func.func @transform_2(%arg0: i32, %arg1: i32) -> (i32, i32) {
    %c0_i32 = arith.constant 0 : i32
    %c0_i32_0 = arith.constant 0 : i32
    %c0_i32_1 = arith.constant 0 : i32
    return %c0_i32, %c0_i32_0 : i32, i32
  }
  func.func @transform_3(%arg0: i32, %arg1: i32) -> (i32, i32) {
    %c0_i32 = arith.constant 0 : i32
    %c0_i32_0 = arith.constant 0 : i32
    %c0_i32_1 = arith.constant 0 : i32
    return %c0_i32, %c0_i32_0 : i32, i32
  }
  func.func @transform_4(%arg0: i32, %arg1: i32) -> (i32, i32) {
    %c0_i32 = arith.constant 0 : i32
    %c0_i32_0 = arith.constant 0 : i32
    %c0_i32_1 = arith.constant 0 : i32
    return %c0_i32, %c0_i32_0 : i32, i32
  }
  func.func @transform_5(%arg0: i32, %arg1: i32) -> (i32, i32) {
    %c0_i32 = arith.constant 0 : i32
    %c0_i32_0 = arith.constant 0 : i32
    %c0_i32_1 = arith.constant 0 : i32
    return %c0_i32, %c0_i32_0 : i32, i32
  }
  func.func @transform_6(%arg0: i32, %arg1: i32) -> (i32, i32) {
    %c0_i32 = arith.constant 0 : i32
    %c0_i32_0 = arith.constant 0 : i32
    %c0_i32_1 = arith.constant 0 : i32
    return %c0_i32, %c0_i32_0 : i32, i32
  }
  func.func @transform_7(%arg0: i32, %arg1: i32) -> (i32, i32, i32) {
    %c0_i32 = arith.constant 0 : i32
    %c0_i32_0 = arith.constant 0 : i32
    %c0_i32_1 = arith.constant 0 : i32
    return %arg0, %c0_i32, %c0_i32_0 : i32, i32, i32
  }
}

</mosaic_0001>

<bundles_post_ra>
// kernel: tpu_custom_call.1
= control target key start
LH: loop header
LB: loop body
LE: loop exit
PB: predicated region body
PF: predicated region fallthrough
CT: control target
= control target key end

     0   :  { %s4507_s24 = smov 0   ;;  %s4509_s25 = smov 0   ;;  %s6507_s0 = inlined_call_operand.vmem [shape: f32[2,8,16], index: 0, kind: input, shape index: {}]   ;;  %s6508_s1 = inlined_call_operand.vmem [shape: bf16[64,8], index: 1, kind: input, shape index: {}]   ;;  %s6509_s2 = inlined_call_operand.vmem [shape: f32[64,1], index: 2, kind: input, shape index: {}]   ;;  %s6510_s3 = inlined_call_operand.vmem [shape: bf16[128,64], index: 3, kind: input, shape index: {}]   ;;  %s6511_s4 = inlined_call_operand.vmem [shape: f32[128,1], index: 4, kind: input, shape index: {}]   ;;  %s6512_s5 = inlined_call_operand.vmem [shape: bf16[1024,128], index: 5, kind: input, shape index: {}]   ;;  %s6513_s6 = inlined_call_operand.vmem [shape: f32[1024,1], index: 6, kind: input, shape index: {}]   ;;  %s6514_s7 = inlined_call_operand.vmem [shape: f32[2,1024,1], index: 7, kind: output, shape index: {}]  }
   0x1   :  { %s4511_s26 = smov 0  }
   0x2 LB: > { %s29_s27 = sadd.s32 1, %s4460_s25  ;;  %p3960_p0 = scmp.ge.s32.totalorder %s4464_s26, 1  ;;  %s4464_s26 = sphi %s4511_s26, %s17_s26   ;;  %s4460_s25 = sphi %s4509_s25, %s6682_s25   ;;  %s4456_s24 = sphi %s4507_s24, %s6681_s24  }
   0x3   : > { %p31_p1 = scmp.ge.s32.totalorder %s29_s27, 2  ;;  %p253_p2 = scmp.lt.s32.totalorder %s4464_s26, 3 }
   0x5   : > { %s6684_s27 = smov (%p31_p1, %s29_s27), 0  ;;  %p254_p3 = pnand %p3960_p0, %p253_p2 }
   0x7   : > { %257 = sbr.rel (%p254_p3) target bundleno = 1142 (0x476), region = 48 }
   0xe   : > { %v312_v0 = vld [vmem:[%s6509_s2 + $0x10] sm:$0xff]  ;;  %v310_v1 = vld [vmem:[%s6509_s2] sm:$0xff]  ;;  %p287_p4 = scmp.lt.s32.totalorder %s4456_s24, 1  ;;  %v4466_v2 = vmov 0   ;;  %v313_v3 = vld [vmem:[%s6509_s2 + $0x18] sm:$0xff]  ;;  %vm378_vm0 = vcmask 64512  }
   0xf   : > { %4365 = vset.pattern.permute.xlu1 %v4466_v2  ;;  %4364 = vset.pattern.permute.xlu0 %v4466_v2  ;;  %v4366_v4 = vld [vmem:[%s6508_s1] sm:$0xff]   ;;  %v311_v5 = vld [vmem:[%s6509_s2 + $0x8] sm:$0xff]  ;;  %vm391_vm1 = vcmask 1043456   ;;  %v317_v12 = vld [vmem:[%s6509_s2 + $0x38] sm:$0xff]  ;;  %vm624_vm2 = vcmask 523264   ;;  %vm2595_vm3 = vcmask 130048  }
  0x10   : > { %330 = vperm.xlu1 %4365, %v312_v0   ;;  %320 = vperm.xlu0 %4364, %v310_v1   ;;  %s6686_s24 = smov (!%p287_p4, %s4456_s24), 1  ;;  %v315_v8 = vld [vmem:[%s6509_s2 + $0x28] sm:$0xff]  ;;  %v314_v9 = vld [vmem:[%s6509_s2 + $0x20] sm:$0xff]  ;;  %v4368_v13 = vld [vmem:[%s6508_s1 + $0x10] sm:$0xff]   ;;  %vm3112_vm4 = vcmask 7168  }
  0x11   : > { %s3961_s15 = sshll.u32 %s6686_s24, 3  ;;  %4146 = vmatprep.mubr.msk.bf16.mxu0 %vm378_vm0, %v4366_v4  ;;  %v4367_v11 = vld [vmem:[%s6508_s1 + $0x8] sm:$0xff]   ;;  %v316_v14 = vld [vmem:[%s6509_s2 + $0x30] sm:$0xff]  ;;  %v488_v16 = vld [vmem:[%s6511_s4] sm:$0xff]  ;;  %s4054_s9 = sshll.u32 %s6686_s24, 10 }
  0x12   : > { %s293_s18 = scalar_lea.vmem %s6507_s0, %s3961_s15  ;;  %v489_v15 = vld [vmem:[%s6511_s4 + $0x8] sm:$0xff]  ;;  %v4369_v17 = vld [vmem:[%s6508_s1 + $0x18] sm:$0xff]   ;;  %v490_v19 = vld [vmem:[%s6511_s4 + $0x10] sm:$0xff]  ;;  %s5966_s11 = scalar_lea.vmem %s6514_s7, %s4054_s9 }
  0x13   : > { %v300_v6 = vld [vmem:[%s293_s18] sm:$0xff]  ;;  %v491_v18 = vld [vmem:[%s6511_s4 + $0x18] sm:$0xff]  ;;  %v493_v20 = vld [vmem:[%s6511_s4 + $0x28] sm:$0xff] }
  0x14   : > { %335 = vperm.xlu1 %4365, %v313_v3   ;;  %325 = vperm.xlu0 %4364, %v311_v5   ;;  %v301_v7 = vpack.c.bf16 %v300_v6, %v300_v6  ;;  %v492_v21 = vld [vmem:[%s6511_s4 + $0x20] sm:$0xff]  ;;  %v495_v22 = vld [vmem:[%s6511_s4 + $0x38] sm:$0xff]  ;;  %v494_v23 = vld [vmem:[%s6511_s4 + $0x30] sm:$0xff] }
  0x15   : > { %v497_v24 = vld [vmem:[%s6511_s4 + $0x48] sm:$0xff]  ;;  %v496_v25 = vld [vmem:[%s6511_s4 + $0x40] sm:$0xff]  ;;  %v499_v26 = vld [vmem:[%s6511_s4 + $0x58] sm:$0xff] }
  0x16   : > { %4338 = vmatprep.subr.msk.bf16.mxu0 %vm391_vm1, %v301_v7  ;;  %v393_v10 = vsel %vm391_vm1, %v301_v7, 0  ;;  %v498_v27 = vld [vmem:[%s6511_s4 + $0x50] sm:$0xff]  ;;  %v501_v28 = vld [vmem:[%s6511_s4 + $0x68] sm:$0xff]  ;;  %v500_v29 = vld [vmem:[%s6511_s4 + $0x60] sm:$0xff] }
  0x17   : > { %4145 = vmatpush3.bf16.msra.mxu0 %v393_v10  ;;  %v503_v30 = vld [vmem:[%s6511_s4 + $0x78] sm:$0xff]  ;;  %v502_v31 = vld [vmem:[%s6511_s4 + $0x70] sm:$0xff]  ;;  %v899_v32 = vld [vmem:[%s6513_s6 + $0x8] sm:$0xff] }
  0x18   : > { %345 = vperm.xlu1 %4365, %v315_v8   ;;  %340 = vperm.xlu0 %4364, %v314_v9   ;;  %v898_v33 = vld [vmem:[%s6513_s6] sm:$0xff]  ;;  %v901_v34 = vld [vmem:[%s6513_s6 + $0x18] sm:$0xff]  ;;  %v900_v35 = vld [vmem:[%s6513_s6 + $0x10] sm:$0xff] }
  0x19   : > { %v903_v36 = vld [vmem:[%s6513_s6 + $0x28] sm:$0xff]  ;;  %v902_v37 = vld [vmem:[%s6513_s6 + $0x20] sm:$0xff]  ;;  %v905_v38 = vld [vmem:[%s6513_s6 + $0x38] sm:$0xff] }
  0x1a   : > { %4147 = vmatmul.mubr.msk.bf16.vlgmr.msra.gmra.mrb[0].mxu0 %vm378_vm0, %v4367_v11  ;;  %v904_v39 = vld [vmem:[%s6513_s6 + $0x30] sm:$0xff]  ;;  %v907_v40 = vld [vmem:[%s6513_s6 + $0x48] sm:$0xff]  ;;  %v906_v41 = vld [vmem:[%s6513_s6 + $0x40] sm:$0xff] }
  0x1b   : > { %4150 = vmatprep.mubr.msk.bf16.mxu0 %vm378_vm0, %v4368_v13  ;;  %v909_v42 = vld [vmem:[%s6513_s6 + $0x58] sm:$0xff]  ;;  %v908_v43 = vld [vmem:[%s6513_s6 + $0x50] sm:$0xff]  ;;  %v911_v44 = vld [vmem:[%s6513_s6 + $0x68] sm:$0xff] }
  0x1c   : > { %355 = vperm.xlu1 %4365, %v317_v12   ;;  %350 = vperm.xlu0 %4364, %v316_v14   ;;  %v910_v45 = vld [vmem:[%s6513_s6 + $0x60] sm:$0xff]  ;;  %v913_v46 = vld [vmem:[%s6513_s6 + $0x78] sm:$0xff]  ;;  %v912_v47 = vld [vmem:[%s6513_s6 + $0x70] sm:$0xff] }
  0x1d   : > { %v915_v48 = vld [vmem:[%s6513_s6 + $0x88] sm:$0xff]  ;;  %v914_v49 = vld [vmem:[%s6513_s6 + $0x80] sm:$0xff]  ;;  %v917_v50 = vld [vmem:[%s6513_s6 + $0x98] sm:$0xff] }
  0x1e   : > { %v916_v51 = vld [vmem:[%s6513_s6 + $0x90] sm:$0xff]  ;;  %v919_v52 = vld [vmem:[%s6513_s6 + $0xa8] sm:$0xff]  ;;  %v918_v53 = vld [vmem:[%s6513_s6 + $0xa0] sm:$0xff] }
  0x1f   : > { %v921_v54 = vld [vmem:[%s6513_s6 + $0xb8] sm:$0xff]  ;;  %v920_v55 = vld [vmem:[%s6513_s6 + $0xb0] sm:$0xff]  ;;  %v923_v56 = vld [vmem:[%s6513_s6 + $0xc8] sm:$0xff] }
  0x20   : > { %511 = vperm.xlu1 %4365, %v489_v15   ;;  %506 = vperm.xlu0 %4364, %v488_v16   ;;  %v922_v57 = vld [vmem:[%s6513_s6 + $0xc0] sm:$0xff]  ;;  %v925_v58 = vld [vmem:[%s6513_s6 + $0xd8] sm:$0xff]  ;;  %v924_v59 = vld [vmem:[%s6513_s6 + $0xd0] sm:$0xff] }
  0x21   : > { %v927_v60 = vld [vmem:[%s6513_s6 + $0xe8] sm:$0xff]  ;;  %v926_v61 = vld [vmem:[%s6513_s6 + $0xe0] sm:$0xff]  ;;  %v929_v62 = vld [vmem:[%s6513_s6 + $0xf8] sm:$0xff] }
  0x22   : > { %4151 = vmatmul.mubr.msk.bf16.gmra.mrb[4].mxu0 %vm378_vm0, %v4369_v17  ;;  %v928_v63 = vld [vmem:[%s6513_s6 + $0xf0] sm:$0xff]  ;;  %v931_v0 = vld [vmem:[%s6513_s6 + $0x108] sm:$0xff]  ;;  %v930_v1 = vld [vmem:[%s6513_s6 + $0x100] sm:$0xff] }
  0x23   : > { %v933_v2 = vld [vmem:[%s6513_s6 + $0x118] sm:$0xff]  ;;  %v932_v3 = vld [vmem:[%s6513_s6 + $0x110] sm:$0xff]  ;;  %v935_v4 = vld [vmem:[%s6513_s6 + $0x128] sm:$0xff] }
  0x24   : > { %521 = vperm.xlu1 %4365, %v491_v18   ;;  %516 = vperm.xlu0 %4364, %v490_v19   ;;  %v934_v5 = vld [vmem:[%s6513_s6 + $0x120] sm:$0xff]  ;;  %v937_v7 = vld [vmem:[%s6513_s6 + $0x138] sm:$0xff]  ;;  %v936_v8 = vld [vmem:[%s6513_s6 + $0x130] sm:$0xff] }
  0x25   : > { %v4370_v6 = vld [vmem:[%s6510_s3] sm:$0xff]   ;;  %v939_v9 = vld [vmem:[%s6513_s6 + $0x148] sm:$0xff]  ;;  %v941_v11 = vld [vmem:[%s6513_s6 + $0x158] sm:$0xff] }
  0x26   : > { %4162 = vmatprep.mubr.msk.bf16.mxu1 %vm624_vm2, %v4370_v6  ;;  %v938_v10 = vld [vmem:[%s6513_s6 + $0x140] sm:$0xff]  ;;  %v940_v12 = vld [vmem:[%s6513_s6 + $0x150] sm:$0xff]  ;;  %v943_v13 = vld [vmem:[%s6513_s6 + $0x168] sm:$0xff] }
  0x27   : > { %v942_v14 = vld [vmem:[%s6513_s6 + $0x160] sm:$0xff]  ;;  %v945_v15 = vld [vmem:[%s6513_s6 + $0x178] sm:$0xff]  ;;  %v944_v16 = vld [vmem:[%s6513_s6 + $0x170] sm:$0xff] }
  0x28   : > { %531 = vperm.xlu1 %4365, %v493_v20   ;;  %526 = vperm.xlu0 %4364, %v492_v21   ;;  %v947_v17 = vld [vmem:[%s6513_s6 + $0x188] sm:$0xff]  ;;  %v946_v18 = vld [vmem:[%s6513_s6 + $0x180] sm:$0xff]  ;;  %v949_v21 = vld [vmem:[%s6513_s6 + $0x198] sm:$0xff] }
  0x2c   : > { %541 = vperm.xlu1 %4365, %v495_v22   ;;  %536 = vperm.xlu0 %4364, %v494_v23   ;;  %v948_v22 = vld [vmem:[%s6513_s6 + $0x190] sm:$0xff]  ;;  %v951_v23 = vld [vmem:[%s6513_s6 + $0x1a8] sm:$0xff] }
  0x30   : > { %551 = vperm.xlu1 %4365, %v497_v24   ;;  %546 = vperm.xlu0 %4364, %v496_v25   ;;  %v950_v25 = vld [vmem:[%s6513_s6 + $0x1a0] sm:$0xff] }
  0x34   : > { %561 = vperm.xlu1 %4365, %v499_v26   ;;  %556 = vperm.xlu0 %4364, %v498_v27   ;;  %v953_v27 = vld [vmem:[%s6513_s6 + $0x1b8] sm:$0xff] }
  0x38   : > { %571 = vperm.xlu1 %4365, %v501_v28   ;;  %566 = vperm.xlu0 %4364, %v500_v29   ;;  %v952_v28 = vld [vmem:[%s6513_s6 + $0x1b0] sm:$0xff] }
  0x3c   : > { %581 = vperm.xlu1 %4365, %v503_v30   ;;  %576 = vperm.xlu0 %4364, %v502_v31   ;;  %v955_v31 = vld [vmem:[%s6513_s6 + $0x1c8] sm:$0xff] }
  0x40   : > { %1033 = vperm.xlu1 %4365, %v899_v32   ;;  %1028 = vperm.xlu0 %4364, %v898_v33   ;;  %v954_v32 = vld [vmem:[%s6513_s6 + $0x1c0] sm:$0xff]  ;;  %v957_v33 = vld [vmem:[%s6513_s6 + $0x1d8] sm:$0xff] }
  0x44   : > { %1043 = vperm.xlu1 %4365, %v901_v34   ;;  %1038 = vperm.xlu0 %4364, %v900_v35   ;;  %v956_v35 = vld [vmem:[%s6513_s6 + $0x1d0] sm:$0xff] }
  0x48   : > { %1053 = vperm.xlu1 %4365, %v903_v36   ;;  %1048 = vperm.xlu0 %4364, %v902_v37   ;;  %v959_v37 = vld [vmem:[%s6513_s6 + $0x1e8] sm:$0xff] }
  0x4c   : > { %1063 = vperm.xlu1 %4365, %v905_v38   ;;  %1058 = vperm.xlu0 %4364, %v904_v39   ;;  %v958_v38 = vld [vmem:[%s6513_s6 + $0x1e0] sm:$0xff] }
  0x50   : > { %1073 = vperm.xlu1 %4365, %v907_v40   ;;  %1068 = vperm.xlu0 %4364, %v906_v41   ;;  %v961_v41 = vld [vmem:[%s6513_s6 + $0x1f8] sm:$0xff] }
  0x54   : > { %1083 = vperm.xlu1 %4365, %v909_v42   ;;  %1078 = vperm.xlu0 %4364, %v908_v43   ;;  %v960_v42 = vld [vmem:[%s6513_s6 + $0x1f0] sm:$0xff]  ;;  %v963_v43 = vld [vmem:[%s6513_s6 + $0x208] sm:$0xff] }
  0x58   : > { %1093 = vperm.xlu1 %4365, %v911_v44   ;;  %1088 = vperm.xlu0 %4364, %v910_v45   ;;  %v962_v45 = vld [vmem:[%s6513_s6 + $0x200] sm:$0xff] }
  0x5c   : > { %1103 = vperm.xlu1 %4365, %v913_v46   ;;  %1098 = vperm.xlu0 %4364, %v912_v47   ;;  %v965_v47 = vld [vmem:[%s6513_s6 + $0x218] sm:$0xff] }
  0x60   : > { %1113 = vperm.xlu1 %4365, %v915_v48   ;;  %1108 = vperm.xlu0 %4364, %v914_v49   ;;  %v964_v48 = vld [vmem:[%s6513_s6 + $0x210] sm:$0xff] }
  0x64   : > { %1123 = vperm.xlu1 %4365, %v917_v50   ;;  %1118 = vperm.xlu0 %4364, %v916_v51   ;;  %v967_v51 = vld [vmem:[%s6513_s6 + $0x228] sm:$0xff] }
  0x68   : > { %1133 = vperm.xlu1 %4365, %v919_v52   ;;  %1128 = vperm.xlu0 %4364, %v918_v53   ;;  %v966_v52 = vld [vmem:[%s6513_s6 + $0x220] sm:$0xff]  ;;  %v969_v53 = vld [vmem:[%s6513_s6 + $0x238] sm:$0xff] }
  0x6c   : > { %1143 = vperm.xlu1 %4365, %v921_v54   ;;  %1138 = vperm.xlu0 %4364, %v920_v55   ;;  %v968_v55 = vld [vmem:[%s6513_s6 + $0x230] sm:$0xff] }
  0x70   : > { %1153 = vperm.xlu1 %4365, %v923_v56   ;;  %1148 = vperm.xlu0 %4364, %v922_v57   ;;  %v971_v57 = vld [vmem:[%s6513_s6 + $0x248] sm:$0xff] }
  0x74   : > { %1163 = vperm.xlu1 %4365, %v925_v58   ;;  %1158 = vperm.xlu0 %4364, %v924_v59   ;;  %v970_v58 = vld [vmem:[%s6513_s6 + $0x240] sm:$0xff] }
  0x78   : > { %1173 = vperm.xlu1 %4365, %v927_v60   ;;  %1168 = vperm.xlu0 %4364, %v926_v61   ;;  %v973_v61 = vld [vmem:[%s6513_s6 + $0x258] sm:$0xff] }
  0x7c   : > { %1183 = vperm.xlu1 %4365, %v929_v62   ;;  %1178 = vperm.xlu0 %4364, %v928_v63   ;;  %v972_v62 = vld [vmem:[%s6513_s6 + $0x250] sm:$0xff]  ;;  %v975_v63 = vld [vmem:[%s6513_s6 + $0x268] sm:$0xff] }
  0x80   : > { %1193 = vperm.xlu1 %4365, %v931_v0   ;;  %1188 = vperm.xlu0 %4364, %v930_v1   ;;  %v974_v1 = vld [vmem:[%s6513_s6 + $0x260] sm:$0xff] }
  0x84   : > { %1203 = vperm.xlu1 %4365, %v933_v2   ;;  %1198 = vperm.xlu0 %4364, %v932_v3   ;;  %v977_v3 = vld [vmem:[%s6513_s6 + $0x278] sm:$0xff] }
  0x88   : > { %1213 = vperm.xlu1 %4365, %v935_v4   ;;  %1208 = vperm.xlu0 %4364, %v934_v5   ;;  %v976_v4 = vld [vmem:[%s6513_s6 + $0x270] sm:$0xff] }
  0x8c   : > { %1223 = vperm.xlu1 %4365, %v937_v7   ;;  %1218 = vperm.xlu0 %4364, %v936_v8   ;;  %v979_v7 = vld [vmem:[%s6513_s6 + $0x288] sm:$0xff]  ;;  %v978_v8 = vld [vmem:[%s6513_s6 + $0x280] sm:$0xff] }
  0x8f   : > { %v4773_v19 = vpop.permute.xlu1 %330  ;;  %v4775_v20 = vpop.permute.xlu0 %320 }
  0x90   : > { %1233 = vperm.xlu1 %4365, %v939_v9   ;;  %1228 = vperm.xlu0 %4364, %v938_v10   ;;  %v981_v9 = vld [vmem:[%s6513_s6 + $0x298] sm:$0xff] }
  0x93   : > { %v4786_v24 = vpop.permute.xlu1 %335  ;;  %v4791_v26 = vpop.permute.xlu0 %325 }
  0x94   : > { %1243 = vperm.xlu1 %4365, %v941_v11   ;;  %1238 = vperm.xlu0 %4364, %v940_v12   ;;  %v980_v11 = vld [vmem:[%s6513_s6 + $0x290] sm:$0xff] }
  0x97   : > { %v4799_v29 = vpop.permute.xlu1 %345  ;;  %v4801_v30 = vpop.permute.xlu0 %340 }
  0x98   : > { %1253 = vperm.xlu1 %4365, %v943_v13   ;;  %1248 = vperm.xlu0 %4364, %v942_v14   ;;  %v983_v13 = vld [vmem:[%s6513_s6 + $0x2a8] sm:$0xff]  ;;  %v982_v14 = vld [vmem:[%s6513_s6 + $0x2a0] sm:$0xff] }
  0x9b   : > { %v4812_v34 = vpop.permute.xlu1 %355  ;;  %v4817_v36 = vpop.permute.xlu0 %350 }
  0x9c   : > { %1263 = vperm.xlu1 %4365, %v945_v15   ;;  %1258 = vperm.xlu0 %4364, %v944_v16  }
  0x9f   : > { %v4825_v39 = vpop.permute.xlu1 %511  ;;  %v4827_v40 = vpop.permute.xlu0 %506 }
  0xa0   : > { %1273 = vperm.xlu1 %4365, %v947_v17   ;;  %1268 = vperm.xlu0 %4364, %v946_v18   ;;  %v985_v17 = vld [vmem:[%s6513_s6 + $0x2b8] sm:$0xff]  ;;  %v984_v18 = vld [vmem:[%s6513_s6 + $0x2b0] sm:$0xff] }
  0xa3   : > { %v4838_v44 = vpop.permute.xlu1 %521  ;;  %v4843_v46 = vpop.permute.xlu0 %516 }
  0xa4   : > { %1283 = vperm.xlu1 %4365, %v949_v21   ;;  %1278 = vperm.xlu0 %4364, %v948_v22   ;;  %v987_v21 = vld [vmem:[%s6513_s6 + $0x2c8] sm:$0xff] }
  0xa7   : > { %v4851_v49 = vpop.permute.xlu1 %531  ;;  %v4853_v50 = vpop.permute.xlu0 %526 }
  0xa8   : > { %1293 = vperm.xlu1 %4365, %v951_v23   ;;  %1288 = vperm.xlu0 %4364, %v950_v25   ;;  %v986_v23 = vld [vmem:[%s6513_s6 + $0x2c0] sm:$0xff] }
  0xab   : > { %v4864_v54 = vpop.permute.xlu1 %541  ;;  %v4869_v56 = vpop.permute.xlu0 %536 }
  0xac   : > { %1303 = vperm.xlu1 %4365, %v953_v27   ;;  %1298 = vperm.xlu0 %4364, %v952_v28  }
  0xaf   : > { %v4877_v59 = vpop.permute.xlu1 %551  ;;  %v4879_v60 = vpop.permute.xlu0 %546 }
  0xb0   : > { %1313 = vperm.xlu1 %4365, %v955_v31   ;;  %1308 = vperm.xlu0 %4364, %v954_v32  }
  0xb3   : > { %v4890_v0 = vpop.permute.xlu1 %561  ;;  %v4895_v2 = vpop.permute.xlu0 %556 }
  0xb4   : > { %1323 = vperm.xlu1 %4365, %v957_v33   ;;  %1318 = vperm.xlu0 %4364, %v956_v35   ;;  %v989_v35 = vld [vmem:[%s6513_s6 + $0x2d8] sm:$0xff] }
  0xb7   : > { %v4903_v5 = vpop.permute.xlu1 %571  ;;  %v4905_v6 = vpop.permute.xlu0 %566 }
  0xb8   : > { %1333 = vperm.xlu1 %4365, %v959_v37   ;;  %1328 = vperm.xlu0 %4364, %v958_v38  }
  0xbb   : > { %v4916_v10 = vpop.permute.xlu1 %581  ;;  %v4921_v12 = vpop.permute.xlu0 %576 }
  0xbc   : > { %1343 = vperm.xlu1 %4365, %v961_v41   ;;  %1338 = vperm.xlu0 %4364, %v960_v42   ;;  %v988_v41 = vld [vmem:[%s6513_s6 + $0x2d0] sm:$0xff] }
  0xbf   : > { %v4929_v15 = vpop.permute.xlu1 %1033  ;;  %v4931_v16 = vpop.permute.xlu0 %1028 }
  0xc0   : > { %1353 = vperm.xlu1 %4365, %v963_v43   ;;  %1348 = vperm.xlu0 %4364, %v962_v45  }
  0xc3   : > { %v4942_v22 = vpop.permute.xlu1 %1043  ;;  %v4947_v25 = vpop.permute.xlu0 %1038 }
  0xc4   : > { %1363 = vperm.xlu1 %4365, %v965_v47   ;;  %1358 = vperm.xlu0 %4364, %v964_v48  }
  0xc8   : > { %1373 = vperm.xlu1 %4365, %v967_v51   ;;  %1368 = vperm.xlu0 %4364, %v966_v52   ;;  %v990_v52 = vld [vmem:[%s6513_s6 + $0x2e0] sm:$0xff] }
  0xcc   : > { %1383 = vperm.xlu1 %4365, %v969_v53   ;;  %1378 = vperm.xlu0 %4364, %v968_v55  }
  0xd0   : > { %1393 = vperm.xlu1 %4365, %v971_v57   ;;  %1388 = vperm.xlu0 %4364, %v970_v58  }
  0xd4   : > { %1403 = vperm.xlu1 %4365, %v973_v61   ;;  %1398 = vperm.xlu0 %4364, %v972_v62   ;;  %v993_v62 = vld [vmem:[%s6513_s6 + $0x2f8] sm:$0xff] }
  0xd8   : > { %1413 = vperm.xlu1 %4365, %v975_v63   ;;  %1408 = vperm.xlu0 %4364, %v974_v1  }
  0xdc   : > { %1423 = vperm.xlu1 %4365, %v977_v3   ;;  %1418 = vperm.xlu0 %4364, %v976_v4  }
  0xe0   : > { %1433 = vperm.xlu1 %4365, %v979_v7   ;;  %1428 = vperm.xlu0 %4364, %v978_v8  }
  0xe4   : > { %1443 = vperm.xlu1 %4365, %v981_v9   ;;  %1438 = vperm.xlu0 %4364, %v980_v11  }
  0xe8   : > { %1453 = vperm.xlu1 %4365, %v983_v13   ;;  %1448 = vperm.xlu0 %4364, %v982_v14   ;;  %v994_v14 = vld [vmem:[%s6513_s6 + $0x300] sm:$0xff] }
  0xec   : > { %1463 = vperm.xlu1 %4365, %v985_v17   ;;  %1458 = vperm.xlu0 %4364, %v984_v18  }
  0xed   : > { %v4148_v27 = vpop.f32.mrb[0].mxu0 }
  0xee   : > { %v438_v28 = vadd.f32 %v4148_v27, %v4773_v19  ;;  %v429_v31 = vpop.f32.mrb[1].mxu0  ;;  %v4959_v19 = vpop.permute.xlu1 %1053  ;;  %v999_v27 = vld [vmem:[%s6513_s6 + $0x328] sm:$0xff] }
  0xef   : > { %v430_v32 = vadd.f32 %v429_v31, %v4775_v20  ;;  %v4149_v33 = vpop.f32.mrb[2].mxu0  ;;  %v4961_v20 = vpop.permute.xlu0 %1048 }
  0xf0   : > { %1473 = vperm.xlu1 %4365, %v987_v21   ;;  %1468 = vperm.xlu0 %4364, %v986_v23   ;;  %v441_v37 = vadd.f32 %v4149_v33, %v4786_v24  ;;  %v432_v38 = vpop.f32.mrb[3].mxu0  ;;  %v462_v43 = vmax.f32 %v438_v28, 0.0  ;;  %v991_v24 = vld [vmem:[%s6513_s6 + $0x2e8] sm:$0xff]  ;;  %v997_v21 = vld [vmem:[%s6513_s6 + $0x318] sm:$0xff]  ;;  %v996_v23 = vld [vmem:[%s6513_s6 + $0x310] sm:$0xff] }
  0xf1   : > { %v433_v42 = vadd.f32 %v432_v38, %v4791_v26  ;;  %v460_v47 = vmax.f32 %v430_v32, 0.0  ;;  %v4371_v28 = vld [vmem:[%s6510_s3 + $0x8] sm:$0xff]   ;;  %v998_v32 = vld [vmem:[%s6513_s6 + $0x320] sm:$0xff]  ;;  %v4372_v33 = vld [vmem:[%s6510_s3 + $0x10] sm:$0xff]  }
  0xf2   : > { %v463_v45 = vmax.f32 %v441_v37, 0.0  ;;  %v4974_v63 = vpop.permute.xlu1 %1063  ;;  %v1001_v37 = vld [vmem:[%s6513_s6 + $0x338] sm:$0xff]  ;;  %v1000_v38 = vld [vmem:[%s6513_s6 + $0x330] sm:$0xff] }
  0xf3   : > { %v461_v48 = vmax.f32 %v433_v42, 0.0  ;;  %v4980_v4 = vpop.permute.xlu0 %1058 }
  0xf4   : > { %1483 = vperm.xlu1 %4365, %v989_v35   ;;  %1478 = vperm.xlu0 %4364, %v988_v41   ;;  %v485_v51 = vpack.c.bf16 %v463_v45, %v462_v43  ;;  %v1003_v43 = vld [vmem:[%s6513_s6 + $0x348] sm:$0xff]  ;;  %v4373_v45 = vld [vmem:[%s6510_s3 + $0x18] sm:$0xff]  }
  0xf5   : > { %v4152_v26 = vpop.f32.mrb[4].mxu0  ;;  %v484_v53 = vpack.c.bf16 %v461_v48, %v460_v47  ;;  %v1002_v47 = vld [vmem:[%s6513_s6 + $0x340] sm:$0xff] }
  0xf6   : > { %v454_v55 = vadd.f32 %v4152_v26, %v4817_v36  ;;  %v445_v57 = vpop.f32.mrb[5].mxu0  ;;  %v992_v36 = vld [vmem:[%s6513_s6 + $0x2f0] sm:$0xff]  ;;  %v4989_v18 = vpop.permute.xlu1 %1073  ;;  %v4374_v48 = vld [vmem:[%s6510_s3 + $0x20] sm:$0xff]  }
  0xf7   : > { %v446_v58 = vadd.f32 %v445_v57, %v4801_v30  ;;  %v4153_v61 = vpop.f32.mrb[6].mxu0  ;;  %4154 = vmatprep.subr.bf16.mxu1 %v484_v53  ;;  %v1006_v57 = vld [vmem:[%s6513_s6 + $0x360] sm:$0xff] }
  0xf8   : > { %1493 = vperm.xlu1 %4365, %v991_v24   ;;  %1488 = vperm.xlu0 %4364, %v990_v52   ;;  %v457_v1 = vadd.f32 %v4153_v61, %v4812_v34  ;;  %v448_v3 = vpop.f32.mrb[7].mxu0  ;;  %v466_v7 = vmax.f32 %v454_v55, 0.0  ;;  %v995_v34 = vld [vmem:[%s6513_s6 + $0x308] sm:$0xff]  ;;  %v1005_v24 = vld [vmem:[%s6513_s6 + $0x358] sm:$0xff]  ;;  %v1004_v52 = vld [vmem:[%s6513_s6 + $0x350] sm:$0xff] }
  0xf9   : > { %4155 = vmatpush3.bf16.msra.mxu1 %v484_v53  ;;  %v449_v30 = vadd.f32 %v448_v3, %v4799_v29  ;;  %v464_v9 = vmax.f32 %v446_v58, 0.0  ;;  %v4991_v29 = vpop.permute.xlu0 %1068  ;;  %v1007_v53 = vld [vmem:[%s6513_s6 + $0x368] sm:$0xff]  ;;  %v4376_v58 = vld [vmem:[%s6510_s3 + $0x30] sm:$0xff]  }
  0xfa   : > { %4156 = vmatprep.subr.bf16.mxu1 %v485_v51  ;;  %v467_v8 = vmax.f32 %v457_v1, 0.0  ;;  %v5005_v31 = vpop.permute.xlu1 %1083  ;;  %v4375_v55 = vld [vmem:[%s6510_s3 + $0x28] sm:$0xff]   ;;  %v1009_v1 = vld [vmem:[%s6513_s6 + $0x378] sm:$0xff]  ;;  %v1008_v3 = vld [vmem:[%s6513_s6 + $0x370] sm:$0xff] }
  0xfb   : > { %v465_v11 = vmax.f32 %v449_v30, 0.0  ;;  %v4377_v30 = vld [vmem:[%s6510_s3 + $0x38] sm:$0xff]  }
  0xfc   : > { %1503 = vperm.xlu1 %4365, %v993_v62   ;;  %1498 = vperm.xlu0 %4364, %v992_v36   ;;  %v487_v13 = vpack.c.bf16 %v467_v8, %v466_v7  ;;  %v1011_v36 = vld [vmem:[%s6513_s6 + $0x388] sm:$0xff]  ;;  %v1010_v8 = vld [vmem:[%s6513_s6 + $0x380] sm:$0xff] }
  0xfd   : > { %4157 = vmatpush3.bf16.msra.mxu1 %v485_v51  ;;  %v486_v17 = vpack.c.bf16 %v465_v11, %v464_v9  ;;  %v5013_v35 = vpop.permute.xlu0 %1078  ;;  %v1013_v11 = vld [vmem:[%s6513_s6 + $0x398] sm:$0xff] }
  0xfe   : > { %v5023_v41 = vpop.permute.xlu1 %1093 }
  0xff   : > { %4158 = vmatprep.subr.bf16.mxu1 %v486_v17 }
 0x100   : > { %1513 = vperm.xlu1 %4365, %v995_v34   ;;  %1508 = vperm.xlu0 %4364, %v994_v14   ;;  %v1012_v34 = vld [vmem:[%s6513_s6 + $0x390] sm:$0xff] }
 0x101   : > { %4159 = vmatpush3.bf16.msra.mxu1 %v486_v17  ;;  %v5025_v42 = vpop.permute.xlu0 %1088  ;;  %v1015_v17 = vld [vmem:[%s6513_s6 + $0x3a8] sm:$0xff] }
 0x102   : > { %4160 = vmatprep.subr.bf16.mxu1 %v487_v13  ;;  %v5043_v51 = vpop.permute.xlu1 %1103 }
 0x104   : > { %1523 = vperm.xlu1 %4365, %v997_v21   ;;  %1518 = vperm.xlu0 %4364, %v996_v23   ;;  %v1014_v21 = vld [vmem:[%s6513_s6 + $0x3a0] sm:$0xff]  ;;  %v1017_v23 = vld [vmem:[%s6513_s6 + $0x3b8] sm:$0xff] }
 0x105   : > { %4161 = vmatpush3.bf16.msra.mxu1 %v487_v13  ;;  %v5049_v26 = vpop.permute.xlu0 %1098 }
 0x106   : > { %v5063_v61 = vpop.permute.xlu1 %1113 }
 0x108   : > { %1533 = vperm.xlu1 %4365, %v999_v27   ;;  %1528 = vperm.xlu0 %4364, %v998_v32  }
 0x109   : > { %4163 = vmatmul.mubr.msk.bf16.vlgmr.msra.gmra.mrb[0].mxu1 %vm624_vm2, %v4371_v28  ;;  %v5065_v62 = vpop.permute.xlu0 %1108  ;;  %v1016_v28 = vld [vmem:[%s6513_s6 + $0x3b0] sm:$0xff] }
 0x10a   : > { %4166 = vmatprep.mubr.msk.bf16.mxu1 %vm624_vm2, %v4372_v33  ;;  %v5081_v7 = vpop.permute.xlu1 %1123  ;;  %v1019_v33 = vld [vmem:[%s6513_s6 + $0x3c8] sm:$0xff] }
 0x10c   : > { %1543 = vperm.xlu1 %4365, %v1001_v37   ;;  %1538 = vperm.xlu0 %4364, %v1000_v38   ;;  %v1018_v37 = vld [vmem:[%s6513_s6 + $0x3c0] sm:$0xff] }
 0x10d   : > { %v5086_v9 = vpop.permute.xlu0 %1118 }
 0x10e   : > { %v5095_v13 = vpop.permute.xlu1 %1133 }
 0x110   : > { %1553 = vperm.xlu1 %4365, %v1003_v43   ;;  %1548 = vperm.xlu0 %4364, %v1002_v47   ;;  %v1020_v47 = vld [vmem:[%s6513_s6 + $0x3d0] sm:$0xff] }
 0x111   : > { %4167 = vmatmul.mubr.msk.bf16.gmra.mrb[4].mxu1 %vm624_vm2, %v4373_v45  ;;  %v5097_v14 = vpop.permute.xlu0 %1128  ;;  %v1021_v45 = vld [vmem:[%s6513_s6 + $0x3d8] sm:$0xff] }
 0x112   : > { %4170 = vmatprep.mubr.msk.bf16.mxu1 %vm624_vm2, %v4374_v48  ;;  %v5108_v27 = vpop.permute.xlu1 %1143  ;;  %v1023_v48 = vld [vmem:[%s6513_s6 + $0x3e8] sm:$0xff] }
 0x114   : > { %1563 = vperm.xlu1 %4365, %v1005_v24   ;;  %1558 = vperm.xlu0 %4364, %v1004_v52   ;;  %v1022_v52 = vld [vmem:[%s6513_s6 + $0x3e0] sm:$0xff] }
 0x115   : > { %v5113_v32 = vpop.permute.xlu0 %1138 }
 0x116   : > { %v5121_v38 = vpop.permute.xlu1 %1153 }
 0x117   : > { %6515 = vst [vmem:[#allocation3_spill] sm:$0xff] %v5121_v38 }
 0x118   : > { %1573 = vperm.xlu1 %4365, %v1007_v53   ;;  %1568 = vperm.xlu0 %4364, %v1006_v57   ;;  %v1024_v57 = vld [vmem:[%s6513_s6 + $0x3f0] sm:$0xff] }
 0x119   : > { %4171 = vmatmul.mubr.msk.bf16.gmra.mrb[8].mxu1 %vm624_vm2, %v4375_v55  ;;  %v5123_v43 = vpop.permute.xlu0 %1148  ;;  %v1025_v55 = vld [vmem:[%s6513_s6 + $0x3f8] sm:$0xff] }
 0x11a   : > { %4174 = vmatprep.mubr.msk.bf16.mxu1 %vm624_vm2, %v4376_v58  ;;  %6516 = vst [vmem:[#allocation4_spill] sm:$0xff] %v5123_v43  ;;  %v5134_v24 = vpop.permute.xlu1 %1163 }
 0x11b   : > { %6517 = vst [vmem:[#allocation5_spill] sm:$0xff] %v5134_v24 }
 0x11c   : > { %1583 = vperm.xlu1 %4365, %v1009_v1   ;;  %1578 = vperm.xlu0 %4364, %v1008_v3   ;;  %v4378_v3 = vld [vmem:[%s6512_s5] sm:$0xff]  }
 0x11d   : > { %v5139_v53 = vpop.permute.xlu0 %1158  ;;  %4194 = vmatprep.mubr.bf16.mxu0 %v4378_v3 }
 0x11e   : > { %v5147_v58 = vpop.permute.xlu1 %1173 }
 0x11f   : > { %6518 = vst [vmem:[#allocation6_spill] sm:$0xff] %v5147_v58 }
 0x120   : > { %1593 = vperm.xlu1 %4365, %v1011_v36   ;;  %1588 = vperm.xlu0 %4364, %v1010_v8   ;;  %v4379_v36 = vld [vmem:[%s6512_s5 + $0x110] sm:$0xff]  }
 0x121   : > { %4175 = vmatmul.mubr.msk.bf16.gmra.mrb[12].mxu1 %vm624_vm2, %v4377_v30  ;;  %v5149_v1 = vpop.permute.xlu0 %1168 }
 0x122   : > { %6519 = vst [vmem:[#allocation7_spill] sm:$0xff] %v5149_v1  ;;  %4262 = vmatprep.mubr.bf16.mxu1 %v4379_v36 }
 0x124   : > { %1603 = vperm.xlu1 %4365, %v1013_v11   ;;  %1598 = vperm.xlu0 %4364, %v1012_v34  }
 0x128   : > { %1613 = vperm.xlu1 %4365, %v1015_v17   ;;  %1608 = vperm.xlu0 %4364, %v1014_v21  }
 0x12c   : > { %1623 = vperm.xlu1 %4365, %v1017_v23   ;;  %1618 = vperm.xlu0 %4364, %v1016_v28  }
 0x130   : > { %1633 = vperm.xlu1 %4365, %v1019_v33   ;;  %1628 = vperm.xlu0 %4364, %v1018_v37  }
 0x134   : > { %1643 = vperm.xlu1 %4365, %v1021_v45   ;;  %1638 = vperm.xlu0 %4364, %v1020_v47  }
 0x138   : > { %1653 = vperm.xlu1 %4365, %v1023_v48   ;;  %1648 = vperm.xlu0 %4364, %v1022_v52  }
 0x13c   : > { %1663 = vperm.xlu1 %4365, %v1025_v55   ;;  %1658 = vperm.xlu0 %4364, %v1024_v57  }
 0x1dc   : > { %v4164_v30 = vpop.f32.mrb[0].mxu1 }
 0x1dd   : > { %v692_v8 = vadd.f32 %v4164_v30, %v4843_v46  ;;  %v683_v11 = vpop.f32.mrb[1].mxu1 }
 0x1de   : > { %v684_v34 = vadd.f32 %v683_v11, %v4827_v40  ;;  %v4165_v17 = vpop.f32.mrb[2].mxu1 }
 0x1df   : > { %v695_v21 = vadd.f32 %v4165_v17, %v4838_v44  ;;  %v686_v23 = vpop.f32.mrb[3].mxu1  ;;  %v748_v33 = vmax.f32 %v692_v8, 0.0 }
 0x1e0   : > { %v687_v28 = vadd.f32 %v686_v23, %v4825_v39  ;;  %v746_v45 = vmax.f32 %v684_v34, 0.0 }
 0x1e1   : > { %v749_v37 = vmax.f32 %v695_v21, 0.0 }
 0x1e2   : > { %v747_v47 = vmax.f32 %v687_v28, 0.0 }
 0x1e3   : > { %v891_v48 = vpack.c.bf16 %v749_v37, %v748_v33 }
 0x1e4   : > { %v890_v52 = vpack.c.bf16 %v747_v47, %v746_v45  ;;  %v4168_v55 = vpop.f32.mrb[4].mxu1 }
 0x1e5   : > { %v708_v57 = vadd.f32 %v4168_v55, %v4869_v56  ;;  %v699_v3 = vpop.f32.mrb[5].mxu1 }
 0x1e6   : > { %v700_v46 = vadd.f32 %v699_v3, %v4853_v50  ;;  %v4169_v36 = vpop.f32.mrb[6].mxu1  ;;  %4178 = vmatprep.subr.bf16.mxu0 %v890_v52  ;;  %4322 = vmatprep.subr.bf16.mxu1 %v890_v52 }
 0x1e7   : > { %v711_v40 = vadd.f32 %v4169_v36, %v4864_v54  ;;  %v702_v44 = vpop.f32.mrb[7].mxu1  ;;  %4179 = vmatpush3.bf16.msra.mxu0 %v890_v52  ;;  %4330 = vmatpush3.bf16.msra.mxu1 %v890_v52  ;;  %v752_v30 = vmax.f32 %v708_v57, 0.0 }
 0x1e8   : > { %v703_v39 = vadd.f32 %v702_v44, %v4851_v49  ;;  %4180 = vmatprep.subr.bf16.mxu0 %v891_v48  ;;  %4323 = vmatprep.subr.bf16.mxu1 %v891_v48  ;;  %v750_v11 = vmax.f32 %v700_v46, 0.0 }
 0x1e9   : > { %v753_v8 = vmax.f32 %v711_v40, 0.0 }
 0x1ea   : > { %v751_v34 = vmax.f32 %v703_v39, 0.0 }
 0x1eb   : > { %v893_v56 = vpack.c.bf16 %v753_v8, %v752_v30  ;;  %4181 = vmatpush3.bf16.msra.mxu0 %v891_v48  ;;  %4331 = vmatpush3.bf16.msra.mxu1 %v891_v48 }
 0x1ec   : > { %v892_v50 = vpack.c.bf16 %v751_v34, %v750_v11  ;;  %v4172_v17 = vpop.f32.mrb[8].mxu1  ;;  %v4382_v11 = vld [vmem:[%s6512_s5 + $0x10] sm:$0xff]   ;;  %v4383_v34 = vld [vmem:[%s6512_s5 + $0x120] sm:$0xff]  }
 0x1ed   : > { %v724_v21 = vadd.f32 %v4172_v17, %v4895_v2  ;;  %v715_v23 = vpop.f32.mrb[9].mxu1  ;;  %v4386_v17 = vld [vmem:[%s6512_s5 + $0x20] sm:$0xff]  }
 0x1ee   : > { %v716_v54 = vadd.f32 %v715_v23, %v4879_v60  ;;  %v4173_v28 = vpop.f32.mrb[10].mxu1  ;;  %4182 = vmatprep.subr.bf16.mxu0 %v892_v50  ;;  %4324 = vmatprep.subr.bf16.mxu1 %v892_v50  ;;  %v4388_v23 = vld [vmem:[%s6512_s5 + $0x28] sm:$0xff]  }
 0x1ef   : > { %v727_v49 = vadd.f32 %v4173_v28, %v4890_v0  ;;  %v718_v33 = vpop.f32.mrb[11].mxu1  ;;  %4183 = vmatpush3.bf16.msra.mxu0 %v892_v50  ;;  %4332 = vmatpush3.bf16.msra.mxu1 %v892_v50  ;;  %v756_v45 = vmax.f32 %v724_v21, 0.0  ;;  %v4385_v50 = vld [vmem:[%s6512_s5 + $0x128] sm:$0xff]   ;;  %v4387_v21 = vld [vmem:[%s6512_s5 + $0x130] sm:$0xff]  }
 0x1f0   : > { %v719_v37 = vadd.f32 %v718_v33, %v4877_v59  ;;  %4184 = vmatprep.subr.bf16.mxu0 %v893_v56  ;;  %4325 = vmatprep.subr.bf16.mxu1 %v893_v56  ;;  %v754_v48 = vmax.f32 %v716_v54, 0.0  ;;  %v4389_v54 = vld [vmem:[%s6512_s5 + $0x138] sm:$0xff]   ;;  %v4390_v28 = vld [vmem:[%s6512_s5 + $0x30] sm:$0xff]   ;;  %v5209_v33 = vpop.permute.xlu0 %1178 }
 0x1f1   : > { %v757_v47 = vmax.f32 %v727_v49, 0.0  ;;  %v4391_v49 = vld [vmem:[%s6512_s5 + $0x140] sm:$0xff]   ;;  %6520 = vst [vmem:[#allocation8_spill] sm:$0xff] %v5209_v33 }
 0x1f2   : > { %v755_v52 = vmax.f32 %v719_v37, 0.0  ;;  %v4392_v37 = vld [vmem:[%s6512_s5 + $0x38] sm:$0xff]  }
 0x1f3   : > { %v895_v2 = vpack.c.bf16 %v757_v47, %v756_v45  ;;  %4185 = vmatpush3.bf16.msra.mxu0 %v893_v56  ;;  %4333 = vmatpush3.bf16.msra.mxu1 %v893_v56  ;;  %v4384_v56 = vld [vmem:[%s6512_s5 + $0x18] sm:$0xff]   ;;  %v4393_v45 = vld [vmem:[%s6512_s5 + $0x148] sm:$0xff]   ;;  %v4394_v47 = vld [vmem:[%s6512_s5 + $0x40] sm:$0xff]  }
 0x1f4   : > { %v894_v60 = vpack.c.bf16 %v755_v52, %v754_v48  ;;  %v4176_v55 = vpop.f32.mrb[12].mxu1  ;;  %v4395_v48 = vld [vmem:[%s6512_s5 + $0x150] sm:$0xff]   ;;  %v5223_v52 = vpop.permute.xlu1 %1183 }
 0x1f5   : > { %v740_v57 = vadd.f32 %v4176_v55, %v4921_v12  ;;  %v731_v3 = vpop.f32.mrb[13].mxu1  ;;  %6521 = vst [vmem:[#allocation9_spill] sm:$0xff] %v5223_v52  ;;  %v4397_v55 = vld [vmem:[%s6512_s5 + $0x158] sm:$0xff]  }
 0x1f6   : > { %v732_v0 = vadd.f32 %v731_v3, %v4905_v6  ;;  %v4177_v46 = vpop.f32.mrb[14].mxu1  ;;  %4186 = vmatprep.subr.bf16.mxu0 %v894_v60  ;;  %4326 = vmatprep.subr.bf16.mxu1 %v894_v60  ;;  %v4399_v3 = vld [vmem:[%s6512_s5 + $0x160] sm:$0xff]  }
 0x1f7   : > { %v743_v59 = vadd.f32 %v4177_v46, %v4916_v10  ;;  %v734_v36 = vpop.f32.mrb[15].mxu1  ;;  %4187 = vmatpush3.bf16.msra.mxu0 %v894_v60  ;;  %4334 = vmatpush3.bf16.msra.mxu1 %v894_v60  ;;  %v760_v44 = vmax.f32 %v740_v57, 0.0  ;;  %v4381_v10 = vld [vmem:[%s6512_s5 + $0x118] sm:$0xff]   ;;  %v4396_v60 = vld [vmem:[%s6512_s5 + $0x48] sm:$0xff]   ;;  %v4398_v57 = vld [vmem:[%s6512_s5 + $0x50] sm:$0xff]  }
 0x1f8   : > { %v735_v40 = vadd.f32 %v734_v36, %v4903_v5  ;;  %4188 = vmatprep.subr.bf16.mxu0 %v895_v2  ;;  %4327 = vmatprep.subr.bf16.mxu1 %v895_v2  ;;  %v758_v30 = vmax.f32 %v732_v0, 0.0  ;;  %v4380_v5 = vld [vmem:[%s6512_s5 + $0x8] sm:$0xff]   ;;  %v5239_v0 = vpop.permute.xlu1 %1193 }
 0x1f9   : > { %v761_v39 = vmax.f32 %v743_v59, 0.0  ;;  %6523 = vst [vmem:[#allocation11_spill] sm:$0xff] %v5239_v0 }
 0x1fa   : > { %v759_v8 = vmax.f32 %v735_v40, 0.0  ;;  %v4400_v40 = vld [vmem:[%s6512_s5 + $0x58] sm:$0xff]  }
 0x1fb   : > { %v897_v12 = vpack.c.bf16 %v761_v39, %v760_v44  ;;  %4189 = vmatpush3.bf16.msra.mxu0 %v895_v2  ;;  %4335 = vmatpush3.bf16.msra.mxu1 %v895_v2  ;;  %v5225_v2 = vpop.permute.xlu0 %1188  ;;  %v4401_v44 = vld [vmem:[%s6512_s5 + $0x168] sm:$0xff]   ;;  %v4402_v39 = vld [vmem:[%s6512_s5 + $0x60] sm:$0xff]  }
 0x1fc   : > { %v896_v6 = vpack.c.bf16 %v759_v8, %v758_v30  ;;  %6522 = vst [vmem:[#allocation10_spill] sm:$0xff] %v5225_v2  ;;  %v5243_v59 = vpop.permute.xlu1 %1203  ;;  %v4403_v30 = vld [vmem:[%s6512_s5 + $0x170] sm:$0xff]  }
 0x1fd   : > { %6525 = vst [vmem:[#allocation13_spill] sm:$0xff] %v5243_v59 }
 0x1fe   : > { %4190 = vmatprep.subr.bf16.mxu0 %v896_v6  ;;  %4328 = vmatprep.subr.bf16.mxu1 %v896_v6 }
 0x1ff   : > { %4191 = vmatpush3.bf16.msra.mxu0 %v896_v6  ;;  %4336 = vmatpush3.bf16.msra.mxu1 %v896_v6  ;;  %v5241_v46 = vpop.permute.xlu0 %1198  ;;  %v4404_v6 = vld [vmem:[%s6512_s5 + $0x68] sm:$0xff]  }
 0x200   : > { %4192 = vmatprep.subr.bf16.mxu0 %v897_v12  ;;  %4329 = vmatprep.subr.bf16.mxu1 %v897_v12  ;;  %6524 = vst [vmem:[#allocation12_spill] sm:$0xff] %v5241_v46  ;;  %v5259_v8 = vpop.permute.xlu1 %1213 }
 0x201   : > { %6527 = vst [vmem:[#allocation15_spill] sm:$0xff] %v5259_v8 }
 0x203   : > { %4193 = vmatpush3.bf16.msra.mxu0 %v897_v12  ;;  %4337 = vmatpush3.bf16.msra.mxu1 %v897_v12  ;;  %v5245_v36 = vpop.permute.xlu0 %1208 }
 0x204   : > { %6526 = vst [vmem:[#allocation14_spill] sm:$0xff] %v5245_v36 }
 0x206   : > { %4195 = vmatmul.mubr.bf16.vlgmr.msra.gmra.mrb[8].mxu0 %v4380_v5  ;;  %4263 = vmatmul.mubr.bf16.vlgmr.msra.gmra.mrb[16].mxu1 %v4381_v10  ;;  %v4405_v5 = vld [vmem:[%s6512_s5 + $0x178] sm:$0xff]   ;;  %v4406_v10 = vld [vmem:[%s6512_s5 + $0x70] sm:$0xff]  }
 0x207   : > { %4198 = vmatprep.mubr.bf16.mxu0 %v4382_v11  ;;  %4266 = vmatprep.mubr.bf16.mxu1 %v4383_v34  ;;  %v5261_v12 = vpop.permute.xlu0 %1218  ;;  %v4407_v11 = vld [vmem:[%s6512_s5 + $0x180] sm:$0xff]   ;;  %v5275_v34 = vpop.permute.xlu1 %1223 }
 0x208   : > { %6528 = vst [vmem:[#allocation16_spill] sm:$0xff] %v5261_v12  ;;  %6529 = vst [vmem:[#allocation17_spill] sm:$0xff] %v5275_v34 }
 0x20e   : > { %4199 = vmatmul.mubr.bf16.gmra.mrb[12].mxu0 %v4384_v56  ;;  %4267 = vmatmul.mubr.bf16.gmra.mrb[20].mxu1 %v4385_v50  ;;  %v5277_v56 = vpop.permute.xlu0 %1228  ;;  %v4408_v50 = vld [vmem:[%s6512_s5 + $0x78] sm:$0xff]  }
 0x20f   : > { %4202 = vmatprep.mubr.bf16.mxu0 %v4386_v17  ;;  %4270 = vmatprep.mubr.bf16.mxu1 %v4387_v21  ;;  %6530 = vst [vmem:[#allocation18_spill] sm:$0xff] %v5277_v56  ;;  %v4409_v17 = vld [vmem:[%s6512_s5 + $0x188] sm:$0xff]   ;;  %v4410_v21 = vld [vmem:[%s6512_s5 + $0x80] sm:$0xff]  }
 0x216   : > { %4203 = vmatmul.mubr.bf16.gmra.mrb[16].mxu0 %v4388_v23  ;;  %4271 = vmatmul.mubr.bf16.gmra.mrb[24].mxu1 %v4389_v54  ;;  %v4411_v23 = vld [vmem:[%s6512_s5 + $0x190] sm:$0xff]   ;;  %v5291_v54 = vpop.permute.xlu1 %1233 }
 0x217   : > { %4206 = vmatprep.mubr.bf16.mxu0 %v4390_v28  ;;  %4274 = vmatprep.mubr.bf16.mxu1 %v4391_v49  ;;  %6531 = vst [vmem:[#allocation19_spill] sm:$0xff] %v5291_v54  ;;  %v5293_v28 = vpop.permute.xlu0 %1238 }
 0x218   : > { %6532 = vst [vmem:[#allocation20_spill] sm:$0xff] %v5293_v28 }
 0x21a   : > { %v5295_v49 = vpop.permute.xlu1 %1243 }
 0x21b   : > { %6533 = vst [vmem:[#allocation21_spill] sm:$0xff] %v5295_v49 }
 0x21e   : > { %4207 = vmatmul.mubr.bf16.gmra.mrb[20].mxu0 %v4392_v37  ;;  %4275 = vmatmul.mubr.bf16.gmra.mrb[28].mxu1 %v4393_v45  ;;  %v5297_v37 = vpop.permute.xlu0 %1248  ;;  %v4412_v45 = vld [vmem:[%s6512_s5 + $0x88] sm:$0xff]  }
 0x21f   : > { %4210 = vmatprep.mubr.bf16.mxu0 %v4394_v47  ;;  %4278 = vmatprep.mubr.bf16.mxu1 %v4395_v48  ;;  %6534 = vst [vmem:[#allocation22_spill] sm:$0xff] %v5297_v37  ;;  %v4413_v47 = vld [vmem:[%s6512_s5 + $0x198] sm:$0xff]   ;;  %v4414_v48 = vld [vmem:[%s6512_s5 + $0x90] sm:$0xff]  }
 0x226   : > { %4211 = vmatmul.mubr.bf16.gmra.mrb[24].mxu0 %v4396_v60  ;;  %4279 = vmatmul.mubr.bf16.gmra.mrb[32].mxu1 %v4397_v55  ;;  %v4415_v60 = vld [vmem:[%s6512_s5 + $0x1a0] sm:$0xff]   ;;  %v5311_v55 = vpop.permute.xlu1 %1253 }
 0x227   : > { %4214 = vmatprep.mubr.bf16.mxu0 %v4398_v57  ;;  %4282 = vmatprep.mubr.bf16.mxu1 %v4399_v3  ;;  %6535 = vst [vmem:[#allocation23_spill] sm:$0xff] %v5311_v55  ;;  %v5313_v57 = vpop.permute.xlu0 %1258  ;;  %v4416_v3 = vld [vmem:[%s6512_s5 + $0x98] sm:$0xff]  }
 0x228   : > { %6536 = vst [vmem:[#allocation24_spill] sm:$0xff] %v5313_v57 }
 0x22e   : > { %4215 = vmatmul.mubr.bf16.gmra.mrb[28].mxu0 %v4400_v40  ;;  %4283 = vmatmul.mubr.bf16.gmra.mrb[36].mxu1 %v4401_v44  ;;  %v4417_v40 = vld [vmem:[%s6512_s5 + $0x1a8] sm:$0xff]   ;;  %v4418_v44 = vld [vmem:[%s6512_s5 + $0xa0] sm:$0xff]  }
 0x22f   : > { %4218 = vmatprep.mubr.bf16.mxu0 %v4402_v39  ;;  %4286 = vmatprep.mubr.bf16.mxu1 %v4403_v30  ;;  %v4419_v39 = vld [vmem:[%s6512_s5 + $0x1b0] sm:$0xff]   ;;  %v5327_v30 = vpop.permute.xlu1 %1263 }
 0x230   : > { %6537 = vst [vmem:[#allocation25_spill] sm:$0xff] %v5327_v30 }
 0x236   : > { %4219 = vmatmul.mubr.bf16.gmra.mrb[32].mxu0 %v4404_v6  ;;  %4287 = vmatmul.mubr.bf16.gmra.mrb[40].mxu1 %v4405_v5  ;;  %v5329_v6 = vpop.permute.xlu0 %1268  ;;  %v4420_v5 = vld [vmem:[%s6512_s5 + $0xa8] sm:$0xff]  }
 0x237   : > { %4222 = vmatprep.mubr.bf16.mxu0 %v4406_v10  ;;  %4290 = vmatprep.mubr.bf16.mxu1 %v4407_v11  ;;  %6538 = vst [vmem:[#allocation26_spill] sm:$0xff] %v5329_v6  ;;  %v4421_v10 = vld [vmem:[%s6512_s5 + $0x1b8] sm:$0xff]   ;;  %v4422_v11 = vld [vmem:[%s6512_s5 + $0xb0] sm:$0xff]  }
 0x23e   : > { %4223 = vmatmul.mubr.bf16.gmra.mrb[36].mxu0 %v4408_v50  ;;  %4291 = vmatmul.mubr.bf16.gmra.mrb[44].mxu1 %v4409_v17  ;;  %v4423_v50 = vld [vmem:[%s6512_s5 + $0x1c0] sm:$0xff]   ;;  %v5343_v17 = vpop.permute.xlu1 %1273 }
 0x23f   : > { %4226 = vmatprep.mubr.bf16.mxu0 %v4410_v21  ;;  %4294 = vmatprep.mubr.bf16.mxu1 %v4411_v23  ;;  %6539 = vst [vmem:[#allocation27_spill] sm:$0xff] %v5343_v17  ;;  %v5345_v21 = vpop.permute.xlu0 %1278 }
 0x240   : > { %6540 = vst [vmem:[#allocation28_spill] sm:$0xff] %v5345_v21 }
 0x242   : > { %v5347_v23 = vpop.permute.xlu1 %1283 }
 0x243   : > { %6541 = vst [vmem:[#allocation29_spill] sm:$0xff] %v5347_v23 }
 0x246   : > { %4227 = vmatmul.mubr.bf16.gmra.mrb[40].mxu0 %v4412_v45  ;;  %4295 = vmatmul.mubr.bf16.gmra.mrb[48].mxu1 %v4413_v47  ;;  %v5349_v45 = vpop.permute.xlu0 %1288  ;;  %v4424_v47 = vld [vmem:[%s6512_s5 + $0xb8] sm:$0xff]  }
 0x247   : > { %4230 = vmatprep.mubr.bf16.mxu0 %v4414_v48  ;;  %4298 = vmatprep.mubr.bf16.mxu1 %v4415_v60  ;;  %6542 = vst [vmem:[#allocation30_spill] sm:$0xff] %v5349_v45  ;;  %v4425_v48 = vld [vmem:[%s6512_s5 + $0x1c8] sm:$0xff]   ;;  %v4426_v60 = vld [vmem:[%s6512_s5 + $0xc0] sm:$0xff]  }
 0x24e   : > { %4231 = vmatmul.mubr.bf16.gmra.mrb[44].mxu0 %v4416_v3  ;;  %4299 = vmatmul.mubr.bf16.gmra.mrb[52].mxu1 %v4417_v40  ;;  %v4427_v3 = vld [vmem:[%s6512_s5 + $0x1d0] sm:$0xff]   ;;  %v5363_v40 = vpop.permute.xlu1 %1293 }
 0x24f   : > { %4234 = vmatprep.mubr.bf16.mxu0 %v4418_v44  ;;  %4302 = vmatprep.mubr.bf16.mxu1 %v4419_v39  ;;  %6543 = vst [vmem:[#allocation31_spill] sm:$0xff] %v5363_v40  ;;  %v5365_v44 = vpop.permute.xlu0 %1298  ;;  %v4428_v39 = vld [vmem:[%s6512_s5 + $0xc8] sm:$0xff]  }
 0x250   : > { %6544 = vst [vmem:[#allocation32_spill] sm:$0xff] %v5365_v44  ;;  %v4436_v40 = vld [vmem:[%s6512_s5 + $0xe8] sm:$0xff]  }
 0x256   : > { %4235 = vmatmul.mubr.bf16.gmra.mrb[48].mxu0 %v4420_v5  ;;  %4303 = vmatmul.mubr.bf16.gmra.mrb[56].mxu1 %v4421_v10  ;;  %v4429_v5 = vld [vmem:[%s6512_s5 + $0x1d8] sm:$0xff]   ;;  %v4430_v10 = vld [vmem:[%s6512_s5 + $0xd0] sm:$0xff]  }
 0x257   : > { %4238 = vmatprep.mubr.bf16.mxu0 %v4422_v11  ;;  %4306 = vmatprep.mubr.bf16.mxu1 %v4423_v50  ;;  %v4431_v11 = vld [vmem:[%s6512_s5 + $0x1e0] sm:$0xff]   ;;  %v5379_v50 = vpop.permute.xlu1 %1303 }
 0x258   : > { %6545 = vst [vmem:[#allocation33_spill] sm:$0xff] %v5379_v50  ;;  %v4437_v50 = vld [vmem:[%s6512_s5 + $0x1f8] sm:$0xff]  }
 0x25e   : > { %4239 = vmatmul.mubr.bf16.gmra.mrb[52].mxu0 %v4424_v47  ;;  %4307 = vmatmul.mubr.bf16.gmra.mrb[60].mxu1 %v4425_v48  ;;  %v5381_v47 = vpop.permute.xlu0 %1308  ;;  %v4432_v48 = vld [vmem:[%s6512_s5 + $0xd8] sm:$0xff]  }
 0x25f   : > { %4242 = vmatprep.mubr.bf16.mxu0 %v4426_v60  ;;  %4310 = vmatprep.mubr.bf16.mxu1 %v4427_v3  ;;  %6546 = vst [vmem:[#allocation34_spill] sm:$0xff] %v5381_v47  ;;  %v4433_v60 = vld [vmem:[%s6512_s5 + $0x1e8] sm:$0xff]   ;;  %v4434_v3 = vld [vmem:[%s6512_s5 + $0xe0] sm:$0xff]   ;;  %v4435_v47 = vld [vmem:[%s6512_s5 + $0x1f0] sm:$0xff]  }
 0x266   : > { %4243 = vmatmul.mubr.bf16.gmra.mrb[56].mxu0 %v4428_v39  ;;  %4311 = vmatmul.mubr.bf16.gmra.mrb[64].mxu1 %v4429_v5  ;;  %v5395_v39 = vpop.permute.xlu1 %1313  ;;  %v5397_v5 = vpop.permute.xlu0 %1318 }
 0x267   : > { %4246 = vmatprep.mubr.bf16.mxu0 %v4430_v10  ;;  %4314 = vmatprep.mubr.bf16.mxu1 %v4431_v11  ;;  %6547 = vst [vmem:[#allocation35_spill] sm:$0xff] %v5395_v39  ;;  %6548 = vst [vmem:[#allocation36_spill] sm:$0xff] %v5397_v5  ;;  %v4438_v39 = vld [vmem:[%s6512_s5 + $0xf0] sm:$0xff]  }
 0x26a   : > { %v5399_v10 = vpop.permute.xlu1 %1323  ;;  %v5401_v11 = vpop.permute.xlu0 %1328 }
 0x26b   : > { %6549 = vst [vmem:[#allocation37_spill] sm:$0xff] %v5399_v10  ;;  %6550 = vst [vmem:[#allocation38_spill] sm:$0xff] %v5401_v11 }
 0x26e   : > { %4247 = vmatmul.mubr.bf16.gmra.mrb[60].mxu0 %v4432_v48  ;;  %4315 = vmatmul.mubr.bf16.gmra.mrb[68].mxu1 %v4433_v60  ;;  %v5414_v48 = vpop.permute.xlu0 %1338  ;;  %v4439_v60 = vld [vmem:[%s6512_s5 + $0xf8] sm:$0xff]  }
 0x26f   : > { %4250 = vmatprep.mubr.bf16.mxu0 %v4434_v3  ;;  %4318 = vmatprep.mubr.bf16.mxu1 %v4435_v47  ;;  %v5412_v47 = vpop.permute.xlu1 %1333  ;;  %6552 = vst [vmem:[#allocation40_spill] sm:$0xff] %v5414_v48  ;;  %v4440_v3 = vld [vmem:[%s6512_s5 + $0x100] sm:$0xff]  }
 0x270   : > { %6551 = vst [vmem:[#allocation39_spill] sm:$0xff] %v5412_v47 }
 0x272   : > { %v5424_v10 = vpop.permute.xlu0 %1348 }
 0x273   : > { %v5422_v11 = vpop.permute.xlu1 %1343  ;;  %6554 = vst [vmem:[#allocation42_spill] sm:$0xff] %v5424_v10 }
 0x274   : > { %6553 = vst [vmem:[#allocation41_spill] sm:$0xff] %v5422_v11 }
 0x276   : > { %4251 = vmatmul.mubr.bf16.gmra.mrb[64].mxu0 %v4436_v40  ;;  %4319 = vmatmul.mubr.bf16.gmra.mrb[72].mxu1 %v4437_v50  ;;  %v4441_v40 = vld [vmem:[%s6512_s5 + $0x108] sm:$0xff]  }
 0x277   : > { %4254 = vmatprep.mubr.bf16.mxu0 %v4438_v39  ;;  %v5429_v50 = vpop.permute.xlu1 %1353  ;;  %v5431_v39 = vpop.permute.xlu0 %1358 }
 0x278   : > { %6555 = vst [vmem:[#allocation43_spill] sm:$0xff] %v5429_v50  ;;  %6556 = vst [vmem:[#allocation44_spill] sm:$0xff] %v5431_v39 }
 0x27b   : > { %v5433_v47 = vpop.permute.xlu1 %1363  ;;  %v1369_v48 = vpop.permute.xlu0 %1368 }
 0x27c   : > { %6557 = vst [vmem:[#allocation45_spill] sm:$0xff] %v5433_v47 }
 0x27e   : > { %4255 = vmatmul.mubr.bf16.gmra.mrb[68].mxu0 %v4439_v60 }
 0x27f   : > { %4258 = vmatprep.mubr.bf16.mxu0 %v4440_v3  ;;  %v5435_v5 = vpop.permute.xlu1 %1373  ;;  %v1379_v45 = vpop.permute.xlu0 %1378 }
 0x283   : > { %v1384_v11 = vpop.permute.xlu1 %1383  ;;  %v5437_v44 = vpop.permute.xlu0 %1388 }
 0x286   : > { %4259 = vmatmul.mubr.bf16.gmra.mrb[72].mxu0 %v4441_v40 }
 0x287   : > { %v5439_v60 = vpop.permute.xlu1 %1393  ;;  %v5441_v3 = vpop.permute.xlu0 %1398 }
 0x28b   : > { %v5443_v10 = vpop.permute.xlu1 %1403  ;;  %v5445_v17 = vpop.permute.xlu0 %1408 }
 0x28f   : > { %v5447_v50 = vpop.permute.xlu1 %1413  ;;  %v5449_v40 = vpop.permute.xlu0 %1418 }
 0x293   : > { %v5451_v47 = vpop.permute.xlu1 %1423  ;;  %v5453_v39 = vpop.permute.xlu0 %1428 }
 0x297   : > { %v5455_v23 = vpop.permute.xlu1 %1433  ;;  %v5457_v6 = vpop.permute.xlu0 %1438 }
 0x29b   : > { %v5459_v21 = vpop.permute.xlu1 %1443  ;;  %v5461_v55 = vpop.permute.xlu0 %1448 }
 0x29f   : > { %v5463_v30 = vpop.permute.xlu1 %1453  ;;  %v5465_v37 = vpop.permute.xlu0 %1458 }
 0x2a3   : > { %v5467_v57 = vpop.permute.xlu1 %1463  ;;  %v5469_v54 = vpop.permute.xlu0 %1468 }
 0x2a7   : > { %v5471_v49 = vpop.permute.xlu1 %1473  ;;  %v5473_v56 = vpop.permute.xlu0 %1478 }
 0x2a8   : > { %6558 = vst [vmem:[#allocation46_spill] sm:$0xff] %v5471_v49 }
 0x2ab   : > { %v5475_v28 = vpop.permute.xlu1 %1483  ;;  %v5477_v8 = vpop.permute.xlu0 %1488 }
 0x2ac   : > { %6559 = vst [vmem:[#allocation47_spill] sm:$0xff] %v5477_v8 }
 0x2af   : > { %v5479_v34 = vpop.permute.xlu1 %1493  ;;  %v5481_v36 = vpop.permute.xlu0 %1498 }
 0x2b0   : > { %6560 = vst [vmem:[#allocation48_spill] sm:$0xff] %v5479_v34  ;;  %6561 = vst [vmem:[#allocation49_spill] sm:$0xff] %v5481_v36 }
 0x2b3   : > { %v5487_v36 = vpop.permute.xlu1 %1503  ;;  %v5489_v49 = vpop.permute.xlu0 %1508 }
 0x2b4   : > { %6562 = vst [vmem:[#allocation50_spill] sm:$0xff] %v5487_v36  ;;  %6563 = vst [vmem:[#allocation51_spill] sm:$0xff] %v5489_v49 }
 0x2d9   : > { %v4196_v12 = vpop.f32.mrb[8].mxu0  ;;  %v4264_v0 = vpop.f32.mrb[16].mxu1 }
 0x2da   : > { %v2093_v59 = vadd.f32 %v4196_v12, %v4947_v25  ;;  %v2365_v2 = vadd.f32 %v4264_v0, %v1379_v45  ;;  %v2084_v46 = vpop.f32.mrb[9].mxu0  ;;  %v2356_v58 = vpop.f32.mrb[17].mxu1 }
 0x2db   : > { %v4197_v52 = vpop.f32.mrb[10].mxu0  ;;  %v4265_v1 = vpop.f32.mrb[18].mxu1  ;;  %v2085_v33 = vadd.f32 %v2084_v46, %v4931_v16  ;;  %v2357_v38 = vadd.f32 %v2356_v58, %v1369_v48 }
 0x2dc   : > { %v2087_v24 = vpop.f32.mrb[11].mxu0  ;;  %v2359_v43 = vpop.f32.mrb[19].mxu1  ;;  %v2806_v8 = vsel %vm2595_vm3, %v2365_v2, -inf  ;;  %v2602_v34 = vsel %vm2595_vm3, %v2093_v59, -inf  ;;  %v2096_v25 = vadd.f32 %v4197_v52, %v4942_v22  ;;  %v2368_v45 = vadd.f32 %v4265_v1, %v1384_v11 }
 0x2dd   : > { %2807 = vmax.xlane.f32.xlu1 %v2806_v8  ;;  %2603 = vmax.xlane.f32.xlu0 %v2602_v34  ;;  %v2088_v0 = vadd.f32 %v2087_v24, %v4929_v15  ;;  %v2800_v12 = vsel %vm2595_vm3, %v2357_v38, -inf  ;;  %v2596_v16 = vsel %vm2595_vm3, %v2085_v33, -inf  ;;  %v5498_v38 = vpop.permute.xlu1 %1513  ;;  %v5500_v24 = vpop.permute.xlu0 %1518  ;;  %v2360_v33 = vadd.f32 %v2359_v43, %v5435_v5 }
 0x2de   : > { %v2605_v15 = vsel %vm2595_vm3, %v2096_v25, -inf  ;;  %6564 = vst [vmem:[#allocation52_spill] sm:$0xff] %v5498_v38 }
 0x2df   : > { %v2599_v22 = vsel %vm2595_vm3, %v2088_v0, -inf }
 0x2e1   : > { %v4268_v58 = vpop.f32.mrb[20].mxu1  ;;  %2801 = vmax.xlane.f32.xlu1 %v2800_v12  ;;  %v4200_v46 = vpop.f32.mrb[12].mxu0  ;;  %2597 = vmax.xlane.f32.xlu0 %v2596_v16 }
 0x2e2   : > { %v2100_v2 = vpop.f32.mrb[13].mxu0  ;;  %v2372_v59 = vpop.f32.mrb[21].mxu1  ;;  %v2109_v48 = vadd.f32 %v4200_v46, %v4980_v4  ;;  %v2381_v52 = vadd.f32 %v4268_v58, %v5441_v3  ;;  %v2809_v4 = vsel %vm2595_vm3, %v2368_v45, -inf  ;;  %v2803_v3 = vsel %vm2595_vm3, %v2360_v33, -inf }
 0x2e3   : > { %v4201_v8 = vpop.f32.mrb[14].mxu0  ;;  %v4269_v34 = vpop.f32.mrb[22].mxu1 }
 0x2e4   : > { %v2103_v49 = vpop.f32.mrb[15].mxu0  ;;  %v2375_v36 = vpop.f32.mrb[23].mxu1  ;;  %v2614_v1 = vsel %vm2595_vm3, %v2109_v48, -inf  ;;  %v2818_v5 = vsel %vm2595_vm3, %v2381_v52, -inf  ;;  %v2373_v48 = vadd.f32 %v2372_v59, %v5437_v44 }
 0x2e5   : > { %2600 = vmax.xlane.f32.xlu1 %v2599_v22  ;;  %2606 = vmax.xlane.f32.xlu0 %v2605_v15  ;;  %v2101_v22 = vadd.f32 %v2100_v2, %v4961_v20  ;;  %v2112_v15 = vadd.f32 %v4201_v8, %v4974_v63  ;;  %v5514_v58 = vpop.permute.xlu1 %1523  ;;  %v5516_v45 = vpop.permute.xlu0 %1528  ;;  %v2384_v20 = vadd.f32 %v4269_v34, %v5443_v10 }
 0x2e6   : > { %6565 = vst [vmem:[#allocation53_spill] sm:$0xff] %v5516_v45  ;;  %v2104_v44 = vadd.f32 %v2103_v49, %v4959_v19 }
 0x2e7   : > { %v2608_v63 = vsel %vm2595_vm3, %v2101_v22, -inf  ;;  %v2617_v2 = vsel %vm2595_vm3, %v2112_v15, -inf  ;;  %v2812_v22 = vsel %vm2595_vm3, %v2373_v48, -inf  ;;  %v2821_v15 = vsel %vm2595_vm3, %v2384_v20, -inf }
 0x2e8   : > { %v2611_v49 = vsel %vm2595_vm3, %v2104_v44, -inf }
 0x2e9   : > { %v4204_v11 = vpop.f32.mrb[16].mxu0  ;;  %v4272_v12 = vpop.f32.mrb[24].mxu1  ;;  %2615 = vmax.xlane.f32.xlu1 %v2614_v1  ;;  %2810 = vmax.xlane.f32.xlu0 %v2809_v4 }
 0x2ea   : > { %v2116_v0 = vpop.f32.mrb[17].mxu0  ;;  %v2388_v25 = vpop.f32.mrb[25].mxu1  ;;  %v2125_v10 = vadd.f32 %v4204_v11, %v5013_v35  ;;  %v2397_v19 = vadd.f32 %v4272_v12, %v5449_v40 }
 0x2eb   : > { %v4205_v16 = vpop.f32.mrb[18].mxu0  ;;  %v4273_v46 = vpop.f32.mrb[26].mxu1 }
 0x2ec   : > { %v5508_v38 = vpop.f32.mrb[19].mxu0  ;;  %v5510_v43 = vpop.f32.mrb[27].mxu1  ;;  %v2626_v35 = vsel %vm2595_vm3, %v2125_v10, -inf  ;;  %v2830_v44 = vsel %vm2595_vm3, %v2397_v19, -inf }
 0x2ed   : > { %2819 = vmax.xlane.f32.xlu1 %v2818_v5  ;;  %2804 = vmax.xlane.f32.xlu0 %v2803_v3  ;;  %v5538_v3 = vpop.permute.xlu1 %1533 }
 0x2ee   : > { %6566 = vst [vmem:[#allocation54_spill] sm:$0xff] %v5538_v3  ;;  %v2389_v3 = vadd.f32 %v2388_v25, %v5445_v17  ;;  %v2120_v17 = vadd.f32 %v5508_v38, %v4989_v18 }
 0x2f0   : > { %v2623_v38 = vsel %vm2595_vm3, %v2120_v17, -inf }
 0x2f1   : > { %v4208_v8 = vpop.f32.mrb[20].mxu0  ;;  %v4276_v1 = vpop.f32.mrb[28].mxu1  ;;  %2609 = vmax.xlane.f32.xlu1 %v2608_v63  ;;  %2618 = vmax.xlane.f32.xlu0 %v2617_v2  ;;  %v2376_v2 = vadd.f32 %v2375_v36, %v5439_v60  ;;  %v2117_v36 = vadd.f32 %v2116_v0, %v4991_v29  ;;  %v2128_v60 = vadd.f32 %v4205_v16, %v5005_v31 }
 0x2f2   : > { %v5522_v52 = vpop.f32.mrb[21].mxu0  ;;  %v5524_v33 = vpop.f32.mrb[29].mxu1  ;;  %v2400_v29 = vadd.f32 %v4273_v46, %v5451_v47  ;;  %v2141_v47 = vadd.f32 %v4208_v8, %v5049_v26  ;;  %v2413_v18 = vadd.f32 %v4276_v1, %v5457_v6 }
 0x2f3   : > { %v5526_v4 = vpop.f32.mrb[22].mxu0  ;;  %v5528_v5 = vpop.f32.mrb[30].mxu1  ;;  %v2815_v10 = vsel %vm2595_vm3, %v2376_v2, -inf  ;;  %v2620_v31 = vsel %vm2595_vm3, %v2117_v36, -inf  ;;  %v2629_v0 = vsel %vm2595_vm3, %v2128_v60, -inf  ;;  %v2824_v36 = vsel %vm2595_vm3, %v2389_v3, -inf }
 0x2f4   : > { %v5532_v59 = vpop.f32.mrb[23].mxu0  ;;  %v5534_v34 = vpop.f32.mrb[31].mxu1  ;;  %v2833_v60 = vsel %vm2595_vm3, %v2400_v29, -inf  ;;  %v2638_v26 = vsel %vm2595_vm3, %v2141_v47, -inf  ;;  %v2133_v6 = vadd.f32 %v5522_v52, %v5025_v42  ;;  %v2842_v17 = vsel %vm2595_vm3, %v2413_v18, -inf }
 0x2f5   : > { %2813 = vmax.xlane.f32.xlu1 %v2812_v22  ;;  %2822 = vmax.xlane.f32.xlu0 %v2821_v15  ;;  %v5540_v63 = vpop.permute.xlu0 %1538  ;;  %v2405_v42 = vadd.f32 %v5524_v33, %v5453_v39 }
 0x2f6   : > { %6567 = vst [vmem:[#allocation55_spill] sm:$0xff] %v5540_v63  ;;  %v2632_v52 = vsel %vm2595_vm3, %v2133_v6, -inf }
 0x2f9   : > { %v5546_v11 = vpop.f32.mrb[24].mxu0  ;;  %v5548_v45 = vpop.f32.mrb[32].mxu1  ;;  %2627 = vmax.xlane.f32.xlu1 %v2626_v35  ;;  %2612 = vmax.xlane.f32.xlu0 %v2611_v49 }
 0x2fa   : > { %v5550_v48 = vpop.f32.mrb[25].mxu0  ;;  %v5552_v20 = vpop.f32.mrb[33].mxu1  ;;  %v2157_v33 = vadd.f32 %v5546_v11, %v5086_v9  ;;  %v2429_v9 = vadd.f32 %v5548_v45, %v5465_v37 }
 0x2fb   : > { %v5554_v22 = vpop.f32.mrb[26].mxu0  ;;  %v5556_v15 = vpop.f32.mrb[34].mxu1  ;;  %v2149_v37 = vadd.f32 %v5550_v48, %v5065_v62  ;;  %v2421_v62 = vadd.f32 %v5552_v20, %v5461_v55 }
 0x2fc   : > { %v5560_v40 = vpop.f32.mrb[27].mxu0  ;;  %v5562_v12 = vpop.f32.mrb[35].mxu1  ;;  %v2160_v45 = vadd.f32 %v5554_v22, %v5081_v7  ;;  %v2432_v7 = vadd.f32 %v5556_v15, %v5467_v57 }
 0x2fd   : > { %2831 = vmax.xlane.f32.xlu1 %v2830_v44  ;;  %2816 = vmax.xlane.f32.xlu0 %v2815_v10  ;;  %v5566_v35 = vpop.permute.xlu1 %1543  ;;  %v5568_v49 = vpop.permute.xlu0 %1548  ;;  %v2644_v48 = vsel %vm2595_vm3, %v2149_v37, -inf  ;;  %v2152_v57 = vadd.f32 %v5560_v40, %v5063_v61  ;;  %v2424_v61 = vadd.f32 %v5562_v12, %v5463_v30 }
 0x2fe   : > { %6568 = vst [vmem:[#allocation56_spill] sm:$0xff] %v5568_v49  ;;  %v2392_v49 = vadd.f32 %v5510_v43, %v5447_v50  ;;  %v2144_v50 = vadd.f32 %v5526_v4, %v5043_v51  ;;  %v2416_v51 = vadd.f32 %v5528_v5, %v5459_v21  ;;  %v2136_v21 = vadd.f32 %v5532_v59, %v5023_v41 }
 0x2ff   : > { %v2408_v41 = vadd.f32 %v5534_v34, %v5455_v23  ;;  %v2650_v59 = vsel %vm2595_vm3, %v2157_v33, -inf  ;;  %v2854_v33 = vsel %vm2595_vm3, %v2429_v9, -inf  ;;  %v2653_v22 = vsel %vm2595_vm3, %v2160_v45, -inf }
 0x300   : > { %v2827_v47 = vsel %vm2595_vm3, %v2392_v49, -inf  ;;  %v2641_v4 = vsel %vm2595_vm3, %v2144_v50, -inf  ;;  %v2836_v50 = vsel %vm2595_vm3, %v2405_v42, -inf  ;;  %v2635_v11 = vsel %vm2595_vm3, %v2136_v21, -inf }
 0x301   : > { %v5574_v16 = vpop.f32.mrb[28].mxu0  ;;  %v5576_v63 = vpop.f32.mrb[36].mxu1  ;;  %2621 = vmax.xlane.f32.xlu1 %v2620_v31  ;;  %2630 = vmax.xlane.f32.xlu0 %v2629_v0  ;;  %v2848_v45 = vsel %vm2595_vm3, %v2421_v62, -inf }
 0x302   : > { %v5578_v2 = vpop.f32.mrb[29].mxu0  ;;  %v5580_v19 = vpop.f32.mrb[37].mxu1  ;;  %v2173_v20 = vadd.f32 %v5574_v16, %v5113_v32  ;;  %v2445_v32 = vadd.f32 %v5576_v63, %v5473_v56  ;;  %v2647_v16 = vsel %vm2595_vm3, %v2152_v57, -inf }
 0x303   : > { %v5582_v44 = vpop.f32.mrb[30].mxu0  ;;  %v5584_v10 = vpop.f32.mrb[38].mxu1  ;;  %v2165_v56 = vadd.f32 %v5578_v2, %v5097_v14 }
 0x304   : > { %v5589_v25 = vpop.f32.mrb[31].mxu0  ;;  %v5591_v46 = vpop.f32.mrb[39].mxu1  ;;  %v2662_v40 = vsel %vm2595_vm3, %v2173_v20, -inf  ;;  %v2176_v63 = vadd.f32 %v5582_v44, %v5108_v27  ;;  %v2866_v20 = vsel %vm2595_vm3, %v2445_v32, -inf  ;;  %v2448_v14 = vadd.f32 %v5584_v10, %v5475_v28 }
 0x305   : > { %2825 = vmax.xlane.f32.xlu1 %v2824_v36  ;;  %2834 = vmax.xlane.f32.xlu0 %v2833_v60  ;;  %v5595_v31 = vpop.permute.xlu1 %1553  ;;  %v5597_v0 = vpop.permute.xlu0 %1558  ;;  %v2656_v27 = vsel %vm2595_vm3, %v2165_v56, -inf }
 0x306   : > { %6569 = vst [vmem:[#allocation57_spill] sm:$0xff] %v5595_v31  ;;  %6570 = vst [vmem:[#allocation58_spill] sm:$0xff] %v5597_v0  ;;  %v2665_v2 = vsel %vm2595_vm3, %v2176_v63, -inf }
 0x309   : > { %v5604_v8 = vpop.f32.mrb[32].mxu0  ;;  %v5606_v3 = vpop.f32.mrb[40].mxu1  ;;  %2639 = vmax.xlane.f32.xlu1 %v2638_v26  ;;  %2624 = vmax.xlane.f32.xlu0 %v2623_v38 }
 0x30a   : > { %v5608_v29 = vpop.f32.mrb[33].mxu0  ;;  %v5610_v36 = vpop.f32.mrb[41].mxu1  ;;  %v2189_v10 = vadd.f32 %v5604_v8, %v5139_v53 }
 0x30b   : > { %v5612_v60 = vpop.f32.mrb[34].mxu0  ;;  %v5614_v31 = vpop.f32.mrb[42].mxu1 }
 0x30c   : > { %v5620_v43 = vpop.f32.mrb[35].mxu0  ;;  %v5622_v1 = vpop.f32.mrb[43].mxu1  ;;  %v2674_v53 = vsel %vm2595_vm3, %v2189_v10, -inf  ;;  %v6588_v10 = vld [vmem:[#allocation5_spill] sm:$0xff] }
 0x30d   : > { %2843 = vmax.xlane.f32.xlu1 %v2842_v17  ;;  %2828 = vmax.xlane.f32.xlu0 %v2827_v47  ;;  %v5626_v26 = vpop.permute.xlu1 %1563  ;;  %v5628_v38 = vpop.permute.xlu0 %1568 }
 0x30e   : > { %6571 = vst [vmem:[#allocation59_spill] sm:$0xff] %v5626_v26  ;;  %6572 = vst [vmem:[#allocation60_spill] sm:$0xff] %v5628_v38 }
 0x311   : > { %v5636_v0 = vpop.f32.mrb[36].mxu0  ;;  %v5638_v18 = vpop.f32.mrb[44].mxu1  ;;  %2633 = vmax.xlane.f32.xlu1 %v2632_v52  ;;  %2642 = vmax.xlane.f32.xlu0 %v2641_v4  ;;  %v2845_v52 = vsel %vm2595_vm3, %v2416_v51, -inf }
 0x312   : > { %v5640_v49 = vpop.f32.mrb[37].mxu0  ;;  %v5642_v17 = vpop.f32.mrb[45].mxu1 }
 0x313   : > { %v5644_v47 = vpop.f32.mrb[38].mxu0  ;;  %v5646_v39 = vpop.f32.mrb[46].mxu1 }
 0x314   : > { %v5652_v5 = vpop.f32.mrb[39].mxu0  ;;  %v5654_v6 = vpop.f32.mrb[47].mxu1 }
 0x315   : > { %2837 = vmax.xlane.f32.xlu1 %v2836_v50  ;;  %2846 = vmax.xlane.f32.xlu0 %v2845_v52  ;;  %v5658_v4 = vpop.permute.xlu1 %1573  ;;  %v5660_v38 = vpop.permute.xlu0 %1578 }
 0x316   : > { %6573 = vst [vmem:[#allocation61_spill] sm:$0xff] %v5658_v4  ;;  %6574 = vst [vmem:[#allocation62_spill] sm:$0xff] %v5660_v38 }
 0x319   : > { %v5668_v26 = vpop.f32.mrb[40].mxu0  ;;  %v5670_v42 = vpop.f32.mrb[48].mxu1  ;;  %2651 = vmax.xlane.f32.xlu1 %v2650_v59  ;;  %2636 = vmax.xlane.f32.xlu0 %v2635_v11  ;;  %v2839_v59 = vsel %vm2595_vm3, %v2408_v41, -inf }
 0x31a   : > { %v5672_v51 = vpop.f32.mrb[41].mxu0  ;;  %v5674_v50 = vpop.f32.mrb[49].mxu1 }
 0x31b   : > { %v5676_v52 = vpop.f32.mrb[42].mxu0  ;;  %v5678_v23 = vpop.f32.mrb[50].mxu1 }
 0x31c   : > { %v5684_v34 = vpop.f32.mrb[43].mxu0  ;;  %v5686_v21 = vpop.f32.mrb[51].mxu1 }
 0x31d   : > { %2855 = vmax.xlane.f32.xlu1 %v2854_v33  ;;  %2840 = vmax.xlane.f32.xlu0 %v2839_v59  ;;  %v5690_v11 = vpop.permute.xlu1 %1583  ;;  %v5692_v4 = vpop.permute.xlu0 %1588 }
 0x31e   : > { %6575 = vst [vmem:[#allocation63_spill] sm:$0xff] %v5690_v11  ;;  %6576 = vst [vmem:[#allocation64_spill] sm:$0xff] %v5692_v4 }
 0x321   : > { %v5700_v38 = vpop.f32.mrb[44].mxu0  ;;  %v5702_v9 = vpop.f32.mrb[52].mxu1  ;;  %2645 = vmax.xlane.f32.xlu1 %v2644_v48  ;;  %2654 = vmax.xlane.f32.xlu0 %v2653_v22  ;;  %v2857_v48 = vsel %vm2595_vm3, %v2432_v7, -inf }
 0x322   : > { %v5704_v41 = vpop.f32.mrb[45].mxu0  ;;  %v5706_v33 = vpop.f32.mrb[53].mxu1 }
 0x323   : > { %v5708_v59 = vpop.f32.mrb[46].mxu0  ;;  %v5710_v55 = vpop.f32.mrb[54].mxu1 }
 0x324   : > { %v5716_v15 = vpop.f32.mrb[47].mxu0  ;;  %v5718_v37 = vpop.f32.mrb[55].mxu1 }
 0x325   : > { %2849 = vmax.xlane.f32.xlu1 %v2848_v45  ;;  %2858 = vmax.xlane.f32.xlu0 %v2857_v48  ;;  %v5722_v22 = vpop.permute.xlu1 %1593  ;;  %v5724_v4 = vpop.permute.xlu0 %1598 }
 0x326   : > { %6577 = vst [vmem:[#allocation65_spill] sm:$0xff] %v5722_v22  ;;  %6578 = vst [vmem:[#allocation66_spill] sm:$0xff] %v5724_v4  ;;  %v2437_v4 = vadd.f32 %v5580_v19, %v5469_v54  ;;  %v2168_v54 = vadd.f32 %v5589_v25, %v5095_v13  ;;  %v6582_v13 = vld [vmem:[#allocation46_spill] sm:$0xff] }
 0x327   : > { %v2440_v25 = vadd.f32 %v5591_v46, %v6582_v13 }
 0x328   : > { %v2659_v8 = vsel %vm2595_vm3, %v2168_v54, -inf  ;;  %v2192_v54 = vadd.f32 %v5612_v60, %v6588_v10 }
 0x329   : > { %v5732_v11 = vpop.f32.mrb[48].mxu0  ;;  %v5734_v62 = vpop.f32.mrb[56].mxu1  ;;  %2663 = vmax.xlane.f32.xlu1 %v2662_v40  ;;  %2648 = vmax.xlane.f32.xlu0 %v2647_v16  ;;  %v2851_v40 = vsel %vm2595_vm3, %v2424_v61, -inf }
 0x32a   : > { %v5736_v7 = vpop.f32.mrb[49].mxu0  ;;  %v5738_v45 = vpop.f32.mrb[57].mxu1  ;;  %v2677_v60 = vsel %vm2595_vm3, %v2192_v54, -inf }
 0x32b   : > { %v5740_v48 = vpop.f32.mrb[50].mxu0  ;;  %v5742_v30 = vpop.f32.mrb[58].mxu1 }
 0x32c   : > { %v5748_v12 = vpop.f32.mrb[51].mxu0  ;;  %v5750_v57 = vpop.f32.mrb[59].mxu1 }
 0x32d   : > { %2867 = vmax.xlane.f32.xlu1 %v2866_v20  ;;  %2852 = vmax.xlane.f32.xlu0 %v2851_v40  ;;  %v1604_v16 = vpop.permute.xlu1 %1603  ;;  %v5754_v22 = vpop.permute.xlu0 %1608 }
 0x32e   : > { %6579 = vst [vmem:[#allocation67_spill] sm:$0xff] %v5754_v22 }
 0x331   : > { %v5762_v44 = vpop.f32.mrb[52].mxu0  ;;  %v5764_v32 = vpop.f32.mrb[60].mxu1  ;;  %2657 = vmax.xlane.f32.xlu1 %v2656_v27  ;;  %2666 = vmax.xlane.f32.xlu0 %v2665_v2  ;;  %v2860_v27 = vsel %vm2595_vm3, %v2437_v4, -inf  ;;  %v2869_v2 = vsel %vm2595_vm3, %v2448_v14, -inf }
 0x332   : > { %v5766_v61 = vpop.f32.mrb[53].mxu0  ;;  %v5768_v20 = vpop.f32.mrb[61].mxu1 }
 0x333   : > { %6580 = vst [vmem:[#allocation68_spill] sm:$0xff] %v5768_v20  ;;  %v5772_v19 = vpop.f32.mrb[54].mxu0  ;;  %v4309_v28 = vpop.f32.mrb[62].mxu1  ;;  %v6583_v20 = vld [vmem:[#allocation49_spill] sm:$0xff] }
 0x334   : > { %6581 = vst [vmem:[#allocation69_spill] sm:$0xff] %v5772_v19  ;;  %v5776_v56 = vadd.f32 %v4309_v28, %v1604_v16  ;;  %v5778_v63 = vpop.f32.mrb[55].mxu0  ;;  %v5780_v40 = vpop.f32.mrb[63].mxu1  ;;  %v2461_v19 = vadd.f32 %v5606_v3, %v6583_v20  ;;  %v6587_v3 = vld [vmem:[#allocation4_spill] sm:$0xff] }
 0x335   : > { %2861 = vmax.xlane.f32.xlu1 %v2860_v27  ;;  %2870 = vmax.xlane.f32.xlu0 %v2869_v2  ;;  %v1619_v22 = vpop.permute.xlu0 %1618  ;;  %v2181_v20 = vadd.f32 %v5608_v29, %v6587_v3 }
 0x337   : > { %v2668_v29 = vsel %vm2595_vm3, %v2181_v20, -inf }
 0x339   : > { %v5790_v16 = vpop.f32.mrb[56].mxu0  ;;  %v4312_v28 = vpop.f32.mrb[64].mxu1  ;;  %2675 = vmax.xlane.f32.xlu1 %v2674_v53  ;;  %2660 = vmax.xlane.f32.xlu0 %v2659_v8  ;;  %v2863_v8 = vsel %vm2595_vm3, %v2440_v25, -inf }
 0x33a   : > { %v5792_v4 = vadd.f32 %v4312_v28, %v1619_v22  ;;  %v5794_v14 = vpop.f32.mrb[57].mxu0  ;;  %v5796_v27 = vpop.f32.mrb[65].mxu1  ;;  %v2878_v22 = vsel %vm2595_vm3, %v2461_v19, -inf  ;;  %v6589_v28 = vld [vmem:[#allocation47_spill] sm:$0xff] }
 0x33b   : > { %6585 = vst [vmem:[#allocation49_spill] sm:$0xff] %v5796_v27  ;;  %v5798_v2 = vpop.f32.mrb[58].mxu0  ;;  %v5800_v46 = vpop.f32.mrb[66].mxu1  ;;  %v2453_v27 = vadd.f32 %v5610_v36, %v6589_v28 }
 0x33c   : > { %6584 = vst [vmem:[#allocation46_spill] sm:$0xff] %v5792_v4  ;;  %6586 = vst [vmem:[#allocation70_spill] sm:$0xff] %v5800_v46  ;;  %v5806_v13 = vpop.f32.mrb[59].mxu0  ;;  %v5808_v53 = vpop.f32.mrb[67].mxu1  ;;  %v6590_v46 = vld [vmem:[#allocation50_spill] sm:$0xff] }
 0x33d   : > { %2879 = vmax.xlane.f32.xlu1 %v2878_v22  ;;  %2864 = vmax.xlane.f32.xlu0 %v2863_v8  ;;  %v2464_v4 = vadd.f32 %v5614_v31, %v6590_v46  ;;  %v6594_v8 = vld [vmem:[#allocation3_spill] sm:$0xff]  ;;  %v6595_v46 = vld [vmem:[#allocation8_spill] sm:$0xff] }
 0x33e   : > { %v2184_v31 = vadd.f32 %v5620_v43, %v6594_v8  ;;  %v2205_v20 = vadd.f32 %v5636_v0, %v6595_v46  ;;  %v2477_v43 = vadd.f32 %v5638_v18, %v5500_v24  ;;  %v6602_v18 = vld [vmem:[#allocation9_spill] sm:$0xff] }
 0x340   : > { %v2686_v0 = vsel %vm2595_vm3, %v2205_v20, -inf  ;;  %v2671_v8 = vsel %vm2595_vm3, %v2184_v31, -inf  ;;  %v2208_v31 = vadd.f32 %v5644_v47, %v6602_v18 }
 0x341   : > { %v5818_v3 = vpop.f32.mrb[60].mxu0  ;;  %v5820_v10 = vpop.f32.mrb[68].mxu1  ;;  %2669 = vmax.xlane.f32.xlu1 %v2668_v29  ;;  %2678 = vmax.xlane.f32.xlu0 %v2677_v60  ;;  %v2872_v29 = vsel %vm2595_vm3, %v2453_v27, -inf  ;;  %v2881_v60 = vsel %vm2595_vm3, %v2464_v4, -inf }
 0x342   : > { %v5822_v19 = vpop.f32.mrb[61].mxu0  ;;  %v5824_v25 = vpop.f32.mrb[69].mxu1 }
 0x343   : > { %6591 = vst [vmem:[#allocation4_spill] sm:$0xff] %v5824_v25  ;;  %v5826_v22 = vpop.f32.mrb[62].mxu0  ;;  %v5828_v36 = vpop.f32.mrb[70].mxu1 }
 0x344   : > { %6592 = vst [vmem:[#allocation5_spill] sm:$0xff] %v5826_v22  ;;  %6593 = vst [vmem:[#allocation47_spill] sm:$0xff] %v5828_v36  ;;  %v5834_v54 = vpop.f32.mrb[63].mxu0  ;;  %v5836_v28 = vpop.f32.mrb[71].mxu1  ;;  %v6597_v22 = vld [vmem:[#allocation48_spill] sm:$0xff] }
 0x345   : > { %6596 = vst [vmem:[#allocation50_spill] sm:$0xff] %v5836_v28  ;;  %2873 = vmax.xlane.f32.xlu1 %v2872_v29  ;;  %2882 = vmax.xlane.f32.xlu0 %v2881_v60  ;;  %v5840_v25 = vpop.permute.xlu1 %1613  ;;  %v2456_v36 = vadd.f32 %v5622_v1, %v6597_v22  ;;  %v6601_v22 = vld [vmem:[#allocation7_spill] sm:$0xff] }
 0x346   : > { %v2197_v24 = vadd.f32 %v5640_v49, %v6601_v22  ;;  %v2480_v49 = vadd.f32 %v5646_v39, %v5514_v58  ;;  %v2689_v22 = vsel %vm2595_vm3, %v2208_v31, -inf  ;;  %v6609_v58 = vld [vmem:[#allocation12_spill] sm:$0xff] }
 0x347   : > { %v2221_v39 = vadd.f32 %v5668_v26, %v6609_v58 }
 0x348   : > { %v2680_v47 = vsel %vm2595_vm3, %v2197_v24, -inf }
 0x349   : > { %v5848_v46 = vpop.f32.mrb[64].mxu0  ;;  %v5850_v28 = vpop.f32.mrb[72].mxu1  ;;  %2687 = vmax.xlane.f32.xlu1 %v2686_v0  ;;  %2672 = vmax.xlane.f32.xlu0 %v2671_v8  ;;  %v2890_v0 = vsel %vm2595_vm3, %v2477_v43, -inf  ;;  %v2875_v8 = vsel %vm2595_vm3, %v2456_v36, -inf }
 0x34a   : > { %6598 = vst [vmem:[#allocation3_spill] sm:$0xff] %v5850_v28  ;;  %v5852_v4 = vpop.f32.mrb[65].mxu0  ;;  %v5854_v27 = vpop.f32.mrb[73].mxu1 }
 0x34b   : > { %v5856_v29 = vpop.f32.mrb[66].mxu0  ;;  %v5858_v1 = vpop.f32.mrb[74].mxu1 }
 0x34c   : > { %6599 = vst [vmem:[#allocation8_spill] sm:$0xff] %v5856_v29  ;;  %6600 = vst [vmem:[#allocation48_spill] sm:$0xff] %v5858_v1  ;;  %v5864_v20 = vpop.f32.mrb[67].mxu0  ;;  %v5866_v60 = vpop.f32.mrb[75].mxu1  ;;  %v6604_v29 = vld [vmem:[#allocation51_spill] sm:$0xff] }
 0x34d   : > { %6603 = vst [vmem:[#allocation7_spill] sm:$0xff] %v5866_v60  ;;  %v5870_v28 = vpop.permute.xlu1 %1623  ;;  %2891 = vmax.xlane.f32.xlu1 %v2890_v0  ;;  %2876 = vmax.xlane.f32.xlu0 %v2875_v8  ;;  %v2469_v1 = vadd.f32 %v5642_v17, %v6604_v29  ;;  %v5886_v8 = vpop.permute.xlu0 %1628  ;;  %v6608_v17 = vld [vmem:[#allocation6_spill] sm:$0xff] }
 0x34e   : > { %v2200_v29 = vadd.f32 %v5652_v5, %v6608_v17 }
 0x34f   : > { %v2884_v31 = vsel %vm2595_vm3, %v2469_v1, -inf }
 0x350   : > { %v2683_v5 = vsel %vm2595_vm3, %v2200_v29, -inf }
 0x351   : > { %v5878_v18 = vpop.f32.mrb[68].mxu0  ;;  %2681 = vmax.xlane.f32.xlu1 %v2680_v47  ;;  %2690 = vmax.xlane.f32.xlu0 %v2689_v22  ;;  %v5882_v36 = vpop.permute.xlu1 %1633  ;;  %v2893_v47 = vsel %vm2595_vm3, %v2480_v49, -inf  ;;  %v6610_v22 = vld [vmem:[#allocation52_spill] sm:$0xff] }
 0x352   : > { %6605 = vst [vmem:[#allocation9_spill] sm:$0xff] %v5878_v18  ;;  %v5880_v43 = vpop.f32.mrb[69].mxu0  ;;  %v2698_v18 = vsel %vm2595_vm3, %v2221_v39, -inf  ;;  %v5906_v1 = vpop.permute.xlu0 %1638 }
 0x353   : > { %6606 = vst [vmem:[#allocation51_spill] sm:$0xff] %v5880_v43  ;;  %v5884_v0 = vpop.f32.mrb[70].mxu0  ;;  %v2472_v43 = vadd.f32 %v5654_v6, %v6610_v22  ;;  %v6613_v6 = vld [vmem:[#allocation10_spill] sm:$0xff] }
 0x354   : > { %6607 = vst [vmem:[#allocation71_spill] sm:$0xff] %v5884_v0  ;;  %v5892_v24 = vpop.f32.mrb[71].mxu0  ;;  %v6611_v0 = vld [vmem:[#allocation55_spill] sm:$0xff] }
 0x355   : > { %2885 = vmax.xlane.f32.xlu1 %v2884_v31  ;;  %2894 = vmax.xlane.f32.xlu0 %v2893_v47  ;;  %v2493_v60 = vadd.f32 %v5670_v42, %v6611_v0  ;;  %v5902_v17 = vpop.permute.xlu1 %1643  ;;  %v2213_v31 = vadd.f32 %v5672_v51, %v6613_v6  ;;  %v6614_v42 = vld [vmem:[#allocation13_spill] sm:$0xff]  ;;  %v2887_v47 = vsel %vm2595_vm3, %v2472_v43, -inf  ;;  %v2496_v51 = vadd.f32 %v5678_v23, %v5566_v35  ;;  %v6619_v23 = vld [vmem:[#allocation54_spill] sm:$0xff] }
 0x356   : > { %v2224_v0 = vadd.f32 %v5676_v52, %v6614_v42  ;;  %v5922_v22 = vpop.permute.xlu0 %1648  ;;  %v6618_v42 = vld [vmem:[#allocation16_spill] sm:$0xff] }
 0x357   : > { %v2902_v29 = vsel %vm2595_vm3, %v2493_v60, -inf  ;;  %v2692_v52 = vsel %vm2595_vm3, %v2213_v31, -inf  ;;  %v6617_v60 = vld [vmem:[#allocation11_spill] sm:$0xff]  ;;  %v2488_v31 = vadd.f32 %v5686_v21, %v6619_v23 }
 0x358   : > { %v2701_v6 = vsel %vm2595_vm3, %v2224_v0, -inf  ;;  %v2216_v43 = vadd.f32 %v5684_v34, %v6617_v60  ;;  %v6620_v0 = vld [vmem:[#allocation58_spill] sm:$0xff] }
 0x359   : > { %v5904_v26 = vpop.f32.mrb[72].mxu0  ;;  %2699 = vmax.xlane.f32.xlu1 %v2698_v18  ;;  %2684 = vmax.xlane.f32.xlu0 %v2683_v5  ;;  %v5920_v18 = vpop.permute.xlu1 %1653  ;;  %v6616_v5 = vld [vmem:[#allocation53_spill] sm:$0xff] }
 0x35a   : > { %v5908_v49 = vpop.f32.mrb[73].mxu0  ;;  %v5938_v35 = vpop.permute.xlu0 %1658 }
 0x35b   : > { %v5910_v58 = vpop.f32.mrb[74].mxu0 }
 0x35c   : > { %6612 = vst [vmem:[#allocation6_spill] sm:$0xff] %v5910_v58  ;;  %v5916_v39 = vpop.f32.mrb[75].mxu0  ;;  %v2485_v58 = vadd.f32 %v5674_v50, %v6616_v5  ;;  %v2509_v5 = vadd.f32 %v5702_v9, %v6620_v0 }
 0x35d   : > { %6615 = vst [vmem:[#allocation12_spill] sm:$0xff] %v5916_v39  ;;  %2903 = vmax.xlane.f32.xlu1 %v2902_v29  ;;  %2888 = vmax.xlane.f32.xlu0 %v2887_v47  ;;  %v2237_v29 = vadd.f32 %v5700_v38, %v6618_v42  ;;  %v2905_v39 = vsel %vm2595_vm3, %v2496_v51, -inf  ;;  %v5936_v50 = vpop.permute.xlu1 %1663  ;;  %v2695_v38 = vsel %vm2595_vm3, %v2216_v43, -inf  ;;  %v6622_v42 = vld [vmem:[#allocation17_spill] sm:$0xff] }
 0x35e   : > { %v2896_v47 = vsel %vm2595_vm3, %v2485_v58, -inf  ;;  %v2240_v21 = vadd.f32 %v5708_v59, %v6622_v42  ;;  %v2914_v9 = vsel %vm2595_vm3, %v2509_v5, -inf }
 0x35f   : > { %v2710_v34 = vsel %vm2595_vm3, %v2237_v29, -inf  ;;  %v2899_v29 = vsel %vm2595_vm3, %v2488_v31, -inf }
 0x360   : > { %v2713_v31 = vsel %vm2595_vm3, %v2240_v21, -inf }
 0x361   : > { %2693 = vmax.xlane.f32.xlu1 %v2692_v52  ;;  %2702 = vmax.xlane.f32.xlu0 %v2701_v6  ;;  %v6621_v6 = vld [vmem:[#allocation14_spill] sm:$0xff] }
 0x362   : > { %v2229_v60 = vadd.f32 %v5704_v41, %v6621_v6  ;;  %v6626_v6 = vld [vmem:[#allocation20_spill] sm:$0xff] }
 0x364   : > { %v2704_v5 = vsel %vm2595_vm3, %v2229_v60, -inf  ;;  %v2253_v60 = vadd.f32 %v5732_v11, %v6626_v6 }
 0x365   : > { %2897 = vmax.xlane.f32.xlu1 %v2896_v47  ;;  %2906 = vmax.xlane.f32.xlu0 %v2905_v39 }
 0x369   : > { %2711 = vmax.xlane.f32.xlu1 %v2710_v34  ;;  %2696 = vmax.xlane.f32.xlu0 %v2695_v38  ;;  %v6623_v34 = vld [vmem:[#allocation56_spill] sm:$0xff]  ;;  %v6624_v38 = vld [vmem:[#allocation59_spill] sm:$0xff] }
 0x36a   : > { %v2808_v58 = vpop.xlane.xlu1 %2807  ;;  %v2604_v39 = vpop.xlane.xlu0 %2603  ;;  %v2501_v41 = vadd.f32 %v5706_v33, %v6623_v34  ;;  %v2512_v59 = vadd.f32 %v5710_v55, %v6624_v38  ;;  %v6628_v34 = vld [vmem:[#allocation62_spill] sm:$0xff] }
 0x36b   : > { %v3054_v51 = vmax.f32 %v2808_v58, 0.0  ;;  %v2986_v52 = vmax.f32 %v2604_v39, 0.0 }
 0x36d   : > { %3183 = vst.msk [vmem:[#allocation2 + $0x230] sm:$0xff] %vm3112_vm4, %v3054_v51  ;;  %3115 = vst.msk [vmem:[#allocation2 + $0x10] sm:$0xff] %vm3112_vm4, %v2986_v52  ;;  %2915 = vmax.xlane.f32.xlu1 %v2914_v9  ;;  %2900 = vmax.xlane.f32.xlu0 %v2899_v29  ;;  %v6625_v51 = vld [vmem:[#allocation15_spill] sm:$0xff]  ;;  %v2908_v9 = vsel %vm2595_vm3, %v2501_v41, -inf  ;;  %v2917_v29 = vsel %vm2595_vm3, %v2512_v59, -inf  ;;  %v2525_v41 = vadd.f32 %v5734_v62, %v6628_v34 }
 0x36e   : > { %v2802_v43 = vpop.xlane.xlu1 %2801  ;;  %v2598_v47 = vpop.xlane.xlu0 %2597  ;;  %v2232_v52 = vadd.f32 %v5716_v15, %v6625_v51  ;;  %v6630_v51 = vld [vmem:[#allocation21_spill] sm:$0xff] }
 0x36f   : > { %v3052_v23 = vmax.f32 %v2802_v43, 0.0  ;;  %v2984_v0 = vmax.f32 %v2598_v47, 0.0 }
 0x371   : > { %3181 = vst.msk [vmem:[#allocation2 + $0x220] sm:$0xff] %vm3112_vm4, %v3052_v23  ;;  %3113 = vst.msk [vmem:[#allocation2] sm:$0xff] %vm3112_vm4, %v2984_v0  ;;  %2705 = vmax.xlane.f32.xlu1 %v2704_v5  ;;  %2714 = vmax.xlane.f32.xlu0 %v2713_v31  ;;  %v6627_v23 = vld [vmem:[#allocation57_spill] sm:$0xff]  ;;  %v2722_v5 = vsel %vm2595_vm3, %v2253_v60, -inf  ;;  %v2707_v31 = vsel %vm2595_vm3, %v2232_v52, -inf  ;;  %v2256_v52 = vadd.f32 %v5740_v48, %v6630_v51 }
 0x372   : > { %v2601_v33 = vpop.xlane.xlu1 %2600  ;;  %v2607_v58 = vpop.xlane.xlu0 %2606  ;;  %v2504_v0 = vadd.f32 %v5718_v37, %v6627_v23 }
 0x373   : > { %v2985_v55 = vmax.f32 %v2601_v33, 0.0  ;;  %v2987_v39 = vmax.f32 %v2607_v58, 0.0 }
 0x374   : > { %v3703_v42 = vld [vmem:[#allocation2 + $0x230] sm:$0xff] }
 0x375   : > { %v3635_v21 = vld [vmem:[#allocation2 + $0x10] sm:$0xff]  ;;  %3832 = vst.msk [vmem:[%s5966_s11 + $0x230] sm:$0xff] %vm3112_vm4, %v3703_v42  ;;  %3114 = vst.msk [vmem:[#allocation2 + $0x8] sm:$0xff] %vm3112_vm4, %v2985_v55  ;;  %2909 = vmax.xlane.f32.xlu1 %v2908_v9  ;;  %2918 = vmax.xlane.f32.xlu0 %v2917_v29  ;;  %v6629_v55 = vld [vmem:[#allocation18_spill] sm:$0xff]  ;;  %v2926_v42 = vsel %vm2595_vm3, %v2525_v41, -inf  ;;  %v2725_v41 = vsel %vm2595_vm3, %v2256_v52, -inf }
 0x376   : > { %3764 = vst.msk [vmem:[%s5966_s11 + $0x10] sm:$0xff] %vm3112_vm4, %v3635_v21  ;;  %3116 = vst.msk [vmem:[#allocation2 + $0x18] sm:$0xff] %vm3112_vm4, %v2987_v39  ;;  %v2616_v15 = vpop.xlane.xlu1 %2615  ;;  %v2811_v11 = vpop.xlane.xlu0 %2810  ;;  %v2245_v39 = vadd.f32 %v5736_v7, %v6629_v55  ;;  %v2911_v21 = vsel %vm2595_vm3, %v2504_v0, -inf }
 0x377   : > { %v2990_v43 = vmax.f32 %v2616_v15, 0.0  ;;  %v3055_v47 = vmax.f32 %v2811_v11, 0.0  ;;  %v6631_v15 = vld [vmem:[#allocation60_spill] sm:$0xff] }
 0x378   : > { %v3701_v38 = vld [vmem:[#allocation2 + $0x220] sm:$0xff]  ;;  %v2517_v11 = vadd.f32 %v5738_v45, %v6631_v15  ;;  %v2716_v34 = vsel %vm2595_vm3, %v2245_v39, -inf }
 0x379   : > { %v3633_v59 = vld [vmem:[#allocation2] sm:$0xff]  ;;  %3830 = vst.msk [vmem:[%s5966_s11 + $0x220] sm:$0xff] %vm3112_vm4, %v3701_v38  ;;  %3119 = vst.msk [vmem:[#allocation2 + $0x30] sm:$0xff] %vm3112_vm4, %v2990_v43  ;;  %2723 = vmax.xlane.f32.xlu1 %v2722_v5  ;;  %2708 = vmax.xlane.f32.xlu0 %v2707_v31 }
 0x37a   : > { %3762 = vst.msk [vmem:[%s5966_s11] sm:$0xff] %vm3112_vm4, %v3633_v59  ;;  %3184 = vst.msk [vmem:[#allocation2 + $0x238] sm:$0xff] %vm3112_vm4, %v3055_v47  ;;  %v2820_v37 = vpop.xlane.xlu1 %2819  ;;  %v2805_v62 = vpop.xlane.xlu0 %2804  ;;  %v6632_v43 = vld [vmem:[#allocation63_spill] sm:$0xff]  ;;  %v2920_v55 = vsel %vm2595_vm3, %v2517_v11, -inf }
 0x37b   : > { %v3058_v33 = vmax.f32 %v2820_v37, 0.0  ;;  %v3053_v58 = vmax.f32 %v2805_v62, 0.0  ;;  %v2528_v47 = vadd.f32 %v5742_v30, %v6632_v43  ;;  %v6633_v5 = vld [vmem:[#allocation19_spill] sm:$0xff]  ;;  %v6634_v37 = vld [vmem:[#allocation24_spill] sm:$0xff]  ;;  %v6637_v43 = vld [vmem:[#allocation22_spill] sm:$0xff] }
 0x37c   : > { %v3634_v6 = vld [vmem:[#allocation2 + $0x8] sm:$0xff]  ;;  %v2248_v31 = vadd.f32 %v5748_v12, %v6633_v5  ;;  %v2269_v62 = vadd.f32 %v5762_v44, %v6634_v37 }
 0x37d   : > { %v3636_v60 = vld [vmem:[#allocation2 + $0x18] sm:$0xff]  ;;  %3763 = vst.msk [vmem:[%s5966_s11 + $0x8] sm:$0xff] %vm3112_vm4, %v3634_v6  ;;  %3187 = vst.msk [vmem:[#allocation2 + $0x250] sm:$0xff] %vm3112_vm4, %v3058_v33  ;;  %2927 = vmax.xlane.f32.xlu1 %v2926_v42  ;;  %2912 = vmax.xlane.f32.xlu0 %v2911_v21  ;;  %v2929_v39 = vsel %vm2595_vm3, %v2528_v47, -inf  ;;  %v6635_v6 = vld [vmem:[#allocation61_spill] sm:$0xff]  ;;  %v2261_v47 = vadd.f32 %v5766_v61, %v6637_v43 }
 0x37e   : > { %3765 = vst.msk [vmem:[%s5966_s11 + $0x18] sm:$0xff] %vm3112_vm4, %v3636_v60  ;;  %3182 = vst.msk [vmem:[#allocation2 + $0x228] sm:$0xff] %vm3112_vm4, %v3053_v58  ;;  %v2610_v7 = vpop.xlane.xlu1 %2609  ;;  %v2619_v48 = vpop.xlane.xlu0 %2618  ;;  %v2520_v60 = vadd.f32 %v5750_v57, %v6635_v6  ;;  %v6636_v42 = vld [vmem:[#allocation66_spill] sm:$0xff]  ;;  %v6640_v37 = vld [vmem:[#allocation64_spill] sm:$0xff] }
 0x37f   : > { %v2988_v9 = vmax.f32 %v2610_v7, 0.0  ;;  %v2991_v29 = vmax.f32 %v2619_v48, 0.0  ;;  %v2541_v21 = vadd.f32 %v5764_v32, %v6636_v42 }
 0x380   : > { %v3639_v23 = vld [vmem:[#allocation2 + $0x30] sm:$0xff] }
 0x381   : > { %v3704_v0 = vld [vmem:[#allocation2 + $0x238] sm:$0xff]  ;;  %3768 = vst.msk [vmem:[%s5966_s11 + $0x30] sm:$0xff] %vm3112_vm4, %v3639_v23  ;;  %3117 = vst.msk [vmem:[#allocation2 + $0x20] sm:$0xff] %vm3112_vm4, %v2988_v9  ;;  %2717 = vmax.xlane.f32.xlu1 %v2716_v34  ;;  %2726 = vmax.xlane.f32.xlu0 %v2725_v41  ;;  %v2734_v9 = vsel %vm2595_vm3, %v2269_v62, -inf  ;;  %v6638_v23 = vld [vmem:[#allocation25_spill] sm:$0xff] }
 0x382   : > { %3833 = vst.msk [vmem:[%s5966_s11 + $0x238] sm:$0xff] %vm3112_vm4, %v3704_v0  ;;  %3120 = vst.msk [vmem:[#allocation2 + $0x38] sm:$0xff] %vm3112_vm4, %v2991_v29  ;;  %v2814_v45 = vpop.xlane.xlu1 %2813  ;;  %v2823_v30 = vpop.xlane.xlu0 %2822  ;;  %v2719_v29 = vsel %vm2595_vm3, %v2248_v31, -inf  ;;  %v6639_v0 = vld [vmem:[#allocation69_spill] sm:$0xff]  ;;  %v6641_v62 = vld [vmem:[#allocation68_spill] sm:$0xff] }
 0x383   : > { %v3056_v38 = vmax.f32 %v2814_v45, 0.0  ;;  %v3059_v59 = vmax.f32 %v2823_v30, 0.0  ;;  %v2272_v34 = vadd.f32 %v6639_v0, %v6638_v23  ;;  %v2938_v30 = vsel %vm2595_vm3, %v2541_v21, -inf  ;;  %v6643_v21 = vld [vmem:[#allocation28_spill] sm:$0xff] }
 0x384   : > { %v3707_v33 = vld [vmem:[#allocation2 + $0x250] sm:$0xff] }
 0x385   : > { %v3702_v58 = vld [vmem:[#allocation2 + $0x228] sm:$0xff]  ;;  %3836 = vst.msk [vmem:[%s5966_s11 + $0x250] sm:$0xff] %vm3112_vm4, %v3707_v33  ;;  %3185 = vst.msk [vmem:[#allocation2 + $0x240] sm:$0xff] %vm3112_vm4, %v3056_v38  ;;  %2921 = vmax.xlane.f32.xlu1 %v2920_v55  ;;  %2930 = vmax.xlane.f32.xlu0 %v2929_v39  ;;  %v2923_v38 = vsel %vm2595_vm3, %v2520_v60, -inf  ;;  %v2533_v33 = vadd.f32 %v6641_v62, %v6640_v37  ;;  %v2728_v39 = vsel %vm2595_vm3, %v2261_v47, -inf  ;;  %v6642_v60 = vld [vmem:[#allocation23_spill] sm:$0xff] }
 0x386   : > { %3831 = vst.msk [vmem:[%s5966_s11 + $0x228] sm:$0xff] %vm3112_vm4, %v3702_v58  ;;  %3188 = vst.msk [vmem:[#allocation2 + $0x258] sm:$0xff] %vm3112_vm4, %v3059_v59  ;;  %v2628_v12 = vpop.xlane.xlu1 %2627  ;;  %v2613_v44 = vpop.xlane.xlu0 %2612  ;;  %v2264_v42 = vadd.f32 %v5778_v63, %v6642_v60  ;;  %v6647_v37 = vld [vmem:[#allocation46_spill] sm:$0xff] }
 0x387   : > { %v2994_v51 = vmax.f32 %v2628_v12, 0.0  ;;  %v2989_v52 = vmax.f32 %v2613_v44, 0.0  ;;  %v2737_v12 = vsel %vm2595_vm3, %v2272_v34, -inf  ;;  %v2950_v62 = vsel %vm2595_vm3, %v6647_v37, -inf }
 0x388   : > { %v3637_v7 = vld [vmem:[#allocation2 + $0x20] sm:$0xff]  ;;  %v2731_v0 = vsel %vm2595_vm3, %v2264_v42, -inf }
 0x389   : > { %v3640_v48 = vld [vmem:[#allocation2 + $0x38] sm:$0xff]  ;;  %3766 = vst.msk [vmem:[%s5966_s11 + $0x20] sm:$0xff] %vm3112_vm4, %v3637_v7  ;;  %3123 = vst.msk [vmem:[#allocation2 + $0x50] sm:$0xff] %vm3112_vm4, %v2994_v51  ;;  %2735 = vmax.xlane.f32.xlu1 %v2734_v9  ;;  %2720 = vmax.xlane.f32.xlu0 %v2719_v29  ;;  %v2285_v7 = vadd.f32 %v5790_v16, %v6643_v21  ;;  %v2932_v29 = vsel %vm2595_vm3, %v2533_v33, -inf }
 0x38a   : > { %3769 = vst.msk [vmem:[%s5966_s11 + $0x38] sm:$0xff] %vm3112_vm4, %v3640_v48  ;;  %3118 = vst.msk [vmem:[#allocation2 + $0x28] sm:$0xff] %vm3112_vm4, %v2989_v52  ;;  %v2832_v57 = vpop.xlane.xlu1 %2831  ;;  %v2817_v32 = vpop.xlane.xlu0 %2816 }
 0x38b   : > { %v3062_v15 = vmax.f32 %v2832_v57, 0.0  ;;  %v3057_v11 = vmax.f32 %v2817_v32, 0.0  ;;  %v2941_v57 = vsel %vm2595_vm3, %v5776_v56, -inf  ;;  %v2746_v23 = vsel %vm2595_vm3, %v2285_v7, -inf }
 0x38c   : > { %v3705_v41 = vld [vmem:[#allocation2 + $0x240] sm:$0xff] }
 0x38d   : > { %v3708_v45 = vld [vmem:[#allocation2 + $0x258] sm:$0xff]  ;;  %3834 = vst.msk [vmem:[%s5966_s11 + $0x240] sm:$0xff] %vm3112_vm4, %v3705_v41  ;;  %3191 = vst.msk [vmem:[#allocation2 + $0x270] sm:$0xff] %vm3112_vm4, %v3062_v15  ;;  %2939 = vmax.xlane.f32.xlu1 %v2938_v30  ;;  %2924 = vmax.xlane.f32.xlu0 %v2923_v38 }
 0x38e   : > { %3837 = vst.msk [vmem:[%s5966_s11 + $0x258] sm:$0xff] %vm3112_vm4, %v3708_v45  ;;  %3186 = vst.msk [vmem:[#allocation2 + $0x248] sm:$0xff] %vm3112_vm4, %v3057_v11  ;;  %v2622_v61 = vpop.xlane.xlu1 %2621  ;;  %v2631_v59 = vpop.xlane.xlu0 %2630  ;;  %v6644_v11 = vld [vmem:[#allocation65_spill] sm:$0xff]  ;;  %v6645_v30 = vld [vmem:[#allocation26_spill] sm:$0xff] }
 0x38f   : > { %v2992_v5 = vmax.f32 %v2622_v61, 0.0  ;;  %v2995_v31 = vmax.f32 %v2631_v59, 0.0  ;;  %v2536_v43 = vadd.f32 %v5780_v40, %v6644_v11  ;;  %v2277_v38 = vadd.f32 %v5794_v14, %v6645_v30  ;;  %v6646_v61 = vld [vmem:[#allocation29_spill] sm:$0xff]  ;;  %v6653_v30 = vld [vmem:[#allocation30_spill] sm:$0xff] }
 0x390   : > { %v3643_v58 = vld [vmem:[#allocation2 + $0x50] sm:$0xff]  ;;  %v2288_v59 = vadd.f32 %v5798_v2, %v6646_v61 }
 0x391   : > { %v3638_v55 = vld [vmem:[#allocation2 + $0x28] sm:$0xff]  ;;  %3772 = vst.msk [vmem:[%s5966_s11 + $0x50] sm:$0xff] %vm3112_vm4, %v3643_v58  ;;  %3121 = vst.msk [vmem:[#allocation2 + $0x40] sm:$0xff] %vm3112_vm4, %v2992_v5  ;;  %2729 = vmax.xlane.f32.xlu1 %v2728_v39  ;;  %2738 = vmax.xlane.f32.xlu0 %v2737_v12  ;;  %v2935_v33 = vsel %vm2595_vm3, %v2536_v43, -inf  ;;  %v6648_v39 = vld [vmem:[#allocation67_spill] sm:$0xff]  ;;  %v2740_v42 = vsel %vm2595_vm3, %v2277_v38, -inf  ;;  %v2293_v38 = vadd.f32 %v5822_v19, %v6653_v30 }
 0x392   : > { %3767 = vst.msk [vmem:[%s5966_s11 + $0x28] sm:$0xff] %vm3112_vm4, %v3638_v55  ;;  %3124 = vst.msk [vmem:[#allocation2 + $0x58] sm:$0xff] %vm3112_vm4, %v2995_v31  ;;  %v2826_v44 = vpop.xlane.xlu1 %2825  ;;  %v2835_v51 = vpop.xlane.xlu0 %2834  ;;  %v6649_v12 = vld [vmem:[#allocation49_spill] sm:$0xff]  ;;  %v2749_v21 = vsel %vm2595_vm3, %v2288_v59, -inf }
 0x393   : > { %v3060_v52 = vmax.f32 %v2826_v44, 0.0  ;;  %v3063_v6 = vmax.f32 %v2835_v51, 0.0  ;;  %v2549_v44 = vadd.f32 %v6649_v12, %v6648_v39  ;;  %v6650_v51 = vld [vmem:[#allocation70_spill] sm:$0xff]  ;;  %v6654_v61 = vld [vmem:[#allocation33_spill] sm:$0xff]  ;;  %v6657_v12 = vld [vmem:[#allocation47_spill] sm:$0xff] }
 0x394   : > { %v3711_v48 = vld [vmem:[#allocation2 + $0x270] sm:$0xff] }
 0x395   : > { %v3706_v9 = vld [vmem:[#allocation2 + $0x248] sm:$0xff]  ;;  %3840 = vst.msk [vmem:[%s5966_s11 + $0x270] sm:$0xff] %vm3112_vm4, %v3711_v48  ;;  %3189 = vst.msk [vmem:[#allocation2 + $0x260] sm:$0xff] %vm3112_vm4, %v3060_v52  ;;  %2933 = vmax.xlane.f32.xlu1 %v2932_v29  ;;  %2942 = vmax.xlane.f32.xlu0 %v2941_v57  ;;  %v2560_v52 = vadd.f32 %v6650_v51, %v5870_v28  ;;  %v6651_v29 = vld [vmem:[#allocation27_spill] sm:$0xff]  ;;  %v2944_v11 = vsel %vm2595_vm3, %v2549_v44, -inf  ;;  %v2576_v44 = vadd.f32 %v6657_v12, %v5902_v17 }
 0x396   : > { %3835 = vst.msk [vmem:[%s5966_s11 + $0x248] sm:$0xff] %vm3112_vm4, %v3706_v9  ;;  %3192 = vst.msk [vmem:[#allocation2 + $0x278] sm:$0xff] %vm3112_vm4, %v3063_v6  ;;  %v2640_v63 = vpop.xlane.xlu1 %2639  ;;  %v2625_v16 = vpop.xlane.xlu0 %2624  ;;  %v2280_v57 = vadd.f32 %v5806_v13, %v6651_v29  ;;  %v6655_v59 = vld [vmem:[#allocation5_spill] sm:$0xff] }
 0x397   : > { %v2998_v32 = vmax.f32 %v2640_v63, 0.0  ;;  %v2993_v15 = vmax.f32 %v2625_v16, 0.0  ;;  %v6652_v63 = vld [vmem:[#allocation32_spill] sm:$0xff]  ;;  %v2953_v43 = vsel %vm2595_vm3, %v2560_v52, -inf }
 0x398   : > { %v3641_v56 = vld [vmem:[#allocation2 + $0x40] sm:$0xff]  ;;  %v2301_v16 = vadd.f32 %v5818_v3, %v6652_v63 }
 0x399   : > { %v3644_v47 = vld [vmem:[#allocation2 + $0x58] sm:$0xff]  ;;  %3770 = vst.msk [vmem:[%s5966_s11 + $0x40] sm:$0xff] %vm3112_vm4, %v3641_v56  ;;  %3127 = vst.msk [vmem:[#allocation2 + $0x70] sm:$0xff] %vm3112_vm4, %v2998_v32  ;;  %2747 = vmax.xlane.f32.xlu1 %v2746_v23  ;;  %2732 = vmax.xlane.f32.xlu0 %v2731_v0  ;;  %v2552_v23 = vadd.f32 %v5808_v53, %v5840_v25  ;;  %v2573_v0 = vadd.f32 %v5820_v10, %v5906_v1 }
 0x39a   : > { %3773 = vst.msk [vmem:[%s5966_s11 + $0x58] sm:$0xff] %vm3112_vm4, %v3644_v47  ;;  %3122 = vst.msk [vmem:[#allocation2 + $0x48] sm:$0xff] %vm3112_vm4, %v2993_v15  ;;  %v2844_v34 = vpop.xlane.xlu1 %2843  ;;  %v2829_v40 = vpop.xlane.xlu0 %2828 }
 0x39b   : > { %v3066_v41 = vmax.f32 %v2844_v34, 0.0  ;;  %v3061_v45 = vmax.f32 %v2829_v40, 0.0 }
 0x39c   : > { %v3709_v5 = vld [vmem:[#allocation2 + $0x260] sm:$0xff] }
 0x39d   : > { %v3712_v31 = vld [vmem:[#allocation2 + $0x278] sm:$0xff]  ;;  %3838 = vst.msk [vmem:[%s5966_s11 + $0x260] sm:$0xff] %vm3112_vm4, %v3709_v5  ;;  %3195 = vst.msk [vmem:[#allocation2 + $0x290] sm:$0xff] %vm3112_vm4, %v3066_v41  ;;  %2951 = vmax.xlane.f32.xlu1 %v2950_v62  ;;  %2936 = vmax.xlane.f32.xlu0 %v2935_v33  ;;  %v2758_v41 = vsel %vm2595_vm3, %v2301_v16, -inf  ;;  %v2304_v5 = vadd.f32 %v6655_v59, %v6654_v61  ;;  %v2962_v62 = vsel %vm2595_vm3, %v2573_v0, -inf  ;;  %v2947_v33 = vsel %vm2595_vm3, %v2552_v23, -inf }
 0x39e   : > { %3841 = vst.msk [vmem:[%s5966_s11 + $0x278] sm:$0xff] %vm3112_vm4, %v3712_v31  ;;  %3190 = vst.msk [vmem:[#allocation2 + $0x268] sm:$0xff] %vm3112_vm4, %v3061_v45  ;;  %v2634_v14 = vpop.xlane.xlu1 %2633  ;;  %v2643_v2 = vpop.xlane.xlu0 %2642  ;;  %v2743_v45 = vsel %vm2595_vm3, %v2280_v57, -inf  ;;  %v2965_v16 = vsel %vm2595_vm3, %v2576_v44, -inf  ;;  %v6667_v44 = vld [vmem:[#allocation7_spill] sm:$0xff] }
 0x39f   : > { %v2996_v58 = vmax.f32 %v2634_v14, 0.0  ;;  %v2999_v55 = vmax.f32 %v2643_v2, 0.0 }
 0x3a0   : > { %v3647_v6 = vld [vmem:[#allocation2 + $0x70] sm:$0xff] }
 0x3a1   : > { %v3642_v60 = vld [vmem:[#allocation2 + $0x48] sm:$0xff]  ;;  %3776 = vst.msk [vmem:[%s5966_s11 + $0x70] sm:$0xff] %vm3112_vm4, %v3647_v6  ;;  %3125 = vst.msk [vmem:[#allocation2 + $0x60] sm:$0xff] %vm3112_vm4, %v2996_v58  ;;  %2741 = vmax.xlane.f32.xlu1 %v2740_v42  ;;  %2750 = vmax.xlane.f32.xlu0 %v2749_v21  ;;  %v2752_v6 = vsel %vm2595_vm3, %v2293_v38, -inf }
 0x3a2   : > { %3771 = vst.msk [vmem:[%s5966_s11 + $0x48] sm:$0xff] %vm3112_vm4, %v3642_v60  ;;  %3128 = vst.msk [vmem:[#allocation2 + $0x78] sm:$0xff] %vm3112_vm4, %v2999_v55  ;;  %v2838_v7 = vpop.xlane.xlu1 %2837  ;;  %v2847_v28 = vpop.xlane.xlu0 %2846  ;;  %v6656_v55 = vld [vmem:[#allocation4_spill] sm:$0xff]  ;;  %v2761_v60 = vsel %vm2595_vm3, %v2304_v5, -inf  ;;  %v6664_v5 = vld [vmem:[#allocation35_spill] sm:$0xff] }
 0x3a3   : > { %v3064_v48 = vmax.f32 %v2838_v7, 0.0  ;;  %v3067_v9 = vmax.f32 %v2847_v28, 0.0  ;;  %v2565_v39 = vadd.f32 %v6656_v55, %v5886_v8  ;;  %v6658_v7 = vld [vmem:[#allocation31_spill] sm:$0xff] }
 0x3a4   : > { %v3715_v32 = vld [vmem:[#allocation2 + $0x290] sm:$0xff]  ;;  %v2296_v28 = vadd.f32 %v5834_v54, %v6658_v7 }
 0x3a5   : > { %v3710_v15 = vld [vmem:[#allocation2 + $0x268] sm:$0xff]  ;;  %3844 = vst.msk [vmem:[%s5966_s11 + $0x290] sm:$0xff] %vm3112_vm4, %v3715_v32  ;;  %3193 = vst.msk [vmem:[#allocation2 + $0x280] sm:$0xff] %vm3112_vm4, %v3064_v48  ;;  %2945 = vmax.xlane.f32.xlu1 %v2944_v11  ;;  %2954 = vmax.xlane.f32.xlu0 %v2953_v43  ;;  %v2956_v63 = vsel %vm2595_vm3, %v2565_v39, -inf  ;;  %v6660_v11 = vld [vmem:[#allocation50_spill] sm:$0xff] }
 0x3a6   : > { %3839 = vst.msk [vmem:[%s5966_s11 + $0x268] sm:$0xff] %vm3112_vm4, %v3710_v15  ;;  %3196 = vst.msk [vmem:[#allocation2 + $0x298] sm:$0xff] %vm3112_vm4, %v3067_v9  ;;  %v2652_v13 = vpop.xlane.xlu1 %2651  ;;  %v2637_v3 = vpop.xlane.xlu0 %2636  ;;  %v6659_v48 = vld [vmem:[#allocation36_spill] sm:$0xff]  ;;  %v2568_v43 = vadd.f32 %v6660_v11, %v5882_v36  ;;  %v2755_v0 = vsel %vm2595_vm3, %v2296_v28, -inf }
 0x3a7   : > { %v3002_v56 = vmax.f32 %v2652_v13, 0.0  ;;  %v2997_v47 = vmax.f32 %v2637_v3, 0.0  ;;  %v2317_v9 = vadd.f32 %v5848_v46, %v6659_v48  ;;  %v6661_v13 = vld [vmem:[#allocation34_spill] sm:$0xff] }
 0x3a8   : > { %v3645_v34 = vld [vmem:[#allocation2 + $0x60] sm:$0xff]  ;;  %v2309_v3 = vadd.f32 %v5852_v4, %v6661_v13  ;;  %v2959_v38 = vsel %vm2595_vm3, %v2568_v43, -inf }
 0x3a9   : > { %v3648_v40 = vld [vmem:[#allocation2 + $0x78] sm:$0xff]  ;;  %3774 = vst.msk [vmem:[%s5966_s11 + $0x60] sm:$0xff] %vm3112_vm4, %v3645_v34  ;;  %3131 = vst.msk [vmem:[#allocation2 + $0x90] sm:$0xff] %vm3112_vm4, %v3002_v56  ;;  %2759 = vmax.xlane.f32.xlu1 %v2758_v41  ;;  %2744 = vmax.xlane.f32.xlu0 %v2743_v45  ;;  %v2770_v23 = vsel %vm2595_vm3, %v2317_v9, -inf  ;;  %v2581_v41 = vadd.f32 %v5854_v27, %v5922_v22  ;;  %v6662_v45 = vld [vmem:[#allocation37_spill] sm:$0xff] }
 0x3aa   : > { %3777 = vst.msk [vmem:[%s5966_s11 + $0x78] sm:$0xff] %vm3112_vm4, %v3648_v40  ;;  %3126 = vst.msk [vmem:[#allocation2 + $0x68] sm:$0xff] %vm3112_vm4, %v2997_v47  ;;  %v2856_v53 = vpop.xlane.xlu1 %2855  ;;  %v2841_v10 = vpop.xlane.xlu0 %2840  ;;  %v2764_v30 = vsel %vm2595_vm3, %v2309_v3, -inf  ;;  %v6670_v9 = vld [vmem:[#allocation41_spill] sm:$0xff]  ;;  %v6673_v3 = vld [vmem:[#allocation39_spill] sm:$0xff] }
 0x3ab   : > { %v3070_v25 = vmax.f32 %v2856_v53, 0.0  ;;  %v3065_v1 = vmax.f32 %v2841_v10, 0.0  ;;  %v6663_v53 = vld [vmem:[#allocation8_spill] sm:$0xff] }
 0x3ac   : > { %v3713_v31 = vld [vmem:[#allocation2 + $0x280] sm:$0xff]  ;;  %v2320_v10 = vadd.f32 %v6663_v53, %v6662_v45 }
 0x3ad   : > { %v3716_v37 = vld [vmem:[#allocation2 + $0x298] sm:$0xff]  ;;  %3842 = vst.msk [vmem:[%s5966_s11 + $0x280] sm:$0xff] %vm3112_vm4, %v3713_v31  ;;  %3199 = vst.msk [vmem:[#allocation2 + $0x2b0] sm:$0xff] %vm3112_vm4, %v3070_v25  ;;  %2963 = vmax.xlane.f32.xlu1 %v2962_v62  ;;  %2948 = vmax.xlane.f32.xlu0 %v2947_v33  ;;  %v2312_v31 = vadd.f32 %v5864_v20, %v6664_v5  ;;  %v6666_v62 = vld [vmem:[#allocation9_spill] sm:$0xff] }
 0x3ae   : > { %3845 = vst.msk [vmem:[%s5966_s11 + $0x298] sm:$0xff] %vm3112_vm4, %v3716_v37  ;;  %3194 = vst.msk [vmem:[#allocation2 + $0x288] sm:$0xff] %vm3112_vm4, %v3065_v1  ;;  %v2646_v19 = vpop.xlane.xlu1 %2645  ;;  %v2655_v14 = vpop.xlane.xlu0 %2654  ;;  %v6665_v37 = vld [vmem:[#allocation40_spill] sm:$0xff]  ;;  %v6675_v45 = vld [vmem:[#allocation3_spill] sm:$0xff] }
 0x3af   : > { %v3000_v2 = vmax.f32 %v2646_v19, 0.0  ;;  %v3003_v58 = vmax.f32 %v2655_v14, 0.0  ;;  %v2333_v33 = vadd.f32 %v6666_v62, %v6665_v37  ;;  %v2589_v53 = vadd.f32 %v6675_v45, %v5938_v35  ;;  %v6679_v37 = vld [vmem:[#allocation12_spill] sm:$0xff] }
 0x3b0   : > { %v3651_v51 = vld [vmem:[#allocation2 + $0x90] sm:$0xff] }
 0x3b1   : > { %v3646_v52 = vld [vmem:[#allocation2 + $0x68] sm:$0xff]  ;;  %3780 = vst.msk [vmem:[%s5966_s11 + $0x90] sm:$0xff] %vm3112_vm4, %v3651_v51  ;;  %3129 = vst.msk [vmem:[#allocation2 + $0x80] sm:$0xff] %vm3112_vm4, %v3000_v2  ;;  %2753 = vmax.xlane.f32.xlu1 %v2752_v6  ;;  %2762 = vmax.xlane.f32.xlu0 %v2761_v60  ;;  %v2968_v2 = vsel %vm2595_vm3, %v2581_v41, -inf  ;;  %v2584_v51 = vadd.f32 %v6667_v44, %v5920_v18  ;;  %v6669_v6 = vld [vmem:[#allocation51_spill] sm:$0xff] }
 0x3b2   : > { %3775 = vst.msk [vmem:[%s5966_s11 + $0x68] sm:$0xff] %vm3112_vm4, %v3646_v52  ;;  %3132 = vst.msk [vmem:[#allocation2 + $0x98] sm:$0xff] %vm3112_vm4, %v3003_v58  ;;  %v2850_v8 = vpop.xlane.xlu1 %2849  ;;  %v2859_v17 = vpop.xlane.xlu0 %2858  ;;  %v2773_v58 = vsel %vm2595_vm3, %v2320_v10, -inf  ;;  %v6668_v52 = vld [vmem:[#allocation38_spill] sm:$0xff]  ;;  %v6676_v10 = vld [vmem:[#allocation45_spill] sm:$0xff] }
 0x3b3   : > { %v3068_v42 = vmax.f32 %v2850_v8, 0.0  ;;  %v3071_v21 = vmax.f32 %v2859_v17, 0.0  ;;  %v2325_v60 = vadd.f32 %v6669_v6, %v6668_v52 }
 0x3b4   : > { %v3719_v29 = vld [vmem:[#allocation2 + $0x2b0] sm:$0xff] }
 0x3b5   : > { %v3714_v57 = vld [vmem:[#allocation2 + $0x288] sm:$0xff]  ;;  %3848 = vst.msk [vmem:[%s5966_s11 + $0x2b0] sm:$0xff] %vm3112_vm4, %v3719_v29  ;;  %3197 = vst.msk [vmem:[#allocation2 + $0x2a0] sm:$0xff] %vm3112_vm4, %v3068_v42  ;;  %2957 = vmax.xlane.f32.xlu1 %v2956_v63  ;;  %2966 = vmax.xlane.f32.xlu0 %v2965_v16  ;;  %v2782_v42 = vsel %vm2595_vm3, %v2333_v33, -inf  ;;  %v6671_v29 = vld [vmem:[#allocation71_spill] sm:$0xff] }
 0x3b6   : > { %3843 = vst.msk [vmem:[%s5966_s11 + $0x288] sm:$0xff] %vm3112_vm4, %v3714_v57  ;;  %3200 = vst.msk [vmem:[#allocation2 + $0x2b8] sm:$0xff] %vm3112_vm4, %v3071_v21  ;;  %v2664_v54 = vpop.xlane.xlu1 %2663  ;;  %v2649_v46 = vpop.xlane.xlu0 %2648  ;;  %v2767_v21 = vsel %vm2595_vm3, %v2312_v31, -inf  ;;  %v2336_v57 = vadd.f32 %v6671_v29, %v6670_v9  ;;  %v6672_v63 = vld [vmem:[#allocation44_spill] sm:$0xff]  ;;  %v6678_v31 = vld [vmem:[#allocation43_spill] sm:$0xff] }
 0x3b7   : > { %v3006_v32 = vmax.f32 %v2664_v54, 0.0  ;;  %v3001_v15 = vmax.f32 %v2649_v46, 0.0  ;;  %v2349_v16 = vadd.f32 %v5904_v26, %v6672_v63  ;;  %v2344_v62 = vadd.f32 %v6679_v37, %v6678_v31 }
 0x3b8   : > { %v3649_v56 = vld [vmem:[#allocation2 + $0x80] sm:$0xff] }
 0x3b9   : > { %v3652_v47 = vld [vmem:[#allocation2 + $0x98] sm:$0xff]  ;;  %3778 = vst.msk [vmem:[%s5966_s11 + $0x80] sm:$0xff] %vm3112_vm4, %v3649_v56  ;;  %3135 = vst.msk [vmem:[#allocation2 + $0xb0] sm:$0xff] %vm3112_vm4, %v3006_v32  ;;  %2771 = vmax.xlane.f32.xlu1 %v2770_v23  ;;  %2756 = vmax.xlane.f32.xlu0 %v2755_v0  ;;  %v2776_v32 = vsel %vm2595_vm3, %v2325_v60, -inf  ;;  %v2328_v56 = vadd.f32 %v5892_v24, %v6673_v3  ;;  %v2791_v6 = vsel %vm2595_vm3, %v2344_v62, -inf }
 0x3ba   : > { %3781 = vst.msk [vmem:[%s5966_s11 + $0x98] sm:$0xff] %vm3112_vm4, %v3652_v47  ;;  %3130 = vst.msk [vmem:[#allocation2 + $0x88] sm:$0xff] %vm3112_vm4, %v3001_v15  ;;  %v2868_v36 = vpop.xlane.xlu1 %2867  ;;  %v2853_v4 = vpop.xlane.xlu0 %2852  ;;  %v2971_v15 = vsel %vm2595_vm3, %v2584_v51, -inf  ;;  %v6674_v47 = vld [vmem:[#allocation42_spill] sm:$0xff] }
 0x3bb   : > { %v3074_v34 = vmax.f32 %v2868_v36, 0.0  ;;  %v3069_v40 = vmax.f32 %v2853_v4, 0.0  ;;  %v2341_v23 = vadd.f32 %v5908_v49, %v6674_v47  ;;  %v2794_v4 = vsel %vm2595_vm3, %v2349_v16, -inf }
 0x3bc   : > { %v3717_v25 = vld [vmem:[#allocation2 + $0x2a0] sm:$0xff] }
 0x3bd   : > { %v3720_v1 = vld [vmem:[#allocation2 + $0x2b8] sm:$0xff]  ;;  %3846 = vst.msk [vmem:[%s5966_s11 + $0x2a0] sm:$0xff] %vm3112_vm4, %v3717_v25  ;;  %3203 = vst.msk [vmem:[#allocation2 + $0x2d0] sm:$0xff] %vm3112_vm4, %v3074_v34  ;;  %2765 = vmax.xlane.f32.xlu1 %v2764_v30  ;;  %2960 = vmax.xlane.f32.xlu0 %v2959_v38  ;;  %v2785_v34 = vsel %vm2595_vm3, %v2336_v57, -inf }
 0x3be   : > { %3849 = vst.msk [vmem:[%s5966_s11 + $0x2b8] sm:$0xff] %vm3112_vm4, %v3720_v1  ;;  %3198 = vst.msk [vmem:[#allocation2 + $0x2a8] sm:$0xff] %vm3112_vm4, %v3069_v40  ;;  %v2658_v27 = vpop.xlane.xlu1 %2657  ;;  %v2667_v22 = vpop.xlane.xlu0 %2666  ;;  %v6677_v25 = vld [vmem:[#allocation6_spill] sm:$0xff] }
 0x3bf   : > { %v3004_v61 = vmax.f32 %v2658_v27, 0.0  ;;  %v3007_v59 = vmax.f32 %v2667_v22, 0.0  ;;  %v2352_v1 = vadd.f32 %v6677_v25, %v6676_v10  ;;  %v2788_v27 = vsel %vm2595_vm3, %v2341_v23, -inf }
 0x3c0   : > { %v3655_v19 = vld [vmem:[#allocation2 + $0xb0] sm:$0xff]  ;;  %v2779_v22 = vsel %vm2595_vm3, %v2328_v56, -inf }
 0x3c1   : > { %v3650_v14 = vld [vmem:[#allocation2 + $0x88] sm:$0xff]  ;;  %3784 = vst.msk [vmem:[%s5966_s11 + $0xb0] sm:$0xff] %vm3112_vm4, %v3655_v19  ;;  %3133 = vst.msk [vmem:[#allocation2 + $0xa0] sm:$0xff] %vm3112_vm4, %v3004_v61  ;;  %2969 = vmax.xlane.f32.xlu1 %v2968_v2  ;;  %2774 = vmax.xlane.f32.xlu0 %v2773_v58  ;;  %v2797_v2 = vsel %vm2595_vm3, %v2352_v1, -inf }
 0x3c2   : > { %3779 = vst.msk [vmem:[%s5966_s11 + $0x88] sm:$0xff] %vm3112_vm4, %v3650_v14  ;;  %3136 = vst.msk [vmem:[#allocation2 + $0xb8] sm:$0xff] %vm3112_vm4, %v3007_v59  ;;  %v2862_v20 = vpop.xlane.xlu1 %2861  ;;  %v2871_v55 = vpop.xlane.xlu0 %2870  ;;  %v2974_v14 = vsel %vm2595_vm3, %v2589_v53, -inf }
 0x3c3   : > { %v3072_v39 = vmax.f32 %v2862_v20, 0.0  ;;  %v3075_v12 = vmax.f32 %v2871_v55, 0.0 }
 0x3c4   : > { %v3723_v8 = vld [vmem:[#allocation2 + $0x2d0] sm:$0xff] }
 0x3c5   : > { %v3718_v17 = vld [vmem:[#allocation2 + $0x2a8] sm:$0xff]  ;;  %3852 = vst.msk [vmem:[%s5966_s11 + $0x2d0] sm:$0xff] %vm3112_vm4, %v3723_v8  ;;  %3201 = vst.msk [vmem:[#allocation2 + $0x2c0] sm:$0xff] %vm3112_vm4, %v3072_v39  ;;  %2783 = vmax.xlane.f32.xlu1 %v2782_v42  ;;  %2768 = vmax.xlane.f32.xlu0 %v2767_v21 }
 0x3c6   : > { %3847 = vst.msk [vmem:[%s5966_s11 + $0x2a8] sm:$0xff] %vm3112_vm4, %v3718_v17  ;;  %3204 = vst.msk [vmem:[#allocation2 + $0x2d8] sm:$0xff] %vm3112_vm4, %v3075_v12  ;;  %v2676_v18 = vpop.xlane.xlu1 %2675  ;;  %v2661_v7 = vpop.xlane.xlu0 %2660  ;;  %v6680_v12 = vld [vmem:[#allocation48_spill] sm:$0xff] }
 0x3c7   : > { %v3010_v28 = vmax.f32 %v2676_v18, 0.0  ;;  %v3005_v48 = vmax.f32 %v2661_v7, 0.0  ;;  %v2592_v44 = vadd.f32 %v6680_v12, %v5936_v50 }
 0x3c8   : > { %v3653_v54 = vld [vmem:[#allocation2 + $0xa0] sm:$0xff] }
 0x3c9   : > { %v3656_v46 = vld [vmem:[#allocation2 + $0xb8] sm:$0xff]  ;;  %3782 = vst.msk [vmem:[%s5966_s11 + $0xa0] sm:$0xff] %vm3112_vm4, %v3653_v54  ;;  %3139 = vst.msk [vmem:[#allocation2 + $0xd0] sm:$0xff] %vm3112_vm4, %v3010_v28  ;;  %2777 = vmax.xlane.f32.xlu1 %v2776_v32  ;;  %2972 = vmax.xlane.f32.xlu0 %v2971_v15  ;;  %v2977_v18 = vsel %vm2595_vm3, %v2592_v44, -inf }
 0x3ca   : > { %3785 = vst.msk [vmem:[%s5966_s11 + $0xb8] sm:$0xff] %vm3112_vm4, %v3656_v46  ;;  %3134 = vst.msk [vmem:[#allocation2 + $0xa8] sm:$0xff] %vm3112_vm4, %v3005_v48  ;;  %v2880_v11 = vpop.xlane.xlu1 %2879  ;;  %v2865_v26 = vpop.xlane.xlu0 %2864 }
 0x3cb   : > { %v3078_v43 = vmax.f32 %v2880_v11, 0.0  ;;  %v3073_v13 = vmax.f32 %v2865_v26, 0.0 }
 0x3cc   : > { %v3721_v0 = vld [vmem:[#allocation2 + $0x2c0] sm:$0xff] }
 0x3cd   : > { %v3724_v36 = vld [vmem:[#allocation2 + $0x2d8] sm:$0xff]  ;;  %3850 = vst.msk [vmem:[%s5966_s11 + $0x2c0] sm:$0xff] %vm3112_vm4, %v3721_v0  ;;  %3207 = vst.msk [vmem:[#allocation2 + $0x2f0] sm:$0xff] %vm3112_vm4, %v3078_v43  ;;  %2795 = vmax.xlane.f32.xlu1 %v2794_v4  ;;  %2786 = vmax.xlane.f32.xlu0 %v2785_v34 }
 0x3ce   : > { %3853 = vst.msk [vmem:[%s5966_s11 + $0x2d8] sm:$0xff] %vm3112_vm4, %v3724_v36  ;;  %3202 = vst.msk [vmem:[#allocation2 + $0x2c8] sm:$0xff] %vm3112_vm4, %v3073_v13  ;;  %v2670_v24 = vpop.xlane.xlu1 %2669  ;;  %v2679_v49 = vpop.xlane.xlu0 %2678 }
 0x3cf   : > { %v3008_v40 = vmax.f32 %v2670_v24, 0.0  ;;  %v3011_v41 = vmax.f32 %v2679_v49, 0.0 }
 0x3d0   : > { %v3659_v30 = vld [vmem:[#allocation2 + $0xd0] sm:$0xff] }
 0x3d1   : > { %v3654_v38 = vld [vmem:[#allocation2 + $0xa8] sm:$0xff]  ;;  %3788 = vst.msk [vmem:[%s5966_s11 + $0xd0] sm:$0xff] %vm3112_vm4, %v3659_v30  ;;  %3137 = vst.msk [vmem:[#allocation2 + $0xc0] sm:$0xff] %vm3112_vm4, %v3008_v40  ;;  %2789 = vmax.xlane.f32.xlu1 %v2788_v27  ;;  %2780 = vmax.xlane.f32.xlu0 %v2779_v22 }
 0x3d2   : > { %3783 = vst.msk [vmem:[%s5966_s11 + $0xa8] sm:$0xff] %vm3112_vm4, %v3654_v38  ;;  %3140 = vst.msk [vmem:[#allocation2 + $0xd8] sm:$0xff] %vm3112_vm4, %v3011_v41  ;;  %v2874_v35 = vpop.xlane.xlu1 %2873  ;;  %v2883_v61 = vpop.xlane.xlu0 %2882 }
 0x3d3   : > { %v3076_v59 = vmax.f32 %v2874_v35, 0.0  ;;  %v3079_v5 = vmax.f32 %v2883_v61, 0.0 }
 0x3d4   : > { %v3727_v33 = vld [vmem:[#allocation2 + $0x2f0] sm:$0xff] }
 0x3d5   : > { %v3722_v19 = vld [vmem:[#allocation2 + $0x2c8] sm:$0xff]  ;;  %3856 = vst.msk [vmem:[%s5966_s11 + $0x2f0] sm:$0xff] %vm3112_vm4, %v3727_v33  ;;  %3205 = vst.msk [vmem:[#allocation2 + $0x2e0] sm:$0xff] %vm3112_vm4, %v3076_v59  ;;  %2975 = vmax.xlane.f32.xlu1 %v2974_v14  ;;  %2798 = vmax.xlane.f32.xlu0 %v2797_v2 }
 0x3d6   : > { %3851 = vst.msk [vmem:[%s5966_s11 + $0x2c8] sm:$0xff] %vm3112_vm4, %v3722_v19  ;;  %3208 = vst.msk [vmem:[#allocation2 + $0x2f8] sm:$0xff] %vm3112_vm4, %v3079_v5  ;;  %v2688_v58 = vpop.xlane.xlu1 %2687  ;;  %v2673_v20 = vpop.xlane.xlu0 %2672 }
 0x3d7   : > { %v3014_v55 = vmax.f32 %v2688_v58, 0.0  ;;  %v3009_v39 = vmax.f32 %v2673_v20, 0.0 }
 0x3d8   : > { %v3657_v51 = vld [vmem:[#allocation2 + $0xc0] sm:$0xff] }
 0x3d9   : > { %v3660_v52 = vld [vmem:[#allocation2 + $0xd8] sm:$0xff]  ;;  %3786 = vst.msk [vmem:[%s5966_s11 + $0xc0] sm:$0xff] %vm3112_vm4, %v3657_v51  ;;  %3143 = vst.msk [vmem:[#allocation2 + $0xf0] sm:$0xff] %vm3112_vm4, %v3014_v55  ;;  %2792 = vmax.xlane.f32.xlu0 %v2791_v6 }
 0x3da   : > { %3789 = vst.msk [vmem:[%s5966_s11 + $0xd8] sm:$0xff] %vm3112_vm4, %v3660_v52  ;;  %3138 = vst.msk [vmem:[#allocation2 + $0xc8] sm:$0xff] %vm3112_vm4, %v3009_v39  ;;  %v2892_v60 = vpop.xlane.xlu1 %2891  ;;  %v2877_v8 = vpop.xlane.xlu0 %2876 }
 0x3db   : > { %v3082_v17 = vmax.f32 %v2892_v60, 0.0  ;;  %v3077_v50 = vmax.f32 %v2877_v8, 0.0 }
 0x3dc   : > { %v3725_v42 = vld [vmem:[#allocation2 + $0x2e0] sm:$0xff] }
 0x3dd   : > { %v3728_v21 = vld [vmem:[#allocation2 + $0x2f8] sm:$0xff]  ;;  %3854 = vst.msk [vmem:[%s5966_s11 + $0x2e0] sm:$0xff] %vm3112_vm4, %v3725_v42  ;;  %3211 = vst.msk [vmem:[#allocation2 + $0x310] sm:$0xff] %vm3112_vm4, %v3082_v17  ;;  %2978 = vmax.xlane.f32.xlu0 %v2977_v18 }
 0x3de   : > { %3857 = vst.msk [vmem:[%s5966_s11 + $0x2f8] sm:$0xff] %vm3112_vm4, %v3728_v21  ;;  %3206 = vst.msk [vmem:[#allocation2 + $0x2e8] sm:$0xff] %vm3112_vm4, %v3077_v50  ;;  %v2682_v7 = vpop.xlane.xlu1 %2681  ;;  %v2691_v28 = vpop.xlane.xlu0 %2690 }
 0x3df   : > { %v3012_v48 = vmax.f32 %v2682_v7, 0.0  ;;  %v3015_v9 = vmax.f32 %v2691_v28, 0.0 }
 0x3e0   : > { %v3663_v29 = vld [vmem:[#allocation2 + $0xf0] sm:$0xff] }
 0x3e1   : > { %v3658_v57 = vld [vmem:[#allocation2 + $0xc8] sm:$0xff]  ;;  %3792 = vst.msk [vmem:[%s5966_s11 + $0xf0] sm:$0xff] %vm3112_vm4, %v3663_v29  ;;  %3141 = vst.msk [vmem:[#allocation2 + $0xe0] sm:$0xff] %vm3112_vm4, %v3012_v48 }
 0x3e2   : > { %3787 = vst.msk [vmem:[%s5966_s11 + $0xc8] sm:$0xff] %vm3112_vm4, %v3658_v57  ;;  %3144 = vst.msk [vmem:[#allocation2 + $0xf8] sm:$0xff] %vm3112_vm4, %v3015_v9  ;;  %v2886_v63 = vpop.xlane.xlu1 %2885  ;;  %v2895_v16 = vpop.xlane.xlu0 %2894 }
 0x3e3   : > { %v3080_v54 = vmax.f32 %v2886_v63, 0.0  ;;  %v3083_v46 = vmax.f32 %v2895_v16, 0.0 }
 0x3e4   : > { %v3731_v32 = vld [vmem:[#allocation2 + $0x310] sm:$0xff] }
 0x3e5   : > { %v3726_v15 = vld [vmem:[#allocation2 + $0x2e8] sm:$0xff]  ;;  %3860 = vst.msk [vmem:[%s5966_s11 + $0x310] sm:$0xff] %vm3112_vm4, %v3731_v32  ;;  %3209 = vst.msk [vmem:[#allocation2 + $0x300] sm:$0xff] %vm3112_vm4, %v3080_v54 }
 0x3e6   : > { %3855 = vst.msk [vmem:[%s5966_s11 + $0x2e8] sm:$0xff] %vm3112_vm4, %v3726_v15  ;;  %3212 = vst.msk [vmem:[#allocation2 + $0x318] sm:$0xff] %vm3112_vm4, %v3083_v46  ;;  %v2700_v11 = vpop.xlane.xlu1 %2699  ;;  %v2685_v26 = vpop.xlane.xlu0 %2684 }
 0x3e7   : > { %v3018_v43 = vmax.f32 %v2700_v11, 0.0  ;;  %v3013_v13 = vmax.f32 %v2685_v26, 0.0 }
 0x3e8   : > { %v3661_v3 = vld [vmem:[#allocation2 + $0xe0] sm:$0xff] }
 0x3e9   : > { %v3664_v56 = vld [vmem:[#allocation2 + $0xf8] sm:$0xff]  ;;  %3790 = vst.msk [vmem:[%s5966_s11 + $0xe0] sm:$0xff] %vm3112_vm4, %v3661_v3  ;;  %3147 = vst.msk [vmem:[#allocation2 + $0x110] sm:$0xff] %vm3112_vm4, %v3018_v43 }
 0x3ea   : > { %3793 = vst.msk [vmem:[%s5966_s11 + $0xf8] sm:$0xff] %vm3112_vm4, %v3664_v56  ;;  %3142 = vst.msk [vmem:[#allocation2 + $0xe8] sm:$0xff] %vm3112_vm4, %v3013_v13  ;;  %v2904_v47 = vpop.xlane.xlu1 %2903  ;;  %v2889_v23 = vpop.xlane.xlu0 %2888 }
 0x3eb   : > { %v3086_v0 = vmax.f32 %v2904_v47, 0.0  ;;  %v3081_v36 = vmax.f32 %v2889_v23, 0.0 }
 0x3ec   : > { %v3729_v4 = vld [vmem:[#allocation2 + $0x300] sm:$0xff] }
 0x3ed   : > { %v3732_v34 = vld [vmem:[#allocation2 + $0x318] sm:$0xff]  ;;  %3858 = vst.msk [vmem:[%s5966_s11 + $0x300] sm:$0xff] %vm3112_vm4, %v3729_v4  ;;  %3215 = vst.msk [vmem:[#allocation2 + $0x330] sm:$0xff] %vm3112_vm4, %v3086_v0 }
 0x3ee   : > { %3861 = vst.msk [vmem:[%s5966_s11 + $0x318] sm:$0xff] %vm3112_vm4, %v3732_v34  ;;  %3210 = vst.msk [vmem:[#allocation2 + $0x308] sm:$0xff] %vm3112_vm4, %v3081_v36  ;;  %v2694_v24 = vpop.xlane.xlu1 %2693  ;;  %v2703_v49 = vpop.xlane.xlu0 %2702 }
 0x3ef   : > { %v3016_v40 = vmax.f32 %v2694_v24, 0.0  ;;  %v3019_v41 = vmax.f32 %v2703_v49, 0.0 }
 0x3f0   : > { %v3667_v45 = vld [vmem:[#allocation2 + $0x110] sm:$0xff] }
 0x3f1   : > { %v3662_v53 = vld [vmem:[#allocation2 + $0xe8] sm:$0xff]  ;;  %3796 = vst.msk [vmem:[%s5966_s11 + $0x110] sm:$0xff] %vm3112_vm4, %v3667_v45  ;;  %3145 = vst.msk [vmem:[#allocation2 + $0x100] sm:$0xff] %vm3112_vm4, %v3016_v40 }
 0x3f2   : > { %3791 = vst.msk [vmem:[%s5966_s11 + $0xe8] sm:$0xff] %vm3112_vm4, %v3662_v53  ;;  %3148 = vst.msk [vmem:[#allocation2 + $0x118] sm:$0xff] %vm3112_vm4, %v3019_v41  ;;  %v2898_v10 = vpop.xlane.xlu1 %2897  ;;  %v2907_v25 = vpop.xlane.xlu0 %2906 }
 0x3f3   : > { %v3084_v1 = vmax.f32 %v2898_v10, 0.0  ;;  %v3087_v30 = vmax.f32 %v2907_v25, 0.0 }
 0x3f4   : > { %v3735_v38 = vld [vmem:[#allocation2 + $0x330] sm:$0xff] }
 0x3f5   : > { %v3730_v27 = vld [vmem:[#allocation2 + $0x308] sm:$0xff]  ;;  %3864 = vst.msk [vmem:[%s5966_s11 + $0x330] sm:$0xff] %vm3112_vm4, %v3735_v38  ;;  %3213 = vst.msk [vmem:[#allocation2 + $0x320] sm:$0xff] %vm3112_vm4, %v3084_v1 }
 0x3f6   : > { %3859 = vst.msk [vmem:[%s5966_s11 + $0x308] sm:$0xff] %vm3112_vm4, %v3730_v27  ;;  %3216 = vst.msk [vmem:[#allocation2 + $0x338] sm:$0xff] %vm3112_vm4, %v3087_v30  ;;  %v2712_v22 = vpop.xlane.xlu1 %2711  ;;  %v2697_v35 = vpop.xlane.xlu0 %2696 }
 0x3f7   : > { %v3022_v61 = vmax.f32 %v2712_v22, 0.0  ;;  %v3017_v59 = vmax.f32 %v2697_v35, 0.0 }
 0x3f8   : > { %v3665_v5 = vld [vmem:[#allocation2 + $0x100] sm:$0xff] }
 0x3f9   : > { %v3668_v31 = vld [vmem:[#allocation2 + $0x118] sm:$0xff]  ;;  %3794 = vst.msk [vmem:[%s5966_s11 + $0x100] sm:$0xff] %vm3112_vm4, %v3665_v5  ;;  %3151 = vst.msk [vmem:[#allocation2 + $0x130] sm:$0xff] %vm3112_vm4, %v3022_v61 }
 0x3fa   : > { %3797 = vst.msk [vmem:[%s5966_s11 + $0x118] sm:$0xff] %vm3112_vm4, %v3668_v31  ;;  %3146 = vst.msk [vmem:[#allocation2 + $0x108] sm:$0xff] %vm3112_vm4, %v3017_v59  ;;  %v2916_v37 = vpop.xlane.xlu1 %2915  ;;  %v2901_v62 = vpop.xlane.xlu0 %2900 }
 0x3fb   : > { %v3090_v33 = vmax.f32 %v2916_v37, 0.0  ;;  %v3085_v19 = vmax.f32 %v2901_v62, 0.0 }
 0x3fc   : > { %v3733_v14 = vld [vmem:[#allocation2 + $0x320] sm:$0xff] }
 0x3fd   : > { %v3736_v2 = vld [vmem:[#allocation2 + $0x338] sm:$0xff]  ;;  %3862 = vst.msk [vmem:[%s5966_s11 + $0x320] sm:$0xff] %vm3112_vm4, %v3733_v14  ;;  %3219 = vst.msk [vmem:[#allocation2 + $0x350] sm:$0xff] %vm3112_vm4, %v3090_v33 }
 0x3fe   : > { %3865 = vst.msk [vmem:[%s5966_s11 + $0x338] sm:$0xff] %vm3112_vm4, %v3736_v2  ;;  %3214 = vst.msk [vmem:[#allocation2 + $0x328] sm:$0xff] %vm3112_vm4, %v3085_v19  ;;  %v2706_v58 = vpop.xlane.xlu1 %2705  ;;  %v2715_v20 = vpop.xlane.xlu0 %2714 }
 0x3ff   : > { %v3020_v55 = vmax.f32 %v2706_v58, 0.0  ;;  %v3023_v39 = vmax.f32 %v2715_v20, 0.0 }
 0x400   : > { %v3671_v12 = vld [vmem:[#allocation2 + $0x130] sm:$0xff] }
 0x401   : > { %v3666_v44 = vld [vmem:[#allocation2 + $0x108] sm:$0xff]  ;;  %3800 = vst.msk [vmem:[%s5966_s11 + $0x130] sm:$0xff] %vm3112_vm4, %v3671_v12  ;;  %3149 = vst.msk [vmem:[#allocation2 + $0x120] sm:$0xff] %vm3112_vm4, %v3020_v55 }
 0x402   : > { %3795 = vst.msk [vmem:[%s5966_s11 + $0x108] sm:$0xff] %vm3112_vm4, %v3666_v44  ;;  %3152 = vst.msk [vmem:[#allocation2 + $0x138] sm:$0xff] %vm3112_vm4, %v3023_v39  ;;  %v2910_v51 = vpop.xlane.xlu1 %2909  ;;  %v2919_v52 = vpop.xlane.xlu0 %2918 }
 0x403   : > { %v3088_v6 = vmax.f32 %v2910_v51, 0.0  ;;  %v3091_v60 = vmax.f32 %v2919_v52, 0.0 }
 0x404   : > { %v3739_v8 = vld [vmem:[#allocation2 + $0x350] sm:$0xff] }
 0x405   : > { %v3734_v17 = vld [vmem:[#allocation2 + $0x328] sm:$0xff]  ;;  %3868 = vst.msk [vmem:[%s5966_s11 + $0x350] sm:$0xff] %vm3112_vm4, %v3739_v8  ;;  %3217 = vst.msk [vmem:[#allocation2 + $0x340] sm:$0xff] %vm3112_vm4, %v3088_v6 }
 0x406   : > { %3863 = vst.msk [vmem:[%s5966_s11 + $0x328] sm:$0xff] %vm3112_vm4, %v3734_v17  ;;  %3220 = vst.msk [vmem:[#allocation2 + $0x358] sm:$0xff] %vm3112_vm4, %v3091_v60  ;;  %v2724_v50 = vpop.xlane.xlu1 %2723  ;;  %v2709_v42 = vpop.xlane.xlu0 %2708 }
 0x407   : > { %v3026_v21 = vmax.f32 %v2724_v50, 0.0  ;;  %v3021_v18 = vmax.f32 %v2709_v42, 0.0 }
 0x408   : > { %v3669_v7 = vld [vmem:[#allocation2 + $0x120] sm:$0xff] }
 0x409   : > { %v3672_v28 = vld [vmem:[#allocation2 + $0x138] sm:$0xff]  ;;  %3798 = vst.msk [vmem:[%s5966_s11 + $0x120] sm:$0xff] %vm3112_vm4, %v3669_v7  ;;  %3155 = vst.msk [vmem:[#allocation2 + $0x150] sm:$0xff] %vm3112_vm4, %v3026_v21 }
 0x40a   : > { %3801 = vst.msk [vmem:[%s5966_s11 + $0x138] sm:$0xff] %vm3112_vm4, %v3672_v28  ;;  %3150 = vst.msk [vmem:[#allocation2 + $0x128] sm:$0xff] %vm3112_vm4, %v3021_v18  ;;  %v2928_v48 = vpop.xlane.xlu1 %2927  ;;  %v2913_v9 = vpop.xlane.xlu0 %2912 }
 0x40b   : > { %v3094_v29 = vmax.f32 %v2928_v48, 0.0  ;;  %v3089_v57 = vmax.f32 %v2913_v9, 0.0 }
 0x40c   : > { %v3737_v63 = vld [vmem:[#allocation2 + $0x340] sm:$0xff] }
 0x40d   : > { %v3740_v16 = vld [vmem:[#allocation2 + $0x358] sm:$0xff]  ;;  %3866 = vst.msk [vmem:[%s5966_s11 + $0x340] sm:$0xff] %vm3112_vm4, %v3737_v63  ;;  %3223 = vst.msk [vmem:[#allocation2 + $0x370] sm:$0xff] %vm3112_vm4, %v3094_v29 }
 0x40e   : > { %3869 = vst.msk [vmem:[%s5966_s11 + $0x358] sm:$0xff] %vm3112_vm4, %v3740_v16  ;;  %3218 = vst.msk [vmem:[#allocation2 + $0x348] sm:$0xff] %vm3112_vm4, %v3089_v57  ;;  %v2718_v54 = vpop.xlane.xlu1 %2717  ;;  %v2727_v46 = vpop.xlane.xlu0 %2726 }
 0x40f   : > { %v3024_v32 = vmax.f32 %v2718_v54, 0.0  ;;  %v3027_v15 = vmax.f32 %v2727_v46, 0.0 }
 0x410   : > { %v3675_v11 = vld [vmem:[#allocation2 + $0x150] sm:$0xff] }
 0x411   : > { %v3670_v26 = vld [vmem:[#allocation2 + $0x128] sm:$0xff]  ;;  %3804 = vst.msk [vmem:[%s5966_s11 + $0x150] sm:$0xff] %vm3112_vm4, %v3675_v11  ;;  %3153 = vst.msk [vmem:[#allocation2 + $0x140] sm:$0xff] %vm3112_vm4, %v3024_v32 }
 0x412   : > { %3799 = vst.msk [vmem:[%s5966_s11 + $0x128] sm:$0xff] %vm3112_vm4, %v3670_v26  ;;  %3156 = vst.msk [vmem:[#allocation2 + $0x158] sm:$0xff] %vm3112_vm4, %v3027_v15  ;;  %v2922_v43 = vpop.xlane.xlu1 %2921  ;;  %v2931_v13 = vpop.xlane.xlu0 %2930 }
 0x413   : > { %v3092_v3 = vmax.f32 %v2922_v43, 0.0  ;;  %v3095_v56 = vmax.f32 %v2931_v13, 0.0 }
 0x414   : > { %v3743_v47 = vld [vmem:[#allocation2 + $0x370] sm:$0xff] }
 0x415   : > { %v3738_v23 = vld [vmem:[#allocation2 + $0x348] sm:$0xff]  ;;  %3872 = vst.msk [vmem:[%s5966_s11 + $0x370] sm:$0xff] %vm3112_vm4, %v3743_v47  ;;  %3221 = vst.msk [vmem:[#allocation2 + $0x360] sm:$0xff] %vm3112_vm4, %v3092_v3 }
 0x416   : > { %3867 = vst.msk [vmem:[%s5966_s11 + $0x348] sm:$0xff] %vm3112_vm4, %v3738_v23  ;;  %3224 = vst.msk [vmem:[#allocation2 + $0x378] sm:$0xff] %vm3112_vm4, %v3095_v56  ;;  %v2736_v0 = vpop.xlane.xlu1 %2735  ;;  %v2721_v36 = vpop.xlane.xlu0 %2720 }
 0x417   : > { %v3030_v4 = vmax.f32 %v2736_v0, 0.0  ;;  %v3025_v34 = vmax.f32 %v2721_v36, 0.0 }
 0x418   : > { %v3673_v24 = vld [vmem:[#allocation2 + $0x140] sm:$0xff] }
 0x419   : > { %v3676_v49 = vld [vmem:[#allocation2 + $0x158] sm:$0xff]  ;;  %3802 = vst.msk [vmem:[%s5966_s11 + $0x140] sm:$0xff] %vm3112_vm4, %v3673_v24  ;;  %3159 = vst.msk [vmem:[#allocation2 + $0x170] sm:$0xff] %vm3112_vm4, %v3030_v4 }
 0x41a   : > { %3805 = vst.msk [vmem:[%s5966_s11 + $0x158] sm:$0xff] %vm3112_vm4, %v3676_v49  ;;  %3154 = vst.msk [vmem:[#allocation2 + $0x148] sm:$0xff] %vm3112_vm4, %v3025_v34  ;;  %v2940_v40 = vpop.xlane.xlu1 %2939  ;;  %v2925_v41 = vpop.xlane.xlu0 %2924 }
 0x41b   : > { %v3098_v45 = vmax.f32 %v2940_v40, 0.0  ;;  %v3093_v53 = vmax.f32 %v2925_v41, 0.0 }
 0x41c   : > { %v3741_v10 = vld [vmem:[#allocation2 + $0x360] sm:$0xff] }
 0x41d   : > { %v3744_v25 = vld [vmem:[#allocation2 + $0x378] sm:$0xff]  ;;  %3870 = vst.msk [vmem:[%s5966_s11 + $0x360] sm:$0xff] %vm3112_vm4, %v3741_v10  ;;  %3227 = vst.msk [vmem:[#allocation2 + $0x390] sm:$0xff] %vm3112_vm4, %v3098_v45 }
 0x41e   : > { %3873 = vst.msk [vmem:[%s5966_s11 + $0x378] sm:$0xff] %vm3112_vm4, %v3744_v25  ;;  %3222 = vst.msk [vmem:[#allocation2 + $0x368] sm:$0xff] %vm3112_vm4, %v3093_v53  ;;  %v2730_v1 = vpop.xlane.xlu1 %2729  ;;  %v2739_v30 = vpop.xlane.xlu0 %2738 }
 0x41f   : > { %v3028_v38 = vmax.f32 %v2730_v1, 0.0  ;;  %v3031_v27 = vmax.f32 %v2739_v30, 0.0 }
 0x420   : > { %v3679_v22 = vld [vmem:[#allocation2 + $0x170] sm:$0xff] }
 0x421   : > { %v3674_v35 = vld [vmem:[#allocation2 + $0x148] sm:$0xff]  ;;  %3808 = vst.msk [vmem:[%s5966_s11 + $0x170] sm:$0xff] %vm3112_vm4, %v3679_v22  ;;  %3157 = vst.msk [vmem:[#allocation2 + $0x160] sm:$0xff] %vm3112_vm4, %v3028_v38 }
 0x422   : > { %3803 = vst.msk [vmem:[%s5966_s11 + $0x148] sm:$0xff] %vm3112_vm4, %v3674_v35  ;;  %3160 = vst.msk [vmem:[#allocation2 + $0x178] sm:$0xff] %vm3112_vm4, %v3031_v27  ;;  %v2934_v61 = vpop.xlane.xlu1 %2933  ;;  %v2943_v59 = vpop.xlane.xlu0 %2942 }
 0x423   : > { %v3096_v5 = vmax.f32 %v2934_v61, 0.0  ;;  %v3099_v31 = vmax.f32 %v2943_v59, 0.0 }
 0x424   : > { %v3747_v37 = vld [vmem:[#allocation2 + $0x390] sm:$0xff] }
 0x425   : > { %v3742_v62 = vld [vmem:[#allocation2 + $0x368] sm:$0xff]  ;;  %3876 = vst.msk [vmem:[%s5966_s11 + $0x390] sm:$0xff] %vm3112_vm4, %v3747_v37  ;;  %3225 = vst.msk [vmem:[#allocation2 + $0x380] sm:$0xff] %vm3112_vm4, %v3096_v5 }
 0x426   : > { %3871 = vst.msk [vmem:[%s5966_s11 + $0x368] sm:$0xff] %vm3112_vm4, %v3742_v62  ;;  %3228 = vst.msk [vmem:[#allocation2 + $0x398] sm:$0xff] %vm3112_vm4, %v3099_v31  ;;  %v2748_v33 = vpop.xlane.xlu1 %2747  ;;  %v2733_v19 = vpop.xlane.xlu0 %2732 }
 0x427   : > { %v3034_v14 = vmax.f32 %v2748_v33, 0.0  ;;  %v3029_v2 = vmax.f32 %v2733_v19, 0.0 }
 0x428   : > { %v3677_v58 = vld [vmem:[#allocation2 + $0x160] sm:$0xff] }
 0x429   : > { %v3680_v20 = vld [vmem:[#allocation2 + $0x178] sm:$0xff]  ;;  %3806 = vst.msk [vmem:[%s5966_s11 + $0x160] sm:$0xff] %vm3112_vm4, %v3677_v58  ;;  %3163 = vst.msk [vmem:[#allocation2 + $0x190] sm:$0xff] %vm3112_vm4, %v3034_v14 }
 0x42a   : > { %3809 = vst.msk [vmem:[%s5966_s11 + $0x178] sm:$0xff] %vm3112_vm4, %v3680_v20  ;;  %3158 = vst.msk [vmem:[#allocation2 + $0x168] sm:$0xff] %vm3112_vm4, %v3029_v2  ;;  %v2952_v55 = vpop.xlane.xlu1 %2951  ;;  %v2937_v39 = vpop.xlane.xlu0 %2936 }
 0x42b   : > { %v3102_v12 = vmax.f32 %v2952_v55, 0.0  ;;  %v3097_v44 = vmax.f32 %v2937_v39, 0.0 }
 0x42c   : > { %v3745_v51 = vld [vmem:[#allocation2 + $0x380] sm:$0xff] }
 0x42d   : > { %v3748_v52 = vld [vmem:[#allocation2 + $0x398] sm:$0xff]  ;;  %3874 = vst.msk [vmem:[%s5966_s11 + $0x380] sm:$0xff] %vm3112_vm4, %v3745_v51  ;;  %3231 = vst.msk [vmem:[#allocation2 + $0x3b0] sm:$0xff] %vm3112_vm4, %v3102_v12 }
 0x42e   : > { %3877 = vst.msk [vmem:[%s5966_s11 + $0x398] sm:$0xff] %vm3112_vm4, %v3748_v52  ;;  %3226 = vst.msk [vmem:[#allocation2 + $0x388] sm:$0xff] %vm3112_vm4, %v3097_v44  ;;  %v2742_v6 = vpop.xlane.xlu1 %2741  ;;  %v2751_v60 = vpop.xlane.xlu0 %2750 }
 0x42f   : > { %v3032_v8 = vmax.f32 %v2742_v6, 0.0  ;;  %v3035_v17 = vmax.f32 %v2751_v60, 0.0 }
 0x430   : > { %v3683_v50 = vld [vmem:[#allocation2 + $0x190] sm:$0xff] }
 0x431   : > { %v3678_v42 = vld [vmem:[#allocation2 + $0x168] sm:$0xff]  ;;  %3812 = vst.msk [vmem:[%s5966_s11 + $0x190] sm:$0xff] %vm3112_vm4, %v3683_v50  ;;  %3161 = vst.msk [vmem:[#allocation2 + $0x180] sm:$0xff] %vm3112_vm4, %v3032_v8 }
 0x432   : > { %3807 = vst.msk [vmem:[%s5966_s11 + $0x168] sm:$0xff] %vm3112_vm4, %v3678_v42  ;;  %3164 = vst.msk [vmem:[#allocation2 + $0x198] sm:$0xff] %vm3112_vm4, %v3035_v17  ;;  %v2946_v21 = vpop.xlane.xlu1 %2945  ;;  %v2955_v18 = vpop.xlane.xlu0 %2954 }
 0x433   : > { %v3100_v7 = vmax.f32 %v2946_v21, 0.0  ;;  %v3103_v28 = vmax.f32 %v2955_v18, 0.0 }
 0x434   : > { %v3751_v48 = vld [vmem:[#allocation2 + $0x3b0] sm:$0xff] }
 0x435   : > { %v3746_v9 = vld [vmem:[#allocation2 + $0x388] sm:$0xff]  ;;  %3880 = vst.msk [vmem:[%s5966_s11 + $0x3b0] sm:$0xff] %vm3112_vm4, %v3751_v48  ;;  %3229 = vst.msk [vmem:[#allocation2 + $0x3a0] sm:$0xff] %vm3112_vm4, %v3100_v7 }
 0x436   : > { %3875 = vst.msk [vmem:[%s5966_s11 + $0x388] sm:$0xff] %vm3112_vm4, %v3746_v9  ;;  %3232 = vst.msk [vmem:[#allocation2 + $0x3b8] sm:$0xff] %vm3112_vm4, %v3103_v28  ;;  %v2760_v29 = vpop.xlane.xlu1 %2759  ;;  %v2745_v57 = vpop.xlane.xlu0 %2744 }
 0x437   : > { %v3038_v63 = vmax.f32 %v2760_v29, 0.0  ;;  %v3033_v16 = vmax.f32 %v2745_v57, 0.0 }
 0x438   : > { %v3681_v54 = vld [vmem:[#allocation2 + $0x180] sm:$0xff] }
 0x439   : > { %v3684_v46 = vld [vmem:[#allocation2 + $0x198] sm:$0xff]  ;;  %3810 = vst.msk [vmem:[%s5966_s11 + $0x180] sm:$0xff] %vm3112_vm4, %v3681_v54  ;;  %3167 = vst.msk [vmem:[#allocation2 + $0x1b0] sm:$0xff] %vm3112_vm4, %v3038_v63 }
 0x43a   : > { %3813 = vst.msk [vmem:[%s5966_s11 + $0x198] sm:$0xff] %vm3112_vm4, %v3684_v46  ;;  %3162 = vst.msk [vmem:[#allocation2 + $0x188] sm:$0xff] %vm3112_vm4, %v3033_v16  ;;  %v2964_v32 = vpop.xlane.xlu1 %2963  ;;  %v2949_v15 = vpop.xlane.xlu0 %2948 }
 0x43b   : > { %v3106_v11 = vmax.f32 %v2964_v32, 0.0  ;;  %v3101_v26 = vmax.f32 %v2949_v15, 0.0 }
 0x43c   : > { %v3749_v43 = vld [vmem:[#allocation2 + $0x3a0] sm:$0xff] }
 0x43d   : > { %v3752_v13 = vld [vmem:[#allocation2 + $0x3b8] sm:$0xff]  ;;  %3878 = vst.msk [vmem:[%s5966_s11 + $0x3a0] sm:$0xff] %vm3112_vm4, %v3749_v43  ;;  %3235 = vst.msk [vmem:[#allocation2 + $0x3d0] sm:$0xff] %vm3112_vm4, %v3106_v11 }
 0x43e   : > { %3881 = vst.msk [vmem:[%s5966_s11 + $0x3b8] sm:$0xff] %vm3112_vm4, %v3752_v13  ;;  %3230 = vst.msk [vmem:[#allocation2 + $0x3a8] sm:$0xff] %vm3112_vm4, %v3101_v26  ;;  %v2754_v3 = vpop.xlane.xlu1 %2753  ;;  %v2763_v56 = vpop.xlane.xlu0 %2762 }
 0x43f   : > { %v3036_v47 = vmax.f32 %v2754_v3, 0.0  ;;  %v3039_v23 = vmax.f32 %v2763_v56, 0.0 }
 0x440   : > { %v3687_v0 = vld [vmem:[#allocation2 + $0x1b0] sm:$0xff] }
 0x441   : > { %v3682_v36 = vld [vmem:[#allocation2 + $0x188] sm:$0xff]  ;;  %3816 = vst.msk [vmem:[%s5966_s11 + $0x1b0] sm:$0xff] %vm3112_vm4, %v3687_v0  ;;  %3165 = vst.msk [vmem:[#allocation2 + $0x1a0] sm:$0xff] %vm3112_vm4, %v3036_v47 }
 0x442   : > { %3811 = vst.msk [vmem:[%s5966_s11 + $0x188] sm:$0xff] %vm3112_vm4, %v3682_v36  ;;  %3168 = vst.msk [vmem:[#allocation2 + $0x1b8] sm:$0xff] %vm3112_vm4, %v3039_v23  ;;  %v2958_v4 = vpop.xlane.xlu1 %2957  ;;  %v2967_v34 = vpop.xlane.xlu0 %2966 }
 0x443   : > { %v3104_v24 = vmax.f32 %v2958_v4, 0.0  ;;  %v3107_v49 = vmax.f32 %v2967_v34, 0.0 }
 0x444   : > { %v3755_v40 = vld [vmem:[#allocation2 + $0x3d0] sm:$0xff] }
 0x445   : > { %v3750_v41 = vld [vmem:[#allocation2 + $0x3a8] sm:$0xff]  ;;  %3884 = vst.msk [vmem:[%s5966_s11 + $0x3d0] sm:$0xff] %vm3112_vm4, %v3755_v40  ;;  %3233 = vst.msk [vmem:[#allocation2 + $0x3c0] sm:$0xff] %vm3112_vm4, %v3104_v24 }
 0x446   : > { %3879 = vst.msk [vmem:[%s5966_s11 + $0x3a8] sm:$0xff] %vm3112_vm4, %v3750_v41  ;;  %3236 = vst.msk [vmem:[#allocation2 + $0x3d8] sm:$0xff] %vm3112_vm4, %v3107_v49  ;;  %v2772_v45 = vpop.xlane.xlu1 %2771  ;;  %v2757_v53 = vpop.xlane.xlu0 %2756 }
 0x447   : > { %v3042_v10 = vmax.f32 %v2772_v45, 0.0  ;;  %v3037_v25 = vmax.f32 %v2757_v53, 0.0 }
 0x448   : > { %v3685_v1 = vld [vmem:[#allocation2 + $0x1a0] sm:$0xff] }
 0x449   : > { %v3688_v30 = vld [vmem:[#allocation2 + $0x1b8] sm:$0xff]  ;;  %3814 = vst.msk [vmem:[%s5966_s11 + $0x1a0] sm:$0xff] %vm3112_vm4, %v3685_v1  ;;  %3171 = vst.msk [vmem:[#allocation2 + $0x1d0] sm:$0xff] %vm3112_vm4, %v3042_v10 }
 0x44a   : > { %3817 = vst.msk [vmem:[%s5966_s11 + $0x1b8] sm:$0xff] %vm3112_vm4, %v3688_v30  ;;  %3166 = vst.msk [vmem:[#allocation2 + $0x1a8] sm:$0xff] %vm3112_vm4, %v3037_v25  ;;  %v2766_v38 = vpop.xlane.xlu1 %2765  ;;  %v2961_v27 = vpop.xlane.xlu0 %2960 }
 0x44b   : > { %v3040_v22 = vmax.f32 %v2766_v38, 0.0  ;;  %v3105_v35 = vmax.f32 %v2961_v27, 0.0 }
 0x44c   : > { %v3753_v61 = vld [vmem:[#allocation2 + $0x3c0] sm:$0xff] }
 0x44d   : > { %v3756_v59 = vld [vmem:[#allocation2 + $0x3d8] sm:$0xff]  ;;  %3882 = vst.msk [vmem:[%s5966_s11 + $0x3c0] sm:$0xff] %vm3112_vm4, %v3753_v61  ;;  %3169 = vst.msk [vmem:[#allocation2 + $0x1c0] sm:$0xff] %vm3112_vm4, %v3040_v22 }
 0x44e   : > { %3885 = vst.msk [vmem:[%s5966_s11 + $0x3d8] sm:$0xff] %vm3112_vm4, %v3756_v59  ;;  %3234 = vst.msk [vmem:[#allocation2 + $0x3c8] sm:$0xff] %vm3112_vm4, %v3105_v35  ;;  %v2970_v5 = vpop.xlane.xlu1 %2969  ;;  %v2775_v31 = vpop.xlane.xlu0 %2774 }
 0x44f   : > { %v3108_v37 = vmax.f32 %v2970_v5, 0.0  ;;  %v3043_v62 = vmax.f32 %v2775_v31, 0.0 }
 0x450   : > { %v3691_v33 = vld [vmem:[#allocation2 + $0x1d0] sm:$0xff] }
 0x451   : > { %v3686_v19 = vld [vmem:[#allocation2 + $0x1a8] sm:$0xff]  ;;  %3820 = vst.msk [vmem:[%s5966_s11 + $0x1d0] sm:$0xff] %vm3112_vm4, %v3691_v33  ;;  %3237 = vst.msk [vmem:[#allocation2 + $0x3e0] sm:$0xff] %vm3112_vm4, %v3108_v37 }
 0x452   : > { %3815 = vst.msk [vmem:[%s5966_s11 + $0x1a8] sm:$0xff] %vm3112_vm4, %v3686_v19  ;;  %3172 = vst.msk [vmem:[#allocation2 + $0x1d8] sm:$0xff] %vm3112_vm4, %v3043_v62  ;;  %v2784_v14 = vpop.xlane.xlu1 %2783  ;;  %v2769_v2 = vpop.xlane.xlu0 %2768 }
 0x453   : > { %v3046_v58 = vmax.f32 %v2784_v14, 0.0  ;;  %v3041_v20 = vmax.f32 %v2769_v2, 0.0 }
 0x454   : > { %v3689_v55 = vld [vmem:[#allocation2 + $0x1c0] sm:$0xff] }
 0x455   : > { %v3754_v39 = vld [vmem:[#allocation2 + $0x3c8] sm:$0xff]  ;;  %3818 = vst.msk [vmem:[%s5966_s11 + $0x1c0] sm:$0xff] %vm3112_vm4, %v3689_v55  ;;  %3175 = vst.msk [vmem:[#allocation2 + $0x1f0] sm:$0xff] %vm3112_vm4, %v3046_v58 }
 0x456   : > { %3883 = vst.msk [vmem:[%s5966_s11 + $0x3c8] sm:$0xff] %vm3112_vm4, %v3754_v39  ;;  %3170 = vst.msk [vmem:[#allocation2 + $0x1c8] sm:$0xff] %vm3112_vm4, %v3041_v20  ;;  %v2778_v12 = vpop.xlane.xlu1 %2777  ;;  %v2973_v44 = vpop.xlane.xlu0 %2972 }
 0x457   : > { %v3044_v51 = vmax.f32 %v2778_v12, 0.0  ;;  %v3109_v52 = vmax.f32 %v2973_v44, 0.0 }
 0x458   : > { %v3757_v6 = vld [vmem:[#allocation2 + $0x3e0] sm:$0xff] }
 0x459   : > { %v3692_v60 = vld [vmem:[#allocation2 + $0x1d8] sm:$0xff]  ;;  %3886 = vst.msk [vmem:[%s5966_s11 + $0x3e0] sm:$0xff] %vm3112_vm4, %v3757_v6  ;;  %3173 = vst.msk [vmem:[#allocation2 + $0x1e0] sm:$0xff] %vm3112_vm4, %v3044_v51 }
 0x45a   : > { %3821 = vst.msk [vmem:[%s5966_s11 + $0x1d8] sm:$0xff] %vm3112_vm4, %v3692_v60  ;;  %3238 = vst.msk [vmem:[#allocation2 + $0x3e8] sm:$0xff] %vm3112_vm4, %v3109_v52  ;;  %v2796_v8 = vpop.xlane.xlu1 %2795  ;;  %v2787_v17 = vpop.xlane.xlu0 %2786 }
 0x45b   : > { %v3050_v50 = vmax.f32 %v2796_v8, 0.0  ;;  %v3047_v42 = vmax.f32 %v2787_v17, 0.0 }
 0x45c   : > { %v3695_v21 = vld [vmem:[#allocation2 + $0x1f0] sm:$0xff] }
 0x45d   : > { %v3690_v18 = vld [vmem:[#allocation2 + $0x1c8] sm:$0xff]  ;;  %3824 = vst.msk [vmem:[%s5966_s11 + $0x1f0] sm:$0xff] %vm3112_vm4, %v3695_v21  ;;  %3179 = vst.msk [vmem:[#allocation2 + $0x210] sm:$0xff] %vm3112_vm4, %v3050_v50 }
 0x45e   : > { %3819 = vst.msk [vmem:[%s5966_s11 + $0x1c8] sm:$0xff] %vm3112_vm4, %v3690_v18  ;;  %3176 = vst.msk [vmem:[#allocation2 + $0x1f8] sm:$0xff] %vm3112_vm4, %v3047_v42  ;;  %v2790_v7 = vpop.xlane.xlu1 %2789  ;;  %v2781_v28 = vpop.xlane.xlu0 %2780 }
 0x45f   : > { %v3048_v48 = vmax.f32 %v2790_v7, 0.0  ;;  %v3045_v9 = vmax.f32 %v2781_v28, 0.0 }
 0x460   : > { %v3693_v29 = vld [vmem:[#allocation2 + $0x1e0] sm:$0xff] }
 0x461   : > { %v3758_v57 = vld [vmem:[#allocation2 + $0x3e8] sm:$0xff]  ;;  %3822 = vst.msk [vmem:[%s5966_s11 + $0x1e0] sm:$0xff] %vm3112_vm4, %v3693_v29  ;;  %3177 = vst.msk [vmem:[#allocation2 + $0x200] sm:$0xff] %vm3112_vm4, %v3048_v48 }
 0x462   : > { %3887 = vst.msk [vmem:[%s5966_s11 + $0x3e8] sm:$0xff] %vm3112_vm4, %v3758_v57  ;;  %3174 = vst.msk [vmem:[#allocation2 + $0x1e8] sm:$0xff] %vm3112_vm4, %v3045_v9  ;;  %v2976_v63 = vpop.xlane.xlu1 %2975  ;;  %v2799_v16 = vpop.xlane.xlu0 %2798 }
 0x463   : > { %v3110_v54 = vmax.f32 %v2976_v63, 0.0  ;;  %v3051_v46 = vmax.f32 %v2799_v16, 0.0 }
 0x464   : > { %v3699_v32 = vld [vmem:[#allocation2 + $0x210] sm:$0xff] }
 0x465   : > { %v3696_v15 = vld [vmem:[#allocation2 + $0x1f8] sm:$0xff]  ;;  %3828 = vst.msk [vmem:[%s5966_s11 + $0x210] sm:$0xff] %vm3112_vm4, %v3699_v32  ;;  %3239 = vst.msk [vmem:[#allocation2 + $0x3f0] sm:$0xff] %vm3112_vm4, %v3110_v54 }
 0x466   : > { %3825 = vst.msk [vmem:[%s5966_s11 + $0x1f8] sm:$0xff] %vm3112_vm4, %v3696_v15  ;;  %3180 = vst.msk [vmem:[#allocation2 + $0x218] sm:$0xff] %vm3112_vm4, %v3051_v46  ;;  %v2793_v11 = vpop.xlane.xlu0 %2792 }
 0x467   : > { %v3049_v26 = vmax.f32 %v2793_v11, 0.0 }
 0x468   : > { %v3697_v43 = vld [vmem:[#allocation2 + $0x200] sm:$0xff] }
 0x469   : > { %v3694_v13 = vld [vmem:[#allocation2 + $0x1e8] sm:$0xff]  ;;  %3826 = vst.msk [vmem:[%s5966_s11 + $0x200] sm:$0xff] %vm3112_vm4, %v3697_v43  ;;  %3178 = vst.msk [vmem:[#allocation2 + $0x208] sm:$0xff] %vm3112_vm4, %v3049_v26 }
 0x46a   : > { %3823 = vst.msk [vmem:[%s5966_s11 + $0x1e8] sm:$0xff] %vm3112_vm4, %v3694_v13  ;;  %v2979_v3 = vpop.xlane.xlu0 %2978 }
 0x46b   : > { %v3111_v56 = vmax.f32 %v2979_v3, 0.0 }
 0x46c   : > { %v3759_v47 = vld [vmem:[#allocation2 + $0x3f0] sm:$0xff] }
 0x46d   : > { %v3700_v23 = vld [vmem:[#allocation2 + $0x218] sm:$0xff]  ;;  %3888 = vst.msk [vmem:[%s5966_s11 + $0x3f0] sm:$0xff] %vm3112_vm4, %v3759_v47  ;;  %3240 = vst.msk [vmem:[#allocation2 + $0x3f8] sm:$0xff] %vm3112_vm4, %v3111_v56 }
 0x46e   : > { %3829 = vst.msk [vmem:[%s5966_s11 + $0x218] sm:$0xff] %vm3112_vm4, %v3700_v23 }
 0x470   : > { %v3698_v0 = vld [vmem:[#allocation2 + $0x208] sm:$0xff] }
 0x471   : > { %3827 = vst.msk [vmem:[%s5966_s11 + $0x208] sm:$0xff] %vm3112_vm4, %v3698_v0 }
 0x474   : > { %v3760_v36 = vld [vmem:[#allocation2 + $0x3f8] sm:$0xff] }
 0x475   : > { %3889 = vst.msk [vmem:[%s5966_s11 + $0x3f8] sm:$0xff] %vm3112_vm4, %v3760_v36 }
 0x476 PF: > { %s17_s26 = sadd.s32 1, %s4464_s26   ;;  %s6681_s24 = smov %s4460_s25 }
 0x477   : > { %p14_p5 = scmp.ge.s32.totalorder %s17_s26, 4   ;;  %s6682_s25 = smov %s6684_s27 }
 0x479   :  { %16 = sbr.rel (!%p14_p5) target bundleno = 2 (0x2), region = 90 }

</bundles_post_ra>
